<compile_context>
chip_gen: v7x
topology: tpu7x:2x2x1
jax: 0.10.0
libtpu: 0.0.40
codegen_flags: <defaults>
</compile_context>

<pallas_src>
import functools

import jax
import jax.numpy as jnp
import numpy as np
from jax.experimental import pallas as pl
from jax.experimental.pallas import tpu as pltpu


def cross_attention_kernel(x_ref, c_ref, wq_ref, wkv_ref, wo_ref, bo_ref,
                           g_ref, b_ref, bias_ref, o_ref,
                           k_cache, v_cache, *, num_heads, eps):
    H = num_heads
    compute_dtype = x_ref.dtype                    # MXU operand dtype (== input dtype)
    dim = x_ref.shape[-1]
    d = dim // H
    M = c_ref.shape[1]
    TQ = x_ref.shape[1]

    gamma = g_ref[...].astype(jnp.float32)         # (1, dim)
    beta = b_ref[...].astype(jnp.float32)          # (1, dim)

    def layer_norm(t):                             # statistics in f32 on the VPU
        tf = t.astype(jnp.float32)
        mu = jnp.mean(tf, axis=-1, keepdims=True)
        var = jnp.mean((tf - mu) ** 2, axis=-1, keepdims=True)
        return ((tf - mu) * jax.lax.rsqrt(var + eps)) * gamma + beta

    # --- K/V: ONE full-width (dim x 2*dim) MXU contraction, computed once per
    # batch element (query-tile axis is innermost/"arbitrary") and cached in VMEM.
    @pl.when(pl.program_id(1) == 0)
    def _compute_kv():
        cn = layer_norm(c_ref[0]).astype(compute_dtype)              # (M, dim)
        kv = jnp.dot(cn, wkv_ref[...],
                     preferred_element_type=jnp.float32)             # (M, 2*dim)
        kv_heads = jnp.transpose(
            kv.astype(compute_dtype).reshape(M, 2 * H, d), (1, 0, 2))  # (2H, M, d)
        k_cache[...] = kv_heads[:H]                                  # leading-dim split
        v_cache[...] = kv_heads[H:]

    # --- Q: ONE full-width (dim x dim) matmul; softmax scale folded into Wq. ---
    xn = layer_norm(x_ref[0]).astype(compute_dtype)                  # (TQ, dim)
    q = jnp.dot(xn, wq_ref[...], preferred_element_type=jnp.float32)
    q_heads = jnp.transpose(
        q.astype(compute_dtype).reshape(TQ, H, d), (1, 0, 2))        # (H, TQ, d)

    # --- attention: head-batched MXU matmuls, numerically stable f32 softmax ---
    k_heads = k_cache[...]
    v_heads = v_cache[...]
    scores = jax.lax.dot_general(
        q_heads, k_heads,
        dimension_numbers=(((2,), (2,)), ((0,), (0,))),
        preferred_element_type=jnp.float32)                          # (H, TQ, M)
    scores = scores + bias_ref[...].astype(jnp.float32)              # rel. pos. bias

    m = jnp.max(scores, axis=-1, keepdims=True)
    e = jnp.exp(scores - m)
    denom = jnp.sum(e, axis=-1, keepdims=True)
    attn = e * pl.reciprocal(denom, approx=True)     # EUP vrcp; dropout(p=0.0) = id

    out_heads = jax.lax.dot_general(
        attn.astype(compute_dtype), v_heads,
        dimension_numbers=(((2,), (1,)), ((0,), (0,))),
        preferred_element_type=jnp.float32)                          # (H, TQ, d)

    # --- output projection: relayout to (TQ, dim), then ONE full-width matmul ---
    out = jnp.transpose(out_heads.astype(compute_dtype),
                        (1, 0, 2)).reshape(TQ, dim)                  # (TQ, H*d)
    y = jnp.dot(out, wo_ref[...], preferred_element_type=jnp.float32)
    y = y + bo_ref[...].astype(jnp.float32)
    o_ref[0] = y.astype(o_ref.dtype)


def _pick_vmem_limit_bytes():
    cap = 64 * 1024 * 1024
    try:
        info = pltpu.get_tpu_info()
        cap = int(getattr(info, "vmem_capacity_bytes", cap))
    except Exception:
        pass
    # ~3/4 of physical VMEM: 96 MiB on v5e/v6e (128 MiB), 48 MiB on v7x (64 MiB).
    return int(min(cap * 3 // 4, 96 * 1024 * 1024))


def _pick_query_tile(n):
    if n <= 256:
        return n
    for t in (256, 128, 64, 32, 16, 8):
        if n % t == 0:
            return t
    return n


def cross_attention(x, context, rel_bias, params, num_heads):
    B, N, dim = x.shape
    M = context.shape[1]
    H = num_heads
    assert dim % H == 0, "dim must be evenly divisible by num_heads"
    d = dim // H
    scale = float(d) ** (-0.5)
    dtype = x.dtype

    # Host-side weight prep (free): transpose for right-multiplication, fold the
    # softmax scale into Wq, fuse Wk|Wv column-wise, and cast everything to the
    # activation dtype so bf16 activations feed bf16 MXU operands.
    wq_t = (scale * params["wq"]).T.astype(dtype)                      # (dim, dim)
    wkv_t = jnp.concatenate([params["wk"].T, params["wv"].T],
                            axis=1).astype(dtype)                      # (dim, 2*dim)
    wo_t = params["wo"].T.astype(dtype)                                # (dim, dim)
    bo = params["bo"].astype(dtype)                                    # (1, dim)
    gamma = params["ln_gamma"].astype(dtype)
    beta = params["ln_beta"].astype(dtype)
    bias = rel_bias.astype(dtype)                                      # (H, N, M)

    tq = _pick_query_tile(N)
    n_qt = N // tq

    kernel = functools.partial(cross_attention_kernel, num_heads=H, eps=1e-5)

    def build(single_buffer_consts):
        const_kw = ({"pipeline_mode": pl.Buffered(1)}
                    if single_buffer_consts else {})
        bias_kw = const_kw if n_qt == 1 else {}
        in_specs = [
            pl.BlockSpec((1, tq, dim), lambda b, qi: (b, qi, 0)),            # x
            pl.BlockSpec((1, M, dim), lambda b, qi: (b, 0, 0)),              # context
            pl.BlockSpec((dim, dim), lambda b, qi: (0, 0), **const_kw),      # scale*Wq^T
            pl.BlockSpec((dim, 2 * dim), lambda b, qi: (0, 0), **const_kw),  # Wk^T|Wv^T
            pl.BlockSpec((dim, dim), lambda b, qi: (0, 0), **const_kw),      # Wo^T
            pl.BlockSpec((1, dim), lambda b, qi: (0, 0), **const_kw),        # to_out bias
            pl.BlockSpec((1, dim), lambda b, qi: (0, 0), **const_kw),        # ln gamma
            pl.BlockSpec((1, dim), lambda b, qi: (0, 0), **const_kw),        # ln beta
            pl.BlockSpec((H, tq, M), lambda b, qi: (0, qi, 0), **bias_kw),   # rel bias
        ]
        out_specs = pl.BlockSpec((1, tq, dim), lambda b, qi: (b, qi, 0))
        return pl.pallas_call(
            kernel,
            out_shape=jax.ShapeDtypeStruct((B, N, dim), x.dtype),
            grid=(B, n_qt),
            in_specs=in_specs,
            out_specs=out_specs,
            scratch_shapes=[pltpu.VMEM((H, M, d), dtype),   # K cache (per batch elt)
                            pltpu.VMEM((H, M, d), dtype)],  # V cache
            compiler_params=pltpu.CompilerParams(
                dimension_semantics=("parallel", "arbitrary"),
                vmem_limit_bytes=_pick_vmem_limit_bytes()),
        )

    args = (x, context, wq_t, wkv_t, wo_t, bo, gamma, beta, bias)
    try:
        return jax.block_until_ready(build(True)(*args))
    except Exception:
        # Installed JAX may not honor single-buffered pipeline_mode on
        # pallas_call inputs; fall back to default double buffering.
        return jax.block_until_ready(build(False)(*args))


def cross_attention_reference(x, context, rel_bias, params, num_heads):
    """Pure-JAX reference mirroring the PyTorch module."""
    eps = 1e-5
    gamma = params["ln_gamma"][0]
    beta = params["ln_beta"][0]

    def ln(t):
        mu = jnp.mean(t, axis=-1, keepdims=True)
        var = jnp.mean((t - mu) ** 2, axis=-1, keepdims=True)
        return (t - mu) / jnp.sqrt(var + eps) * gamma + beta

    B, N, dim = x.shape
    M = context.shape[1]
    d = dim // num_heads
    xn, cn = ln(x), ln(context)
    q = xn @ params["wq"].T
    k = cn @ params["wk"].T
    v = cn @ params["wv"].T
    q = q.reshape(B, N, num_heads, d).transpose(0, 2, 1, 3)
    k = k.reshape(B, M, num_heads, d).transpose(0, 2, 1, 3)
    v = v.reshape(B, M, num_heads, d).transpose(0, 2, 1, 3)
    scores = jnp.einsum("bhid,bhjd->bhij", q, k) * (d ** -0.5)
    scores = scores + rel_bias[None]
    attn = jax.nn.softmax(scores, axis=-1)
    out = jnp.einsum("bhij,bhjd->bhid", attn, v)
    out = out.transpose(0, 2, 1, 3).reshape(B, N, dim)
    return out @ params["wo"].T + params["bo"][0]


if __name__ == "__main__":
    B, N, M, dim, num_heads = 2, 8, 16, 32, 8

    key = jax.random.PRNGKey(0)
    kx, kc, kb, kwq, kwk, kwv, kwo, kbo, kg, kbt = jax.random.split(key, 10)

    x = jax.random.normal(kx, (B, N, dim), dtype=jnp.float32)
    context = jax.random.normal(kc, (B, M, dim), dtype=jnp.float32)
    rel_bias = 0.1 * jax.random.normal(kb, (num_heads, N, M), dtype=jnp.float32)

    params = {
        "wq": 0.05 * jax.random.normal(kwq, (dim, dim), dtype=jnp.float32),
        "wk": 0.05 * jax.random.normal(kwk, (dim, dim), dtype=jnp.float32),
        "wv": 0.05 * jax.random.normal(kwv, (dim, dim), dtype=jnp.float32),
        "wo": 0.05 * jax.random.normal(kwo, (dim, dim), dtype=jnp.float32),
        "bo": 0.01 * jax.random.normal(kbo, (1, dim), dtype=jnp.float32),
        "ln_gamma": (1.0 + 0.05 * jax.random.normal(kg, (1, dim),
                                                    dtype=jnp.float32)),
        "ln_beta": 0.01 * jax.random.normal(kbt, (1, dim), dtype=jnp.float32),
    }

    out = cross_attention(x, context, rel_bias, params, num_heads)
    out = jax.block_until_ready(out)

    ref = cross_attention_reference(x, context, rel_bias, params, num_heads)
    # approx reciprocal (EUP vrcp) in the softmax -> slightly looser tolerance.
    np.testing.assert_allclose(np.asarray(out), np.asarray(ref),
                               rtol=5e-3, atol=2e-3)

    print("KERNEL_OK")
</pallas_src>

<mosaic_0001>
module attributes {stable_mosaic.version = 11 : i64} {
  func.func @cross_attention_kernel(%arg0: i32, %arg1: i32, %arg2: memref<1x8x32xf32, #tpu.memory_space<vmem>>, %arg3: memref<1x16x32xf32, #tpu.memory_space<vmem>>, %arg4: memref<32x32xf32, #tpu.memory_space<vmem>>, %arg5: memref<32x64xf32, #tpu.memory_space<vmem>>, %arg6: memref<32x32xf32, #tpu.memory_space<vmem>>, %arg7: memref<1x32xf32, #tpu.memory_space<vmem>>, %arg8: memref<1x32xf32, #tpu.memory_space<vmem>>, %arg9: memref<1x32xf32, #tpu.memory_space<vmem>>, %arg10: memref<8x8x16xf32, #tpu.memory_space<vmem>>, %arg11: memref<1x8x32xf32, #tpu.memory_space<vmem>>, %arg12: memref<8x16x4xf32, #tpu.memory_space<vmem>>, %arg13: memref<8x16x4xf32, #tpu.memory_space<vmem>>) attributes {dimension_semantics = [#tpu.dimension_semantics<parallel>, #tpu.dimension_semantics<arbitrary>], iteration_bounds = array<i64: 2, 1>, scalar_prefetch = 0 : i64, scratch_operands = 2 : i64, tpu.core_type = #tpu.core_type<tc>, window_params = [{transform_indices = @transform_0, window_bounds = array<i64: 1, 8, 32>}, {transform_indices = @transform_1, window_bounds = array<i64: 1, 16, 32>}, {pipeline_mode = #tpu.pipeline_mode<synchronous>, transform_indices = @transform_2, window_bounds = array<i64: 32, 32>}, {pipeline_mode = #tpu.pipeline_mode<synchronous>, transform_indices = @transform_3, window_bounds = array<i64: 32, 64>}, {pipeline_mode = #tpu.pipeline_mode<synchronous>, transform_indices = @transform_4, window_bounds = array<i64: 32, 32>}, {pipeline_mode = #tpu.pipeline_mode<synchronous>, transform_indices = @transform_5, window_bounds = array<i64: 1, 32>}, {pipeline_mode = #tpu.pipeline_mode<synchronous>, transform_indices = @transform_6, window_bounds = array<i64: 1, 32>}, {pipeline_mode = #tpu.pipeline_mode<synchronous>, transform_indices = @transform_7, window_bounds = array<i64: 1, 32>}, {pipeline_mode = #tpu.pipeline_mode<synchronous>, transform_indices = @transform_8, window_bounds = array<i64: 8, 8, 16>}, {transform_indices = @transform_9, window_bounds = array<i64: 1, 8, 32>}]} {
    %c0 = arith.constant 0 : index
    %c0_0 = arith.constant 0 : index
    %0 = vector.load %arg8[%c0, %c0_0] : memref<1x32xf32, #tpu.memory_space<vmem>>, vector<1x32xf32>
    %c0_1 = arith.constant 0 : index
    %c0_2 = arith.constant 0 : index
    %1 = vector.load %arg9[%c0_1, %c0_2] : memref<1x32xf32, #tpu.memory_space<vmem>>, vector<1x32xf32>
    %c0_i32 = arith.constant 0 : i32
    %2 = arith.cmpi eq, %arg1, %c0_i32 : i32
    %3 = arith.extui %2 : i1 to i32
    %c0_i32_3 = arith.constant 0 : i32
    %4 = arith.cmpi ne, %3, %c0_i32_3 : i32
    scf.if %4 {
      %c0_35 = arith.constant 0 : index
      %c0_36 = arith.constant 0 : index
      %c0_37 = arith.constant 0 : index
      %59 = vector.load %arg3[%c0_35, %c0_36, %c0_37] : memref<1x16x32xf32, #tpu.memory_space<vmem>>, vector<1x16x32xf32>
      %60 = vector.shape_cast %59 : vector<1x16x32xf32> to vector<16x32xf32>
      %cst_38 = arith.constant dense<0.000000e+00> : vector<16xf32>
      %61 = vector.multi_reduction <add>, %60, %cst_38 [1] : vector<16x32xf32> to vector<16xf32>
      %62 = vector.shape_cast %61 : vector<16xf32> to vector<16x1xf32>
      %cst_39 = arith.constant 3.200000e+01 : f32
      %63 = vector.broadcast %cst_39 : f32 to vector<16x1xf32>
      %64 = arith.divf %62, %63 : vector<16x1xf32>
      %65 = vector.broadcast %64 : vector<16x1xf32> to vector<16x32xf32>
      %66 = arith.subf %60, %65 : vector<16x32xf32>
      %67 = arith.mulf %66, %66 : vector<16x32xf32>
      %cst_40 = arith.constant dense<0.000000e+00> : vector<16xf32>
      %68 = vector.multi_reduction <add>, %67, %cst_40 [1] : vector<16x32xf32> to vector<16xf32>
      %69 = vector.shape_cast %68 : vector<16xf32> to vector<16x1xf32>
      %cst_41 = arith.constant 3.200000e+01 : f32
      %70 = vector.broadcast %cst_41 : f32 to vector<16x1xf32>
      %71 = arith.divf %69, %70 : vector<16x1xf32>
      %72 = vector.broadcast %64 : vector<16x1xf32> to vector<16x32xf32>
      %73 = arith.subf %60, %72 : vector<16x32xf32>
      %cst_42 = arith.constant 9.99999974E-6 : f32
      %74 = vector.broadcast %cst_42 : f32 to vector<16x1xf32>
      %75 = arith.addf %71, %74 : vector<16x1xf32>
      %76 = math.rsqrt %75 : vector<16x1xf32>
      %77 = vector.broadcast %76 : vector<16x1xf32> to vector<16x32xf32>
      %78 = arith.mulf %73, %77 : vector<16x32xf32>
      %79 = vector.broadcast %0 : vector<1x32xf32> to vector<16x32xf32>
      %80 = arith.mulf %78, %79 : vector<16x32xf32>
      %81 = vector.broadcast %1 : vector<1x32xf32> to vector<16x32xf32>
      %82 = arith.addf %80, %81 : vector<16x32xf32>
      %c0_43 = arith.constant 0 : index
      %c0_44 = arith.constant 0 : index
      %83 = vector.load %arg5[%c0_43, %c0_44] : memref<32x64xf32, #tpu.memory_space<vmem>>, vector<32x64xf32>
      %cst_45 = arith.constant dense<0.000000e+00> : vector<16x64xf32>
      %84 = tpu.matmul %82, %83, %cst_45 {dimension_numbers = #tpu.dot_dimension_numbers<[1], [0], [0], [1], [0, 0, 1, 1], [], []>} : vector<16x32xf32>, vector<32x64xf32>, vector<16x64xf32> -> vector<16x64xf32>
      %85 = vector.shape_cast %84 : vector<16x64xf32> to vector<16x16x4xf32>
      %86 = tpu.transpose %85, [1, 0, 2] : vector<16x16x4xf32> -> vector<16x16x4xf32>
      %87 = vector.extract_strided_slice %86 {offsets = [0, 0, 0], sizes = [8, 16, 4], strides = [1, 1, 1]} : vector<16x16x4xf32> to vector<8x16x4xf32>
      %c0_46 = arith.constant 0 : index
      %c0_47 = arith.constant 0 : index
      %c0_48 = arith.constant 0 : index
      %88 = vector.load %arg12[%c0_46, %c0_47, %c0_48] : memref<8x16x4xf32, #tpu.memory_space<vmem>>, vector<8x16x4xf32>
      tpu.vector_store %arg12[%c0_46, %c0_47, %c0_48], %87 {strides = array<i32>} : memref<8x16x4xf32, #tpu.memory_space<vmem>>, vector<8x16x4xf32>,
      %89 = vector.extract_strided_slice %86 {offsets = [8, 0, 0], sizes = [8, 16, 4], strides = [1, 1, 1]} : vector<16x16x4xf32> to vector<8x16x4xf32>
      %c0_49 = arith.constant 0 : index
      %c0_50 = arith.constant 0 : index
      %c0_51 = arith.constant 0 : index
      %90 = vector.load %arg13[%c0_49, %c0_50, %c0_51] : memref<8x16x4xf32, #tpu.memory_space<vmem>>, vector<8x16x4xf32>
      tpu.vector_store %arg13[%c0_49, %c0_50, %c0_51], %89 {strides = array<i32>} : memref<8x16x4xf32, #tpu.memory_space<vmem>>, vector<8x16x4xf32>,
    } else {
    }
    %c0_4 = arith.constant 0 : index
    %c0_5 = arith.constant 0 : index
    %c0_6 = arith.constant 0 : index
    %5 = vector.load %arg2[%c0_4, %c0_5, %c0_6] : memref<1x8x32xf32, #tpu.memory_space<vmem>>, vector<1x8x32xf32>
    %6 = vector.shape_cast %5 : vector<1x8x32xf32> to vector<8x32xf32>
    %cst = arith.constant dense<0.000000e+00> : vector<8xf32>
    %7 = vector.multi_reduction <add>, %6, %cst [1] : vector<8x32xf32> to vector<8xf32>
    %8 = vector.shape_cast %7 : vector<8xf32> to vector<8x1xf32>
    %cst_7 = arith.constant 3.200000e+01 : f32
    %9 = vector.broadcast %cst_7 : f32 to vector<8x1xf32>
    %10 = arith.divf %8, %9 : vector<8x1xf32>
    %11 = vector.broadcast %10 : vector<8x1xf32> to vector<8x32xf32>
    %12 = arith.subf %6, %11 : vector<8x32xf32>
    %13 = arith.mulf %12, %12 : vector<8x32xf32>
    %cst_8 = arith.constant dense<0.000000e+00> : vector<8xf32>
    %14 = vector.multi_reduction <add>, %13, %cst_8 [1] : vector<8x32xf32> to vector<8xf32>
    %15 = vector.shape_cast %14 : vector<8xf32> to vector<8x1xf32>
    %cst_9 = arith.constant 3.200000e+01 : f32
    %16 = vector.broadcast %cst_9 : f32 to vector<8x1xf32>
    %17 = arith.divf %15, %16 : vector<8x1xf32>
    %18 = vector.broadcast %10 : vector<8x1xf32> to vector<8x32xf32>
    %19 = arith.subf %6, %18 : vector<8x32xf32>
    %cst_10 = arith.constant 9.99999974E-6 : f32
    %20 = vector.broadcast %cst_10 : f32 to vector<8x1xf32>
    %21 = arith.addf %17, %20 : vector<8x1xf32>
    %22 = math.rsqrt %21 : vector<8x1xf32>
    %23 = vector.broadcast %22 : vector<8x1xf32> to vector<8x32xf32>
    %24 = arith.mulf %19, %23 : vector<8x32xf32>
    %25 = vector.broadcast %0 : vector<1x32xf32> to vector<8x32xf32>
    %26 = arith.mulf %24, %25 : vector<8x32xf32>
    %27 = vector.broadcast %1 : vector<1x32xf32> to vector<8x32xf32>
    %28 = arith.addf %26, %27 : vector<8x32xf32>
    %c0_11 = arith.constant 0 : index
    %c0_12 = arith.constant 0 : index
    %29 = vector.load %arg4[%c0_11, %c0_12] : memref<32x32xf32, #tpu.memory_space<vmem>>, vector<32x32xf32>
    %cst_13 = arith.constant dense<0.000000e+00> : vector<8x32xf32>
    %30 = tpu.matmul %28, %29, %cst_13 {dimension_numbers = #tpu.dot_dimension_numbers<[1], [0], [0], [1], [0, 0, 1, 1], [], []>} : vector<8x32xf32>, vector<32x32xf32>, vector<8x32xf32> -> vector<8x32xf32>
    %31 = vector.shape_cast %30 : vector<8x32xf32> to vector<8x8x4xf32>
    %32 = tpu.transpose %31, [1, 0, 2] : vector<8x8x4xf32> -> vector<8x8x4xf32>
    %c0_14 = arith.constant 0 : index
    %c0_15 = arith.constant 0 : index
    %c0_16 = arith.constant 0 : index
    %33 = vector.load %arg12[%c0_14, %c0_15, %c0_16] : memref<8x16x4xf32, #tpu.memory_space<vmem>>, vector<8x16x4xf32>
    %c0_17 = arith.constant 0 : index
    %c0_18 = arith.constant 0 : index
    %c0_19 = arith.constant 0 : index
    %34 = vector.load %arg13[%c0_17, %c0_18, %c0_19] : memref<8x16x4xf32, #tpu.memory_space<vmem>>, vector<8x16x4xf32>
    %cst_20 = arith.constant dense<0.000000e+00> : vector<8x8x16xf32>
    %35 = tpu.matmul %32, %33, %cst_20 {dimension_numbers = #tpu.dot_dimension_numbers<[2], [2], [1], [1], [0, 0, 0, 1, 1, 1], [0], [0]>} : vector<8x8x4xf32>, vector<8x16x4xf32>, vector<8x8x16xf32> -> vector<8x8x16xf32>
    %c0_21 = arith.constant 0 : index
    %c0_22 = arith.constant 0 : index
    %c0_23 = arith.constant 0 : index
    %36 = vector.load %arg10[%c0_21, %c0_22, %c0_23] : memref<8x8x16xf32, #tpu.memory_space<vmem>>, vector<8x8x16xf32>
    %37 = arith.addf %35, %36 : vector<8x8x16xf32>
    %cst_24 = arith.constant dense<0xFF800000> : vector<8x8xf32>
    %38 = vector.multi_reduction <maximumf>, %37, %cst_24 [2] : vector<8x8x16xf32> to vector<8x8xf32>
    %39 = vector.shape_cast %38 : vector<8x8xf32> to vector<8x8x1xf32>
    %40 = vector.broadcast %39 : vector<8x8x1xf32> to vector<8x8x16xf32>
    %41 = arith.subf %37, %40 : vector<8x8x16xf32>
    %42 = math.exp %41 : vector<8x8x16xf32>
    %cst_25 = arith.constant dense<0.000000e+00> : vector<8x8xf32>
    %43 = vector.multi_reduction <add>, %42, %cst_25 [2] : vector<8x8x16xf32> to vector<8x8xf32>
    %44 = vector.shape_cast %43 : vector<8x8xf32> to vector<8x8x1xf32>
    %45 = tpu.reciprocal %44 {approx = true} : vector<8x8x1xf32> -> vector<8x8x1xf32>
    %46 = vector.broadcast %45 : vector<8x8x1xf32> to vector<8x8x16xf32>
    %47 = arith.mulf %42, %46 : vector<8x8x16xf32>
    %cst_26 = arith.constant dense<0.000000e+00> : vector<8x8x4xf32>
    %48 = tpu.matmul %47, %34, %cst_26 {dimension_numbers = #tpu.dot_dimension_numbers<[2], [1], [1], [2], [0, 0, 0, 1, 1, 2], [0], [0]>} : vector<8x8x16xf32>, vector<8x16x4xf32>, vector<8x8x4xf32> -> vector<8x8x4xf32>
    %49 = tpu.transpose %48, [1, 0, 2] : vector<8x8x4xf32> -> vector<8x8x4xf32>
    %50 = vector.shape_cast %49 : vector<8x8x4xf32> to vector<8x32xf32>
    %c0_27 = arith.constant 0 : index
    %c0_28 = arith.constant 0 : index
    %51 = vector.load %arg6[%c0_27, %c0_28] : memref<32x32xf32, #tpu.memory_space<vmem>>, vector<32x32xf32>
    %cst_29 = arith.constant dense<0.000000e+00> : vector<8x32xf32>
    %52 = tpu.matmul %50, %51, %cst_29 {dimension_numbers = #tpu.dot_dimension_numbers<[1], [0], [0], [1], [0, 0, 1, 1], [], []>} : vector<8x32xf32>, vector<32x32xf32>, vector<8x32xf32> -> vector<8x32xf32>
    %c0_30 = arith.constant 0 : index
    %c0_31 = arith.constant 0 : index
    %53 = vector.load %arg7[%c0_30, %c0_31] : memref<1x32xf32, #tpu.memory_space<vmem>>, vector<1x32xf32>
    %54 = vector.broadcast %53 : vector<1x32xf32> to vector<8x32xf32>
    %55 = arith.addf %52, %54 : vector<8x32xf32>
    %c0_32 = arith.constant 0 : index
    %c0_33 = arith.constant 0 : index
    %c0_34 = arith.constant 0 : index
    %56 = vector.load %arg11[%c0_32, %c0_33, %c0_34] : memref<1x8x32xf32, #tpu.memory_space<vmem>>, vector<1x8x32xf32>
    %57 = vector.shape_cast %56 : vector<1x8x32xf32> to vector<8x32xf32>
    %58 = vector.shape_cast %55 : vector<8x32xf32> to vector<1x8x32xf32>
    tpu.vector_store %arg11[%c0_32, %c0_33, %c0_34], %58 {strides = array<i32>} : memref<1x8x32xf32, #tpu.memory_space<vmem>>, vector<1x8x32xf32>,
    return
  }
  func.func @transform_0(%arg0: i32, %arg1: i32) -> (i32, i32, i32) {
    %c0_i32 = arith.constant 0 : i32
    %c0_i32_0 = arith.constant 0 : i32
    return %arg0, %arg1, %c0_i32 : i32, i32, i32
  }
  func.func @transform_1(%arg0: i32, %arg1: i32) -> (i32, i32, i32) {
    %c0_i32 = arith.constant 0 : i32
    %c0_i32_0 = arith.constant 0 : i32
    %c0_i32_1 = arith.constant 0 : i32
    return %arg0, %c0_i32, %c0_i32_0 : i32, i32, i32
  }
  func.func @transform_2(%arg0: i32, %arg1: i32) -> (i32, i32) {
    %c0_i32 = arith.constant 0 : i32
    %c0_i32_0 = arith.constant 0 : i32
    %c0_i32_1 = arith.constant 0 : i32
    return %c0_i32, %c0_i32_0 : i32, i32
  }
  func.func @transform_3(%arg0: i32, %arg1: i32) -> (i32, i32) {
    %c0_i32 = arith.constant 0 : i32
    %c0_i32_0 = arith.constant 0 : i32
    %c0_i32_1 = arith.constant 0 : i32
    return %c0_i32, %c0_i32_0 : i32, i32
  }
  func.func @transform_4(%arg0: i32, %arg1: i32) -> (i32, i32) {
    %c0_i32 = arith.constant 0 : i32
    %c0_i32_0 = arith.constant 0 : i32
    %c0_i32_1 = arith.constant 0 : i32
    return %c0_i32, %c0_i32_0 : i32, i32
  }
  func.func @transform_5(%arg0: i32, %arg1: i32) -> (i32, i32) {
    %c0_i32 = arith.constant 0 : i32
    %c0_i32_0 = arith.constant 0 : i32
    %c0_i32_1 = arith.constant 0 : i32
    return %c0_i32, %c0_i32_0 : i32, i32
  }
  func.func @transform_6(%arg0: i32, %arg1: i32) -> (i32, i32) {
    %c0_i32 = arith.constant 0 : i32
    %c0_i32_0 = arith.constant 0 : i32
    %c0_i32_1 = arith.constant 0 : i32
    return %c0_i32, %c0_i32_0 : i32, i32
  }
  func.func @transform_7(%arg0: i32, %arg1: i32) -> (i32, i32) {
    %c0_i32 = arith.constant 0 : i32
    %c0_i32_0 = arith.constant 0 : i32
    %c0_i32_1 = arith.constant 0 : i32
    return %c0_i32, %c0_i32_0 : i32, i32
  }
  func.func @transform_8(%arg0: i32, %arg1: i32) -> (i32, i32, i32) {
    %c0_i32 = arith.constant 0 : i32
    %c0_i32_0 = arith.constant 0 : i32
    %c0_i32_1 = arith.constant 0 : i32
    return %c0_i32, %arg1, %c0_i32_0 : i32, i32, i32
  }
  func.func @transform_9(%arg0: i32, %arg1: i32) -> (i32, i32, i32) {
    %c0_i32 = arith.constant 0 : i32
    %c0_i32_0 = arith.constant 0 : i32
    return %arg0, %arg1, %c0_i32 : i32, i32, i32
  }
}

module attributes {stable_mosaic.version = 11 : i64} {
  func.func @cross_attention_kernel(%arg0: i32, %arg1: i32, %arg2: memref<1x8x32xf32, #tpu.memory_space<vmem>>, %arg3: memref<1x16x32xf32, #tpu.memory_space<vmem>>, %arg4: memref<32x32xf32, #tpu.memory_space<vmem>>, %arg5: memref<32x64xf32, #tpu.memory_space<vmem>>, %arg6: memref<32x32xf32, #tpu.memory_space<vmem>>, %arg7: memref<1x32xf32, #tpu.memory_space<vmem>>, %arg8: memref<1x32xf32, #tpu.memory_space<vmem>>, %arg9: memref<1x32xf32, #tpu.memory_space<vmem>>, %arg10: memref<8x8x16xf32, #tpu.memory_space<vmem>>, %arg11: memref<1x8x32xf32, #tpu.memory_space<vmem>>, %arg12: memref<8x16x4xf32, #tpu.memory_space<vmem>>, %arg13: memref<8x16x4xf32, #tpu.memory_space<vmem>>) attributes {dimension_semantics = [#tpu.dimension_semantics<parallel>, #tpu.dimension_semantics<arbitrary>], iteration_bounds = array<i64: 2, 1>, scalar_prefetch = 0 : i64, scratch_operands = 2 : i64, tpu.core_type = #tpu.core_type<tc>, window_params = [{transform_indices = @transform_0, window_bounds = array<i64: 1, 8, 32>}, {transform_indices = @transform_1, window_bounds = array<i64: 1, 16, 32>}, {pipeline_mode = #tpu.pipeline_mode<synchronous>, transform_indices = @transform_2, window_bounds = array<i64: 32, 32>}, {pipeline_mode = #tpu.pipeline_mode<synchronous>, transform_indices = @transform_3, window_bounds = array<i64: 32, 64>}, {pipeline_mode = #tpu.pipeline_mode<synchronous>, transform_indices = @transform_4, window_bounds = array<i64: 32, 32>}, {pipeline_mode = #tpu.pipeline_mode<synchronous>, transform_indices = @transform_5, window_bounds = array<i64: 1, 32>}, {pipeline_mode = #tpu.pipeline_mode<synchronous>, transform_indices = @transform_6, window_bounds = array<i64: 1, 32>}, {pipeline_mode = #tpu.pipeline_mode<synchronous>, transform_indices = @transform_7, window_bounds = array<i64: 1, 32>}, {transform_indices = @transform_8, window_bounds = array<i64: 8, 8, 16>}, {transform_indices = @transform_9, window_bounds = array<i64: 1, 8, 32>}]} {
    %c0 = arith.constant 0 : index
    %c0_0 = arith.constant 0 : index
    %0 = vector.load %arg8[%c0, %c0_0] : memref<1x32xf32, #tpu.memory_space<vmem>>, vector<1x32xf32>
    %c0_1 = arith.constant 0 : index
    %c0_2 = arith.constant 0 : index
    %1 = vector.load %arg9[%c0_1, %c0_2] : memref<1x32xf32, #tpu.memory_space<vmem>>, vector<1x32xf32>
    %c0_i32 = arith.constant 0 : i32
    %2 = arith.cmpi eq, %arg1, %c0_i32 : i32
    %3 = arith.extui %2 : i1 to i32
    %c0_i32_3 = arith.constant 0 : i32
    %4 = arith.cmpi ne, %3, %c0_i32_3 : i32
    scf.if %4 {
      %c0_35 = arith.constant 0 : index
      %c0_36 = arith.constant 0 : index
      %c0_37 = arith.constant 0 : index
      %59 = vector.load %arg3[%c0_35, %c0_36, %c0_37] : memref<1x16x32xf32, #tpu.memory_space<vmem>>, vector<1x16x32xf32>
      %60 = vector.shape_cast %59 : vector<1x16x32xf32> to vector<16x32xf32>
      %cst_38 = arith.constant dense<0.000000e+00> : vector<16xf32>
      %61 = vector.multi_reduction <add>, %60, %cst_38 [1] : vector<16x32xf32> to vector<16xf32>
      %62 = vector.shape_cast %61 : vector<16xf32> to vector<16x1xf32>
      %cst_39 = arith.constant 3.200000e+01 : f32
      %63 = vector.broadcast %cst_39 : f32 to vector<16x1xf32>
      %64 = arith.divf %62, %63 : vector<16x1xf32>
      %65 = vector.broadcast %64 : vector<16x1xf32> to vector<16x32xf32>
      %66 = arith.subf %60, %65 : vector<16x32xf32>
      %67 = arith.mulf %66, %66 : vector<16x32xf32>
      %cst_40 = arith.constant dense<0.000000e+00> : vector<16xf32>
      %68 = vector.multi_reduction <add>, %67, %cst_40 [1] : vector<16x32xf32> to vector<16xf32>
      %69 = vector.shape_cast %68 : vector<16xf32> to vector<16x1xf32>
      %cst_41 = arith.constant 3.200000e+01 : f32
      %70 = vector.broadcast %cst_41 : f32 to vector<16x1xf32>
      %71 = arith.divf %69, %70 : vector<16x1xf32>
      %72 = vector.broadcast %64 : vector<16x1xf32> to vector<16x32xf32>
      %73 = arith.subf %60, %72 : vector<16x32xf32>
      %cst_42 = arith.constant 9.99999974E-6 : f32
      %74 = vector.broadcast %cst_42 : f32 to vector<16x1xf32>
      %75 = arith.addf %71, %74 : vector<16x1xf32>
      %76 = math.rsqrt %75 : vector<16x1xf32>
      %77 = vector.broadcast %76 : vector<16x1xf32> to vector<16x32xf32>
      %78 = arith.mulf %73, %77 : vector<16x32xf32>
      %79 = vector.broadcast %0 : vector<1x32xf32> to vector<16x32xf32>
      %80 = arith.mulf %78, %79 : vector<16x32xf32>
      %81 = vector.broadcast %1 : vector<1x32xf32> to vector<16x32xf32>
      %82 = arith.addf %80, %81 : vector<16x32xf32>
      %c0_43 = arith.constant 0 : index
      %c0_44 = arith.constant 0 : index
      %83 = vector.load %arg5[%c0_43, %c0_44] : memref<32x64xf32, #tpu.memory_space<vmem>>, vector<32x64xf32>
      %cst_45 = arith.constant dense<0.000000e+00> : vector<16x64xf32>
      %84 = tpu.matmul %82, %83, %cst_45 {dimension_numbers = #tpu.dot_dimension_numbers<[1], [0], [0], [1], [0, 0, 1, 1], [], []>} : vector<16x32xf32>, vector<32x64xf32>, vector<16x64xf32> -> vector<16x64xf32>
      %85 = vector.shape_cast %84 : vector<16x64xf32> to vector<16x16x4xf32>
      %86 = tpu.transpose %85, [1, 0, 2] : vector<16x16x4xf32> -> vector<16x16x4xf32>
      %87 = vector.extract_strided_slice %86 {offsets = [0, 0, 0], sizes = [8, 16, 4], strides = [1, 1, 1]} : vector<16x16x4xf32> to vector<8x16x4xf32>
      %c0_46 = arith.constant 0 : index
      %c0_47 = arith.constant 0 : index
      %c0_48 = arith.constant 0 : index
      %88 = vector.load %arg12[%c0_46, %c0_47, %c0_48] : memref<8x16x4xf32, #tpu.memory_space<vmem>>, vector<8x16x4xf32>
      tpu.vector_store %arg12[%c0_46, %c0_47, %c0_48], %87 {strides = array<i32>} : memref<8x16x4xf32, #tpu.memory_space<vmem>>, vector<8x16x4xf32>,
      %89 = vector.extract_strided_slice %86 {offsets = [8, 0, 0], sizes = [8, 16, 4], strides = [1, 1, 1]} : vector<16x16x4xf32> to vector<8x16x4xf32>
      %c0_49 = arith.constant 0 : index
      %c0_50 = arith.constant 0 : index
      %c0_51 = arith.constant 0 : index
      %90 = vector.load %arg13[%c0_49, %c0_50, %c0_51] : memref<8x16x4xf32, #tpu.memory_space<vmem>>, vector<8x16x4xf32>
      tpu.vector_store %arg13[%c0_49, %c0_50, %c0_51], %89 {strides = array<i32>} : memref<8x16x4xf32, #tpu.memory_space<vmem>>, vector<8x16x4xf32>,
    } else {
    }
    %c0_4 = arith.constant 0 : index
    %c0_5 = arith.constant 0 : index
    %c0_6 = arith.constant 0 : index
    %5 = vector.load %arg2[%c0_4, %c0_5, %c0_6] : memref<1x8x32xf32, #tpu.memory_space<vmem>>, vector<1x8x32xf32>
    %6 = vector.shape_cast %5 : vector<1x8x32xf32> to vector<8x32xf32>
    %cst = arith.constant dense<0.000000e+00> : vector<8xf32>
    %7 = vector.multi_reduction <add>, %6, %cst [1] : vector<8x32xf32> to vector<8xf32>
    %8 = vector.shape_cast %7 : vector<8xf32> to vector<8x1xf32>
    %cst_7 = arith.constant 3.200000e+01 : f32
    %9 = vector.broadcast %cst_7 : f32 to vector<8x1xf32>
    %10 = arith.divf %8, %9 : vector<8x1xf32>
    %11 = vector.broadcast %10 : vector<8x1xf32> to vector<8x32xf32>
    %12 = arith.subf %6, %11 : vector<8x32xf32>
    %13 = arith.mulf %12, %12 : vector<8x32xf32>
    %cst_8 = arith.constant dense<0.000000e+00> : vector<8xf32>
    %14 = vector.multi_reduction <add>, %13, %cst_8 [1] : vector<8x32xf32> to vector<8xf32>
    %15 = vector.shape_cast %14 : vector<8xf32> to vector<8x1xf32>
    %cst_9 = arith.constant 3.200000e+01 : f32
    %16 = vector.broadcast %cst_9 : f32 to vector<8x1xf32>
    %17 = arith.divf %15, %16 : vector<8x1xf32>
    %18 = vector.broadcast %10 : vector<8x1xf32> to vector<8x32xf32>
    %19 = arith.subf %6, %18 : vector<8x32xf32>
    %cst_10 = arith.constant 9.99999974E-6 : f32
    %20 = vector.broadcast %cst_10 : f32 to vector<8x1xf32>
    %21 = arith.addf %17, %20 : vector<8x1xf32>
    %22 = math.rsqrt %21 : vector<8x1xf32>
    %23 = vector.broadcast %22 : vector<8x1xf32> to vector<8x32xf32>
    %24 = arith.mulf %19, %23 : vector<8x32xf32>
    %25 = vector.broadcast %0 : vector<1x32xf32> to vector<8x32xf32>
    %26 = arith.mulf %24, %25 : vector<8x32xf32>
    %27 = vector.broadcast %1 : vector<1x32xf32> to vector<8x32xf32>
    %28 = arith.addf %26, %27 : vector<8x32xf32>
    %c0_11 = arith.constant 0 : index
    %c0_12 = arith.constant 0 : index
    %29 = vector.load %arg4[%c0_11, %c0_12] : memref<32x32xf32, #tpu.memory_space<vmem>>, vector<32x32xf32>
    %cst_13 = arith.constant dense<0.000000e+00> : vector<8x32xf32>
    %30 = tpu.matmul %28, %29, %cst_13 {dimension_numbers = #tpu.dot_dimension_numbers<[1], [0], [0], [1], [0, 0, 1, 1], [], []>} : vector<8x32xf32>, vector<32x32xf32>, vector<8x32xf32> -> vector<8x32xf32>
    %31 = vector.shape_cast %30 : vector<8x32xf32> to vector<8x8x4xf32>
    %32 = tpu.transpose %31, [1, 0, 2] : vector<8x8x4xf32> -> vector<8x8x4xf32>
    %c0_14 = arith.constant 0 : index
    %c0_15 = arith.constant 0 : index
    %c0_16 = arith.constant 0 : index
    %33 = vector.load %arg12[%c0_14, %c0_15, %c0_16] : memref<8x16x4xf32, #tpu.memory_space<vmem>>, vector<8x16x4xf32>
    %c0_17 = arith.constant 0 : index
    %c0_18 = arith.constant 0 : index
    %c0_19 = arith.constant 0 : index
    %34 = vector.load %arg13[%c0_17, %c0_18, %c0_19] : memref<8x16x4xf32, #tpu.memory_space<vmem>>, vector<8x16x4xf32>
    %cst_20 = arith.constant dense<0.000000e+00> : vector<8x8x16xf32>
    %35 = tpu.matmul %32, %33, %cst_20 {dimension_numbers = #tpu.dot_dimension_numbers<[2], [2], [1], [1], [0, 0, 0, 1, 1, 1], [0], [0]>} : vector<8x8x4xf32>, vector<8x16x4xf32>, vector<8x8x16xf32> -> vector<8x8x16xf32>
    %c0_21 = arith.constant 0 : index
    %c0_22 = arith.constant 0 : index
    %c0_23 = arith.constant 0 : index
    %36 = vector.load %arg10[%c0_21, %c0_22, %c0_23] : memref<8x8x16xf32, #tpu.memory_space<vmem>>, vector<8x8x16xf32>
    %37 = arith.addf %35, %36 : vector<8x8x16xf32>
    %cst_24 = arith.constant dense<0xFF800000> : vector<8x8xf32>
    %38 = vector.multi_reduction <maximumf>, %37, %cst_24 [2] : vector<8x8x16xf32> to vector<8x8xf32>
    %39 = vector.shape_cast %38 : vector<8x8xf32> to vector<8x8x1xf32>
    %40 = vector.broadcast %39 : vector<8x8x1xf32> to vector<8x8x16xf32>
    %41 = arith.subf %37, %40 : vector<8x8x16xf32>
    %42 = math.exp %41 : vector<8x8x16xf32>
    %cst_25 = arith.constant dense<0.000000e+00> : vector<8x8xf32>
    %43 = vector.multi_reduction <add>, %42, %cst_25 [2] : vector<8x8x16xf32> to vector<8x8xf32>
    %44 = vector.shape_cast %43 : vector<8x8xf32> to vector<8x8x1xf32>
    %45 = tpu.reciprocal %44 {approx = true} : vector<8x8x1xf32> -> vector<8x8x1xf32>
    %46 = vector.broadcast %45 : vector<8x8x1xf32> to vector<8x8x16xf32>
    %47 = arith.mulf %42, %46 : vector<8x8x16xf32>
    %cst_26 = arith.constant dense<0.000000e+00> : vector<8x8x4xf32>
    %48 = tpu.matmul %47, %34, %cst_26 {dimension_numbers = #tpu.dot_dimension_numbers<[2], [1], [1], [2], [0, 0, 0, 1, 1, 2], [0], [0]>} : vector<8x8x16xf32>, vector<8x16x4xf32>, vector<8x8x4xf32> -> vector<8x8x4xf32>
    %49 = tpu.transpose %48, [1, 0, 2] : vector<8x8x4xf32> -> vector<8x8x4xf32>
    %50 = vector.shape_cast %49 : vector<8x8x4xf32> to vector<8x32xf32>
    %c0_27 = arith.constant 0 : index
    %c0_28 = arith.constant 0 : index
    %51 = vector.load %arg6[%c0_27, %c0_28] : memref<32x32xf32, #tpu.memory_space<vmem>>, vector<32x32xf32>
    %cst_29 = arith.constant dense<0.000000e+00> : vector<8x32xf32>
    %52 = tpu.matmul %50, %51, %cst_29 {dimension_numbers = #tpu.dot_dimension_numbers<[1], [0], [0], [1], [0, 0, 1, 1], [], []>} : vector<8x32xf32>, vector<32x32xf32>, vector<8x32xf32> -> vector<8x32xf32>
    %c0_30 = arith.constant 0 : index
    %c0_31 = arith.constant 0 : index
    %53 = vector.load %arg7[%c0_30, %c0_31] : memref<1x32xf32, #tpu.memory_space<vmem>>, vector<1x32xf32>
    %54 = vector.broadcast %53 : vector<1x32xf32> to vector<8x32xf32>
    %55 = arith.addf %52, %54 : vector<8x32xf32>
    %c0_32 = arith.constant 0 : index
    %c0_33 = arith.constant 0 : index
    %c0_34 = arith.constant 0 : index
    %56 = vector.load %arg11[%c0_32, %c0_33, %c0_34] : memref<1x8x32xf32, #tpu.memory_space<vmem>>, vector<1x8x32xf32>
    %57 = vector.shape_cast %56 : vector<1x8x32xf32> to vector<8x32xf32>
    %58 = vector.shape_cast %55 : vector<8x32xf32> to vector<1x8x32xf32>
    tpu.vector_store %arg11[%c0_32, %c0_33, %c0_34], %58 {strides = array<i32>} : memref<1x8x32xf32, #tpu.memory_space<vmem>>, vector<1x8x32xf32>,
    return
  }
  func.func @transform_0(%arg0: i32, %arg1: i32) -> (i32, i32, i32) {
    %c0_i32 = arith.constant 0 : i32
    %c0_i32_0 = arith.constant 0 : i32
    return %arg0, %arg1, %c0_i32 : i32, i32, i32
  }
  func.func @transform_1(%arg0: i32, %arg1: i32) -> (i32, i32, i32) {
    %c0_i32 = arith.constant 0 : i32
    %c0_i32_0 = arith.constant 0 : i32
    %c0_i32_1 = arith.constant 0 : i32
    return %arg0, %c0_i32, %c0_i32_0 : i32, i32, i32
  }
  func.func @transform_2(%arg0: i32, %arg1: i32) -> (i32, i32) {
    %c0_i32 = arith.constant 0 : i32
    %c0_i32_0 = arith.constant 0 : i32
    %c0_i32_1 = arith.constant 0 : i32
    return %c0_i32, %c0_i32_0 : i32, i32
  }
  func.func @transform_3(%arg0: i32, %arg1: i32) -> (i32, i32) {
    %c0_i32 = arith.constant 0 : i32
    %c0_i32_0 = arith.constant 0 : i32
    %c0_i32_1 = arith.constant 0 : i32
    return %c0_i32, %c0_i32_0 : i32, i32
  }
  func.func @transform_4(%arg0: i32, %arg1: i32) -> (i32, i32) {
    %c0_i32 = arith.constant 0 : i32
    %c0_i32_0 = arith.constant 0 : i32
    %c0_i32_1 = arith.constant 0 : i32
    return %c0_i32, %c0_i32_0 : i32, i32
  }
  func.func @transform_5(%arg0: i32, %arg1: i32) -> (i32, i32) {
    %c0_i32 = arith.constant 0 : i32
    %c0_i32_0 = arith.constant 0 : i32
    %c0_i32_1 = arith.constant 0 : i32
    return %c0_i32, %c0_i32_0 : i32, i32
  }
  func.func @transform_6(%arg0: i32, %arg1: i32) -> (i32, i32) {
    %c0_i32 = arith.constant 0 : i32
    %c0_i32_0 = arith.constant 0 : i32
    %c0_i32_1 = arith.constant 0 : i32
    return %c0_i32, %c0_i32_0 : i32, i32
  }
  func.func @transform_7(%arg0: i32, %arg1: i32) -> (i32, i32) {
    %c0_i32 = arith.constant 0 : i32
    %c0_i32_0 = arith.constant 0 : i32
    %c0_i32_1 = arith.constant 0 : i32
    return %c0_i32, %c0_i32_0 : i32, i32
  }
  func.func @transform_8(%arg0: i32, %arg1: i32) -> (i32, i32, i32) {
    %c0_i32 = arith.constant 0 : i32
    %c0_i32_0 = arith.constant 0 : i32
    %c0_i32_1 = arith.constant 0 : i32
    return %c0_i32, %arg1, %c0_i32_0 : i32, i32, i32
  }
  func.func @transform_9(%arg0: i32, %arg1: i32) -> (i32, i32, i32) {
    %c0_i32 = arith.constant 0 : i32
    %c0_i32_0 = arith.constant 0 : i32
    return %arg0, %arg1, %c0_i32 : i32, i32, i32
  }
}

</mosaic_0001>

<bundles_post_ra>
// kernel: tpu_custom_call.1
= control target key start
LH: loop header
LB: loop body
LE: loop exit
PB: predicated region body
PF: predicated region fallthrough
CT: control target
= control target key end

     0   :  { %s5948_s0 = inlined_call_operand.hbm [shape: f32[2,8,32], index: 0, kind: input, shape index: {}]   ;;  %s5949_s1 = inlined_call_operand.hbm [shape: f32[2,16,32], index: 1, kind: input, shape index: {}]   ;;  %s5950_s2 = inlined_call_operand.hbm [shape: f32[32,32], index: 2, kind: input, shape index: {}]   ;;  %s5951_s3 = inlined_call_operand.hbm [shape: f32[32,64], index: 3, kind: input, shape index: {}]   ;;  %s5952_s4 = inlined_call_operand.hbm [shape: f32[32,32], index: 4, kind: input, shape index: {}]   ;;  %s5953_s5 = inlined_call_operand.vmem [shape: f32[1,32], index: 5, kind: input, shape index: {}]   ;;  %s5954_s6 = inlined_call_operand.vmem [shape: f32[1,32], index: 6, kind: input, shape index: {}]   ;;  %s5955_s7 = inlined_call_operand.vmem [shape: f32[1,32], index: 7, kind: input, shape index: {}]   ;;  %s5956_s8 = inlined_call_operand.hbm [shape: f32[8,8,16], index: 8, kind: input, shape index: {}]   ;;  %s5957_s9 = inlined_call_operand.hbm [shape: f32[2,8,32], index: 9, kind: output, shape index: {}]  }
   0x1   :  { %5964 = sst [smem:[#allocation23_spill]] %s5948_s0 }
   0x2   :  { %5965 = sst [smem:[#allocation24_spill]] %s5950_s2 }
   0x3   :  { %5966 = sst [smem:[#allocation25_spill]] %s5951_s3 }
   0x4   :  { %5967 = sst [smem:[#allocation26_spill]] %s5952_s4 }
   0x5   :  { %5968 = sst [smem:[#allocation27_spill]] %s5953_s5 }
   0x6   :  { %5969 = sst [smem:[#allocation28_spill]] %s5957_s9 }
   0x7   :  { %14 = vsyncpa [#allocation5], 0 }
   0x8   :  { %16 = vsyncpa [#allocation5 + $0x1], 0 }
   0x9   :  { %17 = vsyncpa [#allocation8], 0 }
   0xa   :  { %19 = vsyncpa [#allocation8 + $0x1], 0 }
   0xb   :  { %20 = vsyncpa [#allocation11], 0 }
   0xc   :  { %21 = vsyncpa [#allocation14], 0 }
   0xd   :  { %22 = vsyncpa [#allocation6], 0 }
   0xe   :  { %24 = vsyncpa [#allocation6 + $0x1], 0  ;;  %s5053_s30 = smov 0   ;;  %s5055_s10 = smov 0  }
   0xf   :  { %s5057_s11 = smov 0   ;;  %s5059_s12 = smov 0  }
  0x10   :  { %s5061_s13 = smov 0   ;;  %s5063_s14 = smov 0  }
  0x11 LB: > { %5970 = sst [smem:[#allocation22_spill]] %s4957_s12  ;;  %s5084_s15 = sadd.s32 4294967295, %s4965_s14   ;;  %s4965_s14 = sphi %s5063_s14, %s30_s14   ;;  %s4961_s13 = sphi %s5061_s13, %s6006_s13   ;;  %s4957_s12 = sphi %s5059_s12, %s6005_s12   ;;  %s4953_s11 = sphi %s5057_s11, %s6004_s11   ;;  %s4949_s10 = sphi %s5055_s10, %s6003_s10   ;;  %s4945_s30 = sphi %s5053_s30, %s6002_s30  }
  0x12   : > { %p4124_p0 = scmp.ge.s32.totalorder %s4965_s14, 1  ;;  %p5959_p1 = scmp.eq.s32.totalorder %s5084_s15, 0 }
  0x13   : > { %p281_p2 = scmp.lt.s32.totalorder %s4965_s14, 3  ;;  %s4967_s17 = smov [#allocation9]  }
  0x14   : > { %s293_s18 = sshll.u32 %s4967_s17, 4  ;;  %s4968_s20 = smov [#allocation10]   ;;  %s5093_s18 = int_to_ptr.vmem [resolvable:$true] %s293_s18 }
  0x15   : > { %p5089_p3 = pnand %p4124_p0, %p281_p2  ;;  %s306_s21 = sshll.u32 %s4968_s20, 4  ;;  %s5104_s21 = int_to_ptr.vmem [resolvable:$true] %s306_s21 }
  0x16   : > { %s4969_s22 = smov [#allocation12]   ;;  %s5973_s2 = sld [smem:[#allocation24_spill]] }
  0x17   : > { %s5971_s16 = scalar_select %p5089_p3, 1, 0 }
  0x18   : > { %p4542_p4 = pneg %p5089_p3  ;;  %s5106_s23 = sshll.u32 %s4969_s22, 4  ;;  %s320_s23 = int_to_ptr.vmem [resolvable:$true] %s5106_s23 }
  0x1a   : > { %p5100_p6 = pnand %p4542_p4, %p5959_p1 }
  0x1c   : > { %s4695_s26 = scalar_lea.hbm %s5973_s2, 512  ;;  %p5116_p8 = pneg %p5100_p6 }
  0x1d   : > { %p4696_p7 = scmp.ne.s32.totalorder %s5973_s2, %s4695_s26  ;;  %p4702_p11 = scmp.lt.u32.totalorder %s4695_s26, %s5973_s2 }
  0x1f   : > { %p4698_p9 = pnand %p5116_p8, %p4696_p7 }
  0x21   : > { %p4699_p10 = pneg %p4698_p9 }
  0x23   : > { %p4704_p12 = pnand %p4702_p11, %p4699_p10 }
  0x25   : > { %4707 = shalt.err (!%p4704_p12)
}
  0x26   : > { %s4708_s22 = scalar_lea.vmem %s5093_s18, 512  ;;  %p4716_p4 = scmp.lt.s32.totalorder %s5093_s18, %s5093_s18 }
  0x27   : > { %p4709_p13 = scmp.ne.s32.totalorder %s5093_s18, %s4708_s22  ;;  %p4717_p5 = scmp.lt.s32.totalorder %s4708_s22, %s4708_s22 }
  0x29   : > { %p4711_p0 = pnand %p4709_p13, %p5116_p8  ;;  %p4718_p7 = por %p4717_p5, %p4716_p4 }
  0x2b   : > { %p4712_p2 = pneg %p4711_p0 }
  0x2d   : > { %p4719_p9 = pnand %p4718_p7, %p4712_p2 }
  0x2f   : > { %4722 = shalt.err (!%p4719_p9)
}
  0x30   : > { %s5961_s24 = smov 128   ;;  %s5962_s25 = smov 8  }
  0x31   : > { %4545 = dma.hbm_to_vmem [thread:$0]  (!%p5100_p6), %s5973_s2, 512, %s5093_s18, [#allocation8], %s5961_s24, %s5961_s24, %s5962_s25  }
  0x32   : > { %s5975_s3 = sld [smem:[#allocation25_spill]] }
  0x38   : > { %s4723_s20 = scalar_lea.hbm %s5975_s3, 512 }
  0x39   : > { %p4724_p5 = scmp.ne.s32.totalorder %s5975_s3, %s4723_s20  ;;  %p4730_p12 = scmp.lt.u32.totalorder %s4723_s20, %s5975_s3 }
  0x3b   : > { %p4726_p10 = pnand %p4724_p5, %p5116_p8 }
  0x3d   : > { %p4727_p11 = pneg %p4726_p10 }
  0x3f   : > { %p4732_p13 = pnand %p4730_p12, %p4727_p11 }
  0x41   : > { %4735 = shalt.err (!%p4732_p13)
}
  0x42   : > { %s4736_s18 = scalar_lea.vmem %s5104_s21, 512  ;;  %p4744_p7 = scmp.lt.s32.totalorder %s5104_s21, %s5104_s21 }
  0x43   : > { %p4737_p0 = scmp.ne.s32.totalorder %s5104_s21, %s4736_s18  ;;  %p4745_p9 = scmp.lt.s32.totalorder %s4736_s18, %s4736_s18 }
  0x45   : > { %p4739_p2 = pnand %p4737_p0, %p5116_p8  ;;  %p4746_p5 = por %p4745_p9, %p4744_p7 }
  0x47   : > { %p4740_p4 = pneg %p4739_p2 }
  0x49   : > { %p4747_p10 = pnand %p4746_p5, %p4740_p4 }
  0x4b   : > { %4750 = shalt.err (!%p4747_p10)
}
  0x4c   : > { %4548 = dma.hbm_to_vmem [thread:$0]  (!%p5100_p6), %s5975_s3, 512, %s5104_s21, [#allocation11], %s5961_s24, %s5961_s24, %s5962_s25  }
  0x4d   : > { %s5976_s4 = sld [smem:[#allocation26_spill]] }
  0x53   : > { %s4751_s27 = scalar_lea.hbm %s5976_s4, 512 }
  0x54   : > { %p4752_p11 = scmp.ne.s32.totalorder %s5976_s4, %s4751_s27  ;;  %p4758_p0 = scmp.lt.u32.totalorder %s4751_s27, %s5976_s4 }
  0x56   : > { %p4754_p12 = pnand %p4752_p11, %p5116_p8 }
  0x58   : > { %p4755_p13 = pneg %p4754_p12 }
  0x5a   : > { %p4760_p2 = pnand %p4758_p0, %p4755_p13 }
  0x5c   : > { %4763 = shalt.err (!%p4760_p2)
}
  0x5d   : > { %s4764_s18 = scalar_lea.vmem %s320_s23, 512  ;;  %p4772_p5 = scmp.lt.s32.totalorder %s320_s23, %s320_s23 }
  0x5e   : > { %p4765_p4 = scmp.ne.s32.totalorder %s320_s23, %s4764_s18  ;;  %p4773_p10 = scmp.lt.s32.totalorder %s4764_s18, %s4764_s18 }
  0x60   : > { %p4767_p7 = pnand %p4765_p4, %p5116_p8  ;;  %p4774_p1 = por %p4773_p10, %p4772_p5 }
  0x62   : > { %p4768_p9 = pneg %p4767_p7 }
  0x64   : > { %p4775_p3 = pnand %p4774_p1, %p4768_p9 }
  0x66   : > { %4778 = shalt.err (!%p4775_p3)
}
  0x67   : > { %4551 = dma.hbm_to_vmem [thread:$0]  (!%p5100_p6), %s5976_s4, 512, %s320_s23, [#allocation11], %s5961_s24, %s5961_s24, %s5962_s25  }
  0x68   : > { %s4972_s9 = smov [#allocation13]   ;;  %s4779_s28 = scalar_lea.hbm %s5956_s8, 1024 }
  0x69   : > { %s343_s12 = sshll.u32 %s4972_s9, 4  ;;  %p4780_p1 = scmp.ne.s32.totalorder %s5956_s8, %s4779_s28  ;;  %s344_s12 = int_to_ptr.vmem [resolvable:$true] %s343_s12 }
  0x6a   : > { %p4786_p12 = scmp.lt.u32.totalorder %s4779_s28, %s5956_s8 }
  0x6b   : > { %p4782_p3 = pnand %p4780_p1, %p5116_p8 }
  0x6d   : > { %p4783_p11 = pneg %p4782_p3 }
  0x6f   : > { %p4788_p13 = pnand %p4786_p12, %p4783_p11 }
  0x71   : > { %4791 = shalt.err (!%p4788_p13)
}
  0x72   : > { %s4792_s23 = scalar_lea.vmem %s344_s12, 1024  ;;  %p4800_p7 = scmp.lt.s32.totalorder %s344_s12, %s344_s12 }
  0x73   : > { %p4793_p0 = scmp.ne.s32.totalorder %s344_s12, %s4792_s23  ;;  %p4801_p9 = scmp.lt.s32.totalorder %s4792_s23, %s4792_s23 }
  0x75   : > { %p4795_p2 = pnand %p4793_p0, %p5116_p8  ;;  %p4802_p5 = por %p4801_p9, %p4800_p7 }
  0x77   : > { %p4796_p4 = pneg %p4795_p2 }
  0x79   : > { %p4803_p10 = pnand %p4802_p5, %p4796_p4 }
  0x7b   : > { %4806 = shalt.err (!%p4803_p10)
}
  0x7c   : > { %4554 = dma.hbm_to_vmem [thread:$0]  (!%p5100_p6), %s5956_s8, 1024, %s344_s12, [#allocation14], %s5961_s24, %s5961_s24, %s5962_s25  }
  0x7d   : > { %s4123_s19 = sadd.s32 4294967294, %s4965_s14   ;;  %s42_s29 = sadd.s32 1, %s4961_s13 }
  0x7e   : > { %p44_p8 = scmp.ge.s32.totalorder %s42_s29, 2  ;;  %s51_s9 = sadd.s32 1, %s4953_s11 }
  0x7f   : > { %p58_p1 = scmp.ne.s32.totalorder %s4953_s11, %s4949_s10  ;;  %p59_p3 = scmp.eq.s32.totalorder %s4965_s14, 0 }
  0x80   : > { %s6008_s29 = smov (%p44_p8, %s42_s29), 0  ;;  %p64_p12 = scmp.ne.s32.totalorder %s4949_s10, %s4945_s30 }
  0x81   : > { %p5217_p11 = por %p59_p3, %p58_p1  ;;  %s46_s12 = ssub.s32 %s4961_s13, %s6008_s29 }
  0x82   : > { %p268_p6 = scmp.eq.s32.totalorder %s5084_s15, 1  ;;  %p49_p13 = scmp.eq.s32.totalorder %s46_s12, 0 }
  0x83   : > { %p5978_p0 = scmp.eq.s32.totalorder %s5084_s15, 0  ;;  %p274_p7 = scmp.eq.s32.totalorder %s4123_s19, 1 }
  0x84   : > { %p5232_p4 = por %p268_p6, %p58_p1  ;;  %p4570_p5 = scmp.lt.s32.totalorder %s4965_s14, 2 }
  0x85   : > { %p5228_p2 = por %p5978_p0, %p64_p12  ;;  %p5239_p9 = por %p274_p7, %p64_p12 }
  0x86   : > { %s5980_s28 = scalar_select %p5232_p4, 1, 0 }
  0x87   : > { %s5237_s17 = scalar_select %p49_p13, %s4953_s11, %s51_s9  }
  0x88   : > { %s5981_s20 = scalar_select %p5239_p9, 1, 0 }
  0x89   : > { %s5245_s22 = sand.u32 1, %s4953_s11   ;;  %s4131_s18 = sshll.u32 %s4961_s13, 7 }
  0x8a   : > { %s4130_s23 = sshll.u32 %s5245_s22, 3  ;;  %s5982_s0 = sld [smem:[#allocation23_spill]] }
  0x8b   : > { %s361_s19 = scalar_lea.vmem [#allocation4], %s4130_s23  ;;  %p5256_p10 = pnand %p4570_p5, %p5217_p11 }
  0x8c   : > { %s369_s9 = sshll.u32 %s361_s19, 4  ;;  %s358_s2 = scalar_lea.sflag [#allocation5], %s5245_s22  ;;  %s5260_s9 = int_to_ptr.vmem [resolvable:$true] %s369_s9 }
  0x8d   : > { %p4809_p1 = pneg %p5256_p10 }
  0x90   : > { %s5252_s12 = scalar_lea.hbm %s5982_s0, %s4131_s18  ;;  %s4812_s23 = scalar_lea.hbm %s5982_s0, 256 }
  0x91   : > { %s4807_s21 = scalar_lea.hbm %s5252_s12, 128  ;;  %p4813_p11 = scmp.lt.u32.totalorder %s5252_s12, %s5982_s0 }
  0x92   : > { %p4808_p8 = scmp.ne.s32.totalorder %s5252_s12, %s4807_s21  ;;  %p4814_p6 = scmp.lt.u32.totalorder %s4812_s23, %s4807_s21 }
  0x93   : > { %p4816_p0 = scmp.lt.u32.totalorder %s4807_s21, %s5252_s12 }
  0x94   : > { %p4810_p3 = pnand %p4809_p1, %p4808_p8  ;;  %p4815_p13 = por %p4814_p6, %p4813_p11 }
  0x96   : > { %p4811_p12 = pneg %p4810_p3  ;;  %p4817_p7 = por %p4816_p0, %p4815_p13 }
  0x98   : > { %p4818_p5 = pnand %p4817_p7, %p4811_p12 }
  0x9a   : > { %4821 = shalt.err (!%p4818_p5)
}
  0x9b   : > { %s4822_s25 = scalar_lea.vmem %s5260_s9, 128  ;;  %s4973_s18 = smov [#allocation4]  }
  0x9c   : > { %p4823_p8 = scmp.ne.s32.totalorder %s5260_s9, %s4822_s25  ;;  %s4827_s26 = sshll.u32 %s4973_s18, 4  ;;  %s4828_s26 = int_to_ptr.vmem [resolvable:$false] %s4827_s26 }
  0x9d   : > { %s4829_s5 = scalar_lea.vmem %s4828_s26, 256  ;;  %p4830_p4 = scmp.lt.s32.totalorder %s5260_s9, %s4828_s26 }
  0x9e   : > { %p4825_p3 = pnand %p4823_p8, %p4809_p1  ;;  %p4831_p11 = scmp.lt.s32.totalorder %s4829_s5, %s4822_s25 }
  0xa0   : > { %p4826_p9 = pneg %p4825_p3  ;;  %p4832_p6 = por %p4831_p11, %p4830_p4 }
  0xa2   : > { %p4833_p13 = pnand %p4832_p6, %p4826_p9 }
  0xa4   : > { %4836 = shalt.err (!%p4833_p13)
}
  0xa5   : > { %4558 = dma.hbm_to_vmem [thread:$0]  (!%p5256_p10), %s5252_s12, 128, %s5260_s9, %s358_s2  }
  0xa6   : > { %s4232_s21 = sshll.u32 %s4961_s13, 8  ;;  %s5984_s23 = sshll.u32 %s5245_s22, 4 }
  0xa7   : > { %s380_s19 = scalar_lea.vmem [#allocation7], %s5984_s23  ;;  %s376_s26 = sand.u32 1, %s4965_s14  }
  0xa8   : > { %s387_s18 = sshll.u32 %s380_s19, 4  ;;  %s5298_s0 = scalar_lea.hbm %s5949_s1, %s4232_s21  ;;  %s5292_s18 = int_to_ptr.vmem [resolvable:$true] %s387_s18 }
  0xa9   : > { %s5300_s3 = scalar_lea.sflag [#allocation8], %s376_s26  ;;  %s4837_s4 = scalar_lea.hbm %s5298_s0, 256 }
  0xaa   : > { %p4838_p4 = scmp.ne.s32.totalorder %s5298_s0, %s4837_s4  ;;  %s4842_s12 = scalar_lea.hbm %s5949_s1, 512 }
  0xab   : > { %p4843_p0 = scmp.lt.u32.totalorder %s5298_s0, %s5949_s1  ;;  %p4844_p7 = scmp.lt.u32.totalorder %s4842_s12, %s4837_s4 }
  0xac   : > { %p4840_p9 = pnand %p4838_p4, %p4809_p1  ;;  %p4846_p8 = scmp.lt.u32.totalorder %s4837_s4, %s5298_s0 }
  0xad   : > { %p4845_p5 = por %p4844_p7, %p4843_p0 }
  0xae   : > { %p4841_p12 = pneg %p4840_p9 }
  0xaf   : > { %p4847_p3 = por %p4846_p8, %p4845_p5 }
  0xb1   : > { %p4848_p11 = pnand %p4847_p3, %p4841_p12 }
  0xb3   : > { %4851 = shalt.err (!%p4848_p11)
}
  0xb4   : > { %s4852_s21 = scalar_lea.vmem %s5292_s18, 256  ;;  %s4974_s19 = smov [#allocation7]  }
  0xb5   : > { %p4853_p6 = scmp.ne.s32.totalorder %s5292_s18, %s4852_s21  ;;  %s4857_s26 = sshll.u32 %s4974_s19, 4  ;;  %s4858_s26 = int_to_ptr.vmem [resolvable:$false] %s4857_s26 }
  0xb6   : > { %s4859_s25 = scalar_lea.vmem %s4858_s26, 512  ;;  %p4860_p9 = scmp.lt.s32.totalorder %s5292_s18, %s4858_s26 }
  0xb7   : > { %p4855_p13 = pnand %p4853_p6, %p4809_p1  ;;  %p4861_p0 = scmp.lt.s32.totalorder %s4859_s25, %s4852_s21 }
  0xb9   : > { %p4856_p4 = pneg %p4855_p13  ;;  %p4862_p7 = por %p4861_p0, %p4860_p9 }
  0xbb   : > { %p4863_p5 = pnand %p4862_p7, %p4856_p4 }
  0xbd   : > { %4866 = shalt.err (!%p4863_p5)
}
  0xbe   : > { %s5985_s4 = smov 8   ;;  %s5986_s5 = smov 128  }
  0xbf   : > { %4561 = dma.hbm_to_vmem [thread:$0]  (!%p5256_p10), %s5298_s0, 256, %s5292_s18, %s5300_s3, %s5986_s5, %s5986_s5, %s5985_s4  }
  0xc0   : > { %p5987_p1 = scmp.ne.s32.totalorder %s5971_s16, 0 }
  0xc1   : > { %s5332_s2 = sand.u32 (!%p5987_p1), 1, %s4949_s10  }
  0xc2   : > { %399 = sbr.rel (%p5987_p1) target bundleno = 2099 (0x833), region = 56  ;;  %s4136_s22 = sshll.u32 (!%p5987_p1), %s5332_s2, 3 }
  0xc3   : > { %s402_s12 = scalar_lea.sflag (!%p5987_p1), [#allocation5], %s5332_s2  ;;  %s405_s24 = scalar_lea.vmem (!%p5987_p1), [#allocation4], %s4136_s22 }
  0xc9   : > { %4920 = dma.done.wait (%p5228_p2), %s402_s12, 128  }
  0xca   : > { %4922 = vsyncadd (%p5228_p2), %s402_s12, 4294967168  ;;  %s410_s0 = sand.u32 1, %s5084_s15   ;;  %s4137_s3 = sshll.u32 %s5332_s2, 4 }
  0xcb   : > { %s411_s16 = scalar_lea.sflag [#allocation8], %s410_s0  ;;  %s414_s18 = scalar_lea.vmem [#allocation7], %s4137_s3 }
  0xcc   : > { %4924 = dma.done.wait (%p5228_p2), %s411_s16, 256  }
  0xcd   : > { %4926 = vsyncadd (%p5228_p2), %s411_s16, 4294967040  ;;  %p5988_p10 = scmp.eq.s32.totalorder %s5084_s15, 0 }
  0xcf   : > { %4928 = dma.done.wait (%p5988_p10), [#allocation8], 512   ;;  %p5989_p12 = pmov %p5988_p10 }
  0xd0   : > { %p5990_p8 = pmov %p5988_p10 }
  0xd1   : > { %4930 = vsyncadd (%p5989_p12), [#allocation8], 4294966784 }
  0xd2   : > { %4932 = dma.done.wait (%p5990_p8), [#allocation11], 1024   ;;  %p5991_p3 = pmov %p5990_p8 }
  0xd4   : > { %4934 = vsyncadd (%p5991_p3), [#allocation11], 4294966272  ;;  %p5992_p11 = pmov %p5991_p3 }
  0xd5   : > { %p5993_p6 = pmov %p5991_p3 }
  0xd6   : > { %4936 = dma.done.wait (%p5992_p11), [#allocation14], 1024  }
  0xd7   : > { %4938 = vsyncadd (%p5993_p6), [#allocation14], 4294966272  ;;  %vm478_vm0 = vcmask 261120   ;;  %v476_v0 = vld [vmem:[%s414_s18] sm:$0xff]  ;;  %v1820_v1 = vld [vmem:[%s405_s24] sm:$0xff]  ;;  %v4975_v25 = vmov 0.0|0.0   ;;  %v507_v62 = vlaneseq }
  0xd8   : > { %v477_v2 = vld [vmem:[%s414_s18 + $0x8] sm:$0xff]  ;;  %v479_v3 = vsel %vm478_vm0, %v476_v0, 0.0  ;;  %v1822_v4 = vsel %vm478_vm0, %v1820_v1, 0.0  ;;  %v522_v21 = vld [vmem:[#allocation10] sm:$0xff]  ;;  %4452 = vmatprep.subr.bf16.mxu1 %v4975_v25  ;;  %v524_v27 = vld [vmem:[#allocation10 + $0x10] sm:$0xff]  ;;  %vm4976_vm1 = vmmov 0  }
  0xd9   : > { %480 = vadd.xlane.f32.xlu0 %v479_v3  ;;  %1823 = vadd.xlane.f32.xlu1 %v1822_v4  ;;  %v482_v5 = vsel %vm478_vm0, %v477_v2, 0.0  ;;  %v523_v22 = vld [vmem:[#allocation10 + $0x8] sm:$0xff]  ;;  %v1850_v23 = vld [vmem:[#allocation9] sm:$0xff]  ;;  %v525_v28 = vld [vmem:[#allocation10 + $0x18] sm:$0xff]  ;;  %v4977_v34 = vmov 0.0   ;;  %s4978_s21 = smov 124  }
  0xda   : > { %v4444_v24 = vpack.c.bf16 %v523_v22, %v522_v21  ;;  %v1851_v26 = vld [vmem:[#allocation9 + $0x8] sm:$0xff]  ;;  %v4448_v30 = vpack.c.bf16 %v525_v28, %v524_v27  ;;  %v1852_v31 = vld [vmem:[#allocation9 + $0x10] sm:$0xff]  ;;  %v1853_v32 = vld [vmem:[#allocation9 + $0x18] sm:$0xff]  ;;  %4318 = vmatprep.mubr.msk.f32.mxu1 %vm4976_vm1, %v4977_v34  ;;  %s4979_s19 = smov 120   ;;  %s4980_s26 = smov 116   ;;  %vm1787_vm2 = vcmask 31744  }
  0xdb   : > { %v4453_v29 = vpack.c.bf16 %v1851_v26, %v1850_v23  ;;  %v4456_v33 = vpack.c.bf16 %v1853_v32, %v1852_v31  ;;  %v4233_v45 = vld [vmem:[%s5954_s6] ss:$0 sm:$0xff]  ;;  %s4981_s25 = smov 112   ;;  %s4982_s4 = smov 108   ;;  %v4988_v63 = vmov 1983009808   ;;  %vm5548_vm3 = vmpackc.low %vm1787_vm2, %vm1787_vm2 }
  0xdc   : > { %4445 = vmatprep.subr.bf16.mxu0 %v4444_v24  ;;  %v4234_v47 = vld [vmem:[%s5955_s7] ss:$0 sm:$0xff]  ;;  %s4983_s5 = smov 104   ;;  %s4984_s12 = smov 100   ;;  %v4989_v3 = vmov 1934713408  }
  0xdd   : > { %483 = vadd.xlane.f32.xlu0 %v482_v5  ;;  %4447 = vmatpush3.bf16.msra.mxu0 %v4444_v24  ;;  %s4985_s24 = smov 96   ;;  %s4986_s0 = smov 92   ;;  %v766_v4 = vunpack.c.l.s4 %v4989_v3  ;;  %v508_v5 = vshrl.u32 %v507_v62, 7  ;;  %vm2894_vm4 = vcmask 130048   ;;  %vm3868_vm5 = vcmask 64512  }
  0xde   : > { %4454 = vmatpush3.bf16.msra.mxu1 %v4453_v29  ;;  %4449 = vmatprep.subr.bf16.mxu0 %v4448_v30  ;;  %s4987_s3 = smov 88   ;;  %s4990_s16 = smov 84   ;;  %vm3870_vm6 = vcmask 97280   ;;  %vm3873_vm7 = vcmask 162816   ;;  %vm3875_vm8 = vcmask 195584   ;;  %vm3877_vm9 = vcmask 228352  }
  0xdf   : > { %4455 = vmatprep.subr.bf16.mxu1 %v4975_v25  ;;  %s4991_s18 = smov 80   ;;  %s4992_s15 = smov 76  }
  0xe0   : > { %s4993_s27 = smov 72   ;;  %s4994_s9 = smov 68  }
  0xe1   : > { %4451 = vmatpush3.bf16.msra.mxu0 %v4448_v30  ;;  %s4995_s23 = smov 8   ;;  %p5999_p13 = scmp.ne.s32.totalorder %s5980_s28, 0 }
  0xe2   : > { %4458 = vmatprep.subr.bf16.mxu0 %v4975_v25  ;;  %4457 = vmatpush3.bf16.msra.mxu1 %v4456_v33 }
  0xe3   : > { %4462 = vmatprep.subr.bf16.mxu1 %v4975_v25 }
 0x166   : > { %v481_v6 = vpop.xlane.xlu0 %480  ;;  %v1824_v7 = vpop.xlane.xlu1 %1823 }
 0x167   : > { %v486_v8 = vmul.f32 0.03125, %v481_v6  ;;  %v1826_v9 = vmul.f32 0.03125, %v1824_v7 }
 0x169   : > { %v488_v10 = vsub.f32 %v476_v0, %v486_v8  ;;  %v1827_v11 = vsub.f32 %v1820_v1, %v1826_v9  ;;  %v702_v0 = vunpack.c.l.s4 %v4988_v63  ;;  %v767_v9 = vunpack.c.0.s8 %v766_v4 }
 0x16a   : > { %v484_v12 = vpop.xlane.xlu0 %483 }
 0x16b   : > { %v487_v13 = vmul.f32 0.03125, %v484_v12  ;;  %v490_v14 = vmul.f32 %v488_v10, %v488_v10  ;;  %v1828_v15 = vmul.f32 %v1827_v11, %v1827_v11  ;;  %v703_v6 = vunpack.c.0.s8 %v702_v0 }
 0x16d   : > { %v489_v16 = vsub.f32 %v477_v2, %v487_v13  ;;  %v492_v17 = vsel %vm478_vm0, %v490_v14, 0.0  ;;  %v1829_v18 = vsel %vm478_vm0, %v1828_v15, 0.0 }
 0x16e   : > { %493 = vadd.xlane.f32.xlu1 %v492_v17  ;;  %v5424_v17 = vsub.s32 %v767_v9, %v508_v5 }
 0x16f   : > { %v491_v19 = vmul.f32 %v489_v16, %v489_v16 }
 0x171   : > { %v495_v20 = vsel %vm478_vm0, %v491_v19, 0.0 }
 0x172   : > { %1830 = vadd.xlane.f32.xlu1 %v1829_v18  ;;  %496 = vadd.xlane.f32.xlu0 %v495_v20 }
 0x1fb   : > { %v494_v35 = vpop.xlane.xlu1 %493 }
 0x1fc   : > { %v498_v36 = vmul.f32 0.03125, %v494_v35 }
 0x1fe   : > { %v500_v37 = vadd.f32 1e-05, %v498_v36 }
 0x1ff   : > { %v1831_v38 = vpop.xlane.xlu1 %1830  ;;  %v497_v39 = vpop.xlane.xlu0 %496 }
 0x200   : > { %4657 = vrsqrt.f32 %v500_v37  ;;  %v1832_v40 = vmul.f32 0.03125, %v1831_v38  ;;  %v499_v41 = vmul.f32 0.03125, %v497_v39 }
 0x202   : > { %v1833_v42 = vadd.f32 1e-05, %v1832_v40  ;;  %v501_v43 = vadd.f32 1e-05, %v499_v41 }
 0x204   : > { %4659 = vrsqrt.f32 %v1833_v42 }
 0x205   : > { %4661 = vrsqrt.f32 %v501_v43 }
 0x20a   : > { %v4658_v44 = vpop.eup %4657 }
 0x20b   : > { %v504_v46 = vmul.f32 %v4658_v44, %v488_v10  ;;  %v5420_v10 = vsub.s32 %v703_v6, %v508_v5 }
 0x20d   : > { %v512_v48 = vmul.f32 %v4233_v45, %v504_v46 }
 0x20e   : > { %v4660_v49 = vpop.eup %4659 }
 0x20f   : > { %v4662_v50 = vpop.eup %4661  ;;  %v520_v51 = vadd.f32 %v4234_v47, %v512_v48  ;;  %v1835_v52 = vmul.f32 %v4660_v49, %v1827_v11 }
 0x210   : > { %v505_v53 = vmul.f32 %v4662_v50, %v489_v16 }
 0x211   : > { %4307 = vmatprep.mubr.msk.f32.mxu0 %vm478_vm0, %v520_v51  ;;  %v1842_v54 = vmul.f32 %v4233_v45, %v1835_v52 }
 0x212   : > { %v513_v55 = vmul.f32 %v4233_v45, %v505_v53 }
 0x213   : > { %v1849_v56 = vadd.f32 %v4234_v47, %v1842_v54 }
 0x214   : > { %v521_v57 = vadd.f32 %v4234_v47, %v513_v55 }
 0x215   : > { %4319 = vmatmul.mubr.msk.f32.vlgmr.msra.gmra.mrb[0].mxu1 %vm478_vm0, %v1849_v56 }
 0x216   : > { %4308 = vmatmul.mubr.msk.f32.vlgmr.msra.gmra.mrb[0].mxu0 %vm478_vm0, %v521_v57  ;;  %4332 = vmatprep.mubr.msk.f32.mxu1 %vm4976_vm1, %v4977_v34 }
 0x217   : > { %4325 = vmatprep.mubr.msk.f32.mxu0 %vm4976_vm1, %v4977_v34 }
 0x2e8   : > { %v5385_v58 = vpop.f32.mrb[0].mxu1 }
 0x2e9   : > { %v5387_v59 = vpop.f32.mrb[0].mxu0  ;;  %v4320_v60 = vpop.f32.mrb[1].mxu1 }
 0x2ea   : > { %611 = vrot.lane.b32.xlu1 %v5387_v59, %s4978_s21  ;;  %v5390_v61 = vpop.f32.mrb[1].mxu0 }
 0x2eb   : > { %609 = vrot.lane.b32.xlu0 %v5390_v61, %s4978_s21 }
 0x2ee   : > { %617 = vrot.lane.b32.xlu1 %v5387_v59, %s4979_s19 }
 0x2ef   : > { %1928 = vrot.lane.b32.xlu0 %v5385_v58, %s4978_s21  ;;  %s4996_s21 = smov 4  }
 0x2f2   : > { %623 = vrot.lane.b32.xlu1 %v5387_v59, %s4980_s26 }
 0x2f3   : > { %621 = vrot.lane.b32.xlu0 %v5390_v61, %s4980_s26 }
 0x2f6   : > { %615 = vrot.lane.b32.xlu1 %v5390_v61, %s4979_s19 }
 0x2f7   : > { %627 = vrot.lane.b32.xlu0 %v5390_v61, %s4981_s25 }
 0x2fa   : > { %629 = vrot.lane.b32.xlu1 %v5387_v59, %s4981_s25 }
 0x2fb   : > { %633 = vrot.lane.b32.xlu0 %v5390_v61, %s4982_s4 }
 0x2fe   : > { %635 = vrot.lane.b32.xlu1 %v5387_v59, %s4982_s4 }
 0x2ff   : > { %639 = vrot.lane.b32.xlu0 %v5390_v61, %s4983_s5 }
 0x302   : > { %641 = vrot.lane.b32.xlu1 %v5387_v59, %s4983_s5 }
 0x303   : > { %645 = vrot.lane.b32.xlu0 %v5390_v61, %s4984_s12 }
 0x306   : > { %647 = vrot.lane.b32.xlu1 %v5387_v59, %s4984_s12 }
 0x307   : > { %1934 = vrot.lane.b32.xlu0 %v5385_v58, %s4980_s26  ;;  %s4998_s26 = smov 24  }
 0x30a   : > { %1931 = vrot.lane.b32.xlu1 %v5385_v58, %s4979_s19  ;;  %s4997_s19 = smov 12  }
 0x30b   : > { %1940 = vrot.lane.b32.xlu0 %v5385_v58, %s4982_s4  ;;  %s5000_s4 = smov 20  }
 0x30e   : > { %1937 = vrot.lane.b32.xlu1 %v5385_v58, %s4981_s25  ;;  %s4999_s25 = smov 16  }
 0x30f   : > { %1946 = vrot.lane.b32.xlu0 %v5385_v58, %s4984_s12  ;;  %s5996_s12 = sld [smem:[#allocation22_spill]] }
 0x312   : > { %1943 = vrot.lane.b32.xlu1 %v5385_v58, %s4983_s5  ;;  %s5001_s5 = smov 28  }
 0x313   : > { %653 = vrot.lane.b32.xlu0 %v5387_v59, %s4985_s24 }
 0x316   : > { %659 = vrot.lane.b32.xlu1 %v5387_v59, %s4986_s0 }
 0x31a   : > { %651 = vrot.lane.b32.xlu1 %v5390_v61, %s4985_s24 }
 0x31e   : > { %657 = vrot.lane.b32.xlu1 %v5390_v61, %s4986_s0 }
 0x322   : > { %663 = vrot.lane.b32.xlu1 %v5390_v61, %s4987_s3 }
 0x35c   : > { %v612_v1 = vpop.permute.xlu1 %611 }
 0x35d   : > { %v610_v2 = vpop.permute.xlu0 %609 }
 0x360   : > { %v618_v7 = vpop.permute.xlu1 %617 }
 0x361   : > { %v5418_v8 = vpop.permute.xlu0 %1928  ;;  %v971_v11 = vcombine.low %v5387_v59, %v618_v7  ;;  %v972_v12 = vcombine.high %v5387_v59, %v618_v7 }
 0x363   : > { %v979_v18 = vrot.slane %v971_v11, %v5420_v10  ;;  %v986_v19 = vrot.slane %v972_v12, %v5420_v10 }
 0x364   : > { %v624_v13 = vpop.permute.xlu1 %623 }
 0x365   : > { %v987_v14 = vcombine.low %v612_v1, %v624_v13  ;;  %v988_v15 = vcombine.high %v612_v1, %v624_v13  ;;  %v622_v16 = vpop.permute.xlu0 %621 }
 0x366   : > { %v715_v22 = vcombine.low %v610_v2, %v622_v16  ;;  %v716_v23 = vcombine.high %v610_v2, %v622_v16 }
 0x367   : > { %v995_v20 = vrot.slane %v987_v14, %v5420_v10  ;;  %v1002_v21 = vrot.slane %v988_v15, %v5420_v10 }
 0x368   : > { %v616_v24 = vpop.permute.xlu1 %615  ;;  %v723_v38 = vrot.slane %v715_v22, %v5420_v10  ;;  %v730_v39 = vrot.slane %v716_v23, %v5420_v10 }
 0x369   : > { %v1035_v26 = vcombine.low %v979_v18, %v995_v20  ;;  %v1036_v27 = vcombine.high %v979_v18, %v995_v20  ;;  %v1051_v28 = vcombine.low %v986_v19, %v1002_v21  ;;  %v1052_v29 = vcombine.high %v986_v19, %v1002_v21  ;;  %v5430_v30 = vpop.permute.xlu0 %627 }
 0x36a   : > { %v699_v31 = vcombine.low %v5390_v61, %v616_v24  ;;  %v700_v32 = vcombine.high %v5390_v61, %v616_v24 }
 0x36b   : > { %v1043_v33 = vrot.slane %v1035_v26, %v5424_v17  ;;  %v1050_v35 = vrot.slane %v1036_v27, %v5424_v17  ;;  %v1059_v36 = vrot.slane %v1051_v28, %v5424_v17  ;;  %v1066_v37 = vrot.slane %v1052_v29, %v5424_v17 }
 0x36c   : > { %v707_v40 = vrot.slane %v699_v31, %v5420_v10  ;;  %v714_v41 = vrot.slane %v700_v32, %v5420_v10  ;;  %v5442_v42 = vpop.permute.xlu1 %629 }
 0x36d   : > { %v4153_v43 = vcombine.low %v1043_v33, %v1050_v35  ;;  %v4155_v44 = vcombine.high %v1043_v33, %v1050_v35  ;;  %v4157_v45 = vcombine.low %v1059_v36, %v1066_v37  ;;  %v4159_v46 = vcombine.high %v1059_v36, %v1066_v37  ;;  %v5444_v47 = vpop.permute.xlu0 %633 }
 0x36e   : > { %v763_v48 = vcombine.low %v707_v40, %v723_v38  ;;  %v764_v49 = vcombine.high %v707_v40, %v723_v38  ;;  %v779_v50 = vcombine.low %v714_v41, %v730_v39  ;;  %v780_v51 = vcombine.high %v714_v41, %v730_v39 }
 0x36f   : > { %v1387_v52 = vrot.slane %v4153_v43, %v5420_v10  ;;  %v1403_v53 = vrot.slane %v4155_v44, %v5420_v10  ;;  %v1419_v54 = vrot.slane %v4157_v45, %v5420_v10  ;;  %v1435_v55 = vrot.slane %v4159_v46, %v5420_v10 }
 0x370   : > { %v771_v56 = vrot.slane %v763_v48, %v5424_v17  ;;  %v778_v57 = vrot.slane %v764_v49, %v5424_v17  ;;  %v787_v60 = vrot.slane %v779_v50, %v5424_v17  ;;  %v794_v62 = vrot.slane %v780_v51, %v5424_v17  ;;  %v5454_v63 = vpop.permute.xlu1 %635 }
 0x371   : > { %v1443_v0 = vcombine.low %v1387_v52, %v1403_v53  ;;  %v1444_v1 = vcombine.high %v1387_v52, %v1403_v53  ;;  %v1475_v2 = vcombine.low %v1419_v54, %v1435_v55  ;;  %v1476_v3 = vcombine.high %v1419_v54, %v1435_v55  ;;  %v640_v4 = vpop.permute.xlu0 %639 }
 0x372   : > { %v4145_v5 = vcombine.low %v771_v56, %v778_v57  ;;  %v4147_v6 = vcombine.high %v771_v56, %v778_v57  ;;  %v4149_v7 = vcombine.low %v787_v60, %v794_v62  ;;  %v4151_v9 = vcombine.high %v787_v60, %v794_v62 }
 0x373   : > { %v1451_v11 = vrot.slane %v1443_v0, %v5424_v17  ;;  %v1458_v12 = vrot.slane %v1444_v1, %v5424_v17  ;;  %v1483_v13 = vrot.slane %v1475_v2, %v5424_v17  ;;  %v1490_v14 = vrot.slane %v1476_v3, %v5424_v17 }
 0x374   : > { %v1251_v15 = vrot.slane %v4145_v5, %v5420_v10  ;;  %v1267_v16 = vrot.slane %v4147_v6, %v5420_v10  ;;  %v1283_v18 = vrot.slane %v4149_v7, %v5420_v10  ;;  %v1299_v19 = vrot.slane %v4151_v9, %v5420_v10  ;;  %v642_v20 = vpop.permute.xlu1 %641 }
 0x375   : > { %v1507_v21 = vcombine.low %v1451_v11, %v1483_v13  ;;  %v1508_v22 = vcombine.high %v1451_v11, %v1483_v13  ;;  %v1509_v23 = vcombine.low %v1458_v12, %v1490_v14  ;;  %v1510_v24 = vcombine.high %v1458_v12, %v1490_v14  ;;  %v646_v26 = vpop.permute.xlu0 %645 }
 0x376   : > { %v1307_v27 = vcombine.low %v1251_v15, %v1267_v16  ;;  %v1308_v28 = vcombine.high %v1251_v15, %v1267_v16  ;;  %v1339_v29 = vcombine.low %v1283_v18, %v1299_v19  ;;  %v1340_v31 = vcombine.high %v1283_v18, %v1299_v19 }
 0x377   : > { %1789 = vst.msk [vmem:[#allocation2 + $0x8] sm:$0xff] %vm1787_vm2, %v1507_v21  ;;  %1791 = vst.msk [vmem:[#allocation2 + $0x18] sm:$0xff] %vm1787_vm2, %v1508_v22  ;;  %v731_v32 = vcombine.low %v5430_v30, %v640_v4  ;;  %v732_v33 = vcombine.high %v5430_v30, %v640_v4  ;;  %v1003_v35 = vcombine.low %v5442_v42, %v642_v20 }
 0x378   : > { %1793 = vst.msk [vmem:[#allocation2 + $0x28] sm:$0xff] %vm1787_vm2, %v1509_v23  ;;  %1795 = vst.msk [vmem:[#allocation2 + $0x38] sm:$0xff] %vm1787_vm2, %v1510_v24  ;;  %v1004_v36 = vcombine.high %v5442_v42, %v642_v20  ;;  %v1315_v37 = vrot.slane %v1307_v27, %v5424_v17  ;;  %v1322_v38 = vrot.slane %v1308_v28, %v5424_v17  ;;  %v648_v41 = vpop.permute.xlu1 %647 }
 0x379   : > { %v1347_v39 = vrot.slane %v1339_v29, %v5424_v17  ;;  %v1354_v40 = vrot.slane %v1340_v31, %v5424_v17  ;;  %v739_v43 = vrot.slane %v731_v32, %v5420_v10  ;;  %v746_v44 = vrot.slane %v732_v33, %v5420_v10  ;;  %v1935_v45 = vpop.permute.xlu0 %1934 }
 0x37a   : > { %v747_v42 = vcombine.low %v5444_v47, %v646_v26  ;;  %v748_v50 = vcombine.high %v5444_v47, %v646_v26  ;;  %v1019_v51 = vcombine.low %v5454_v63, %v648_v41  ;;  %v1020_v52 = vcombine.high %v5454_v63, %v648_v41 }
 0x37b   : > { %v1371_v46 = vcombine.low %v1315_v37, %v1347_v39  ;;  %v1372_v30 = vcombine.high %v1315_v37, %v1347_v39  ;;  %v1373_v48 = vcombine.low %v1322_v38, %v1354_v40  ;;  %v1374_v49 = vcombine.high %v1322_v38, %v1354_v40 }
 0x37c   : > { %v1011_v53 = vrot.slane %v1003_v35, %v5420_v10  ;;  %v1018_v54 = vrot.slane %v1004_v36, %v5420_v10  ;;  %v1965_v55 = vcombine.low %v5418_v8, %v1935_v45  ;;  %v1966_v47 = vcombine.high %v5418_v8, %v1935_v45  ;;  %v5490_v56 = vpop.permute.xlu1 %1931 }
 0x37d   : > { %1788 = vst.msk [vmem:[#allocation2] sm:$0xff] %vm1787_vm2, %v1371_v46  ;;  %1790 = vst.msk [vmem:[#allocation2 + $0x10] sm:$0xff] %vm1787_vm2, %v1372_v30  ;;  %v755_v57 = vrot.slane %v747_v42, %v5420_v10  ;;  %v762_v60 = vrot.slane %v748_v50, %v5420_v10  ;;  %v1027_v62 = vrot.slane %v1019_v51, %v5420_v10  ;;  %v5514_v32 = vpop.permute.xlu0 %1940 }
 0x37e   : > { %1792 = vst.msk [vmem:[#allocation2 + $0x20] sm:$0xff] %vm1787_vm2, %v1373_v48  ;;  %1794 = vst.msk [vmem:[#allocation2 + $0x30] sm:$0xff] %vm1787_vm2, %v1374_v49  ;;  %v1034_v63 = vrot.slane %v1020_v52, %v5420_v10  ;;  %v5497_v0 = vrot.slane %v1965_v55, %v5420_v10  ;;  %v5500_v1 = vrot.slane %v1966_v47, %v5420_v10 }
 0x37f   : > { %v1949_v2 = vcombine.low %v5385_v58, %v5490_v56  ;;  %v1950_v8 = vcombine.high %v5385_v58, %v5490_v56  ;;  %v795_v3 = vcombine.low %v739_v43, %v755_v57  ;;  %v796_v4 = vcombine.high %v739_v43, %v755_v57 }
 0x380   : > { %v811_v5 = vcombine.low %v746_v44, %v762_v60  ;;  %v812_v6 = vcombine.high %v746_v44, %v762_v60  ;;  %v1067_v7 = vcombine.low %v1011_v53, %v1027_v62  ;;  %v1068_v9 = vcombine.high %v1011_v53, %v1027_v62  ;;  %v1938_v38 = vpop.permute.xlu1 %1937 }
 0x381   : > { %v1083_v11 = vcombine.low %v1018_v54, %v1034_v63  ;;  %v1084_v12 = vcombine.high %v1018_v54, %v1034_v63  ;;  %v803_v13 = vrot.slane %v795_v3, %v5424_v17  ;;  %v810_v14 = vrot.slane %v796_v4, %v5424_v17  ;;  %v1947_v62 = vpop.permute.xlu0 %1946 }
 0x382   : > { %v819_v15 = vrot.slane %v811_v5, %v5424_v17  ;;  %v826_v16 = vrot.slane %v812_v6, %v5424_v17  ;;  %v1075_v18 = vrot.slane %v1067_v7, %v5424_v17  ;;  %v1082_v19 = vrot.slane %v1068_v9, %v5424_v17 }
 0x383   : > { %v1091_v20 = vrot.slane %v1083_v11, %v5424_v17  ;;  %v1098_v21 = vrot.slane %v1084_v12, %v5424_v17  ;;  %v4146_v22 = vcombine.low %v803_v13, %v810_v14  ;;  %v4148_v23 = vcombine.high %v803_v13, %v810_v14 }
 0x384   : > { %v4150_v24 = vcombine.low %v819_v15, %v826_v16  ;;  %v4152_v26 = vcombine.high %v819_v15, %v826_v16  ;;  %v4154_v27 = vcombine.low %v1075_v18, %v1082_v19  ;;  %v4156_v28 = vcombine.high %v1075_v18, %v1082_v19  ;;  %v1944_v6 = vpop.permute.xlu1 %1943  ;;  %v2221_v7 = vld [vmem:[#allocation2] sm:$0xff]  ;;  %v2223_v9 = vld [vmem:[#allocation2 + $0x10] sm:$0xff] }
 0x385   : > { %v4158_v29 = vcombine.low %v1091_v20, %v1098_v21  ;;  %v4160_v31 = vcombine.high %v1091_v20, %v1098_v21  ;;  %v1258_v33 = vrot.slane %v4146_v22, %v5420_v10  ;;  %v1274_v35 = vrot.slane %v4148_v23, %v5420_v10  ;;  %v2222_v20 = vld [vmem:[#allocation2 + $0x8] sm:$0xff]  ;;  %v2224_v22 = vld [vmem:[#allocation2 + $0x18] sm:$0xff]  ;;  %v2253_v21 = vld [vmem:[#allocation13] sm:$0xff] }
 0x386   : > { %v1290_v36 = vrot.slane %v4150_v24, %v5420_v10  ;;  %v1306_v37 = vrot.slane %v4152_v26, %v5420_v10  ;;  %v1394_v39 = vrot.slane %v4154_v27, %v5420_v10  ;;  %v1410_v40 = vrot.slane %v4156_v28, %v5420_v10 }
 0x387   : > { %v1426_v41 = vrot.slane %v4158_v29, %v5420_v10  ;;  %v1442_v43 = vrot.slane %v4160_v31, %v5420_v10  ;;  %v1323_v44 = vcombine.low %v1258_v33, %v1274_v35  ;;  %v1324_v45 = vcombine.high %v1258_v33, %v1274_v35 }
 0x388   : > { %v1355_v46 = vcombine.low %v1290_v36, %v1306_v37  ;;  %v1356_v30 = vcombine.high %v1290_v36, %v1306_v37  ;;  %v1459_v48 = vcombine.low %v1394_v39, %v1410_v40  ;;  %v1460_v49 = vcombine.high %v1394_v39, %v1410_v40 }
 0x389   : > { %v1491_v42 = vcombine.low %v1426_v41, %v1442_v43  ;;  %v1492_v50 = vcombine.high %v1426_v41, %v1442_v43  ;;  %v1331_v51 = vrot.slane %v1323_v44, %v5424_v17  ;;  %v1338_v52 = vrot.slane %v1324_v45, %v5424_v17 }
 0x38a   : > { %v1363_v53 = vrot.slane %v1355_v46, %v5424_v17  ;;  %v1370_v54 = vrot.slane %v1356_v30, %v5424_v17  ;;  %v1467_v55 = vrot.slane %v1459_v48, %v5424_v17  ;;  %v1474_v47 = vrot.slane %v1460_v49, %v5424_v17 }
 0x38b   : > { %v1499_v57 = vrot.slane %v1491_v42, %v5424_v17  ;;  %v1506_v60 = vrot.slane %v1492_v50, %v5424_v17  ;;  %v1957_v15 = vrot.slane %v1949_v2, %v5420_v10  ;;  %v1964_v16 = vrot.slane %v1950_v8, %v5420_v10 }
 0x38c   : > { %v1375_v63 = vcombine.low %v1331_v51, %v1363_v53  ;;  %v1376_v3 = vcombine.high %v1331_v51, %v1363_v53  ;;  %v1377_v4 = vcombine.low %v1338_v52, %v1370_v54  ;;  %v1378_v5 = vcombine.high %v1338_v52, %v1370_v54 }
 0x38d   : > { %v1511_v11 = vcombine.low %v1467_v55, %v1499_v57  ;;  %v1512_v12 = vcombine.high %v1467_v55, %v1499_v57  ;;  %v1513_v13 = vcombine.low %v1474_v47, %v1506_v60  ;;  %v1514_v14 = vcombine.high %v1474_v47, %v1506_v60  ;;  %v2225_v47 = vld [vmem:[#allocation2 + $0x20] sm:$0xff]  ;;  %v2227_v57 = vld [vmem:[#allocation2 + $0x30] sm:$0xff] }
 0x38e   : > { %1796 = vst.msk [vmem:[#allocation2 + $0x40] sm:$0xff] %vm1787_vm2, %v1375_v63  ;;  %1798 = vst.msk [vmem:[#allocation2 + $0x50] sm:$0xff] %vm1787_vm2, %v1376_v3  ;;  %v1997_v18 = vcombine.low %v5514_v32, %v1947_v62  ;;  %v1998_v19 = vcombine.high %v5514_v32, %v1947_v62  ;;  %v1981_v58 = vcombine.low %v1938_v38, %v1944_v6 }
 0x38f   : > { %1800 = vst.msk [vmem:[#allocation2 + $0x60] sm:$0xff] %vm1787_vm2, %v1377_v4  ;;  %1802 = vst.msk [vmem:[#allocation2 + $0x70] sm:$0xff] %vm1787_vm2, %v1378_v5  ;;  %v1982_v56 = vcombine.high %v1938_v38, %v1944_v6  ;;  %v4459_v2 = vpack.c.bf16 %v2222_v20, %v2221_v7  ;;  %v4463_v8 = vpack.c.bf16 %v2224_v22, %v2223_v9  ;;  %v2226_v9 = vld [vmem:[#allocation2 + $0x28] sm:$0xff] }
 0x390   : > { %1797 = vst.msk [vmem:[#allocation2 + $0x48] sm:$0xff] %vm1787_vm2, %v1511_v11  ;;  %1799 = vst.msk [vmem:[#allocation2 + $0x58] sm:$0xff] %vm1787_vm2, %v1512_v12  ;;  %v2013_v23 = vcombine.low %v1957_v15, %v5497_v0  ;;  %v2014_v24 = vcombine.high %v1957_v15, %v5497_v0  ;;  %v2029_v26 = vcombine.low %v1964_v16, %v5500_v1  ;;  %v2228_v11 = vld [vmem:[#allocation2 + $0x38] sm:$0xff] }
 0x391   : > { %1801 = vst.msk [vmem:[#allocation2 + $0x68] sm:$0xff] %vm1787_vm2, %v1513_v13  ;;  %1803 = vst.msk [vmem:[#allocation2 + $0x78] sm:$0xff] %vm1787_vm2, %v1514_v14  ;;  %v2030_v27 = vcombine.high %v1964_v16, %v5500_v1  ;;  %v2005_v28 = vrot.slane %v1997_v18, %v5420_v10  ;;  %v2012_v29 = vrot.slane %v1998_v19, %v5420_v10  ;;  %4461 = vmatpush3.bf16.xpose.msk.msra.mxu0 %vm5548_vm3, %v4459_v2 }
 0x392   : > { %v1989_v31 = vrot.slane %v1981_v58, %v5420_v10  ;;  %v1996_v32 = vrot.slane %v1982_v56, %v5420_v10  ;;  %v2021_v33 = vrot.slane %v2013_v23, %v5424_v17  ;;  %v2028_v35 = vrot.slane %v2014_v24, %v5424_v17  ;;  %4465 = vmatpush3.bf16.xpose.msk.msra.mxu1 %vm5548_vm3, %v4463_v8 }
 0x393   : > { %v2037_v0 = vrot.slane %v2029_v26, %v5424_v17  ;;  %v2044_v36 = vrot.slane %v2030_v27, %v5424_v17  ;;  %4466 = vmatprep.subr.bf16.mxu0 %v4975_v25  ;;  %4470 = vmatprep.subr.bf16.mxu1 %v4975_v25  ;;  %v4467_v12 = vpack.c.bf16 %v2226_v9, %v2225_v47  ;;  %v2256_v47 = vld [vmem:[#allocation13 + $0x18] sm:$0xff] }
 0x394   : > { %v2045_v1 = vcombine.low %v1989_v31, %v2005_v28  ;;  %v2046_v37 = vcombine.high %v1989_v31, %v2005_v28  ;;  %v2061_v38 = vcombine.low %v1996_v32, %v2012_v29  ;;  %v2062_v39 = vcombine.high %v1996_v32, %v2012_v29 }
 0x395   : > { %v4178_v40 = vcombine.low %v2021_v33, %v2028_v35  ;;  %v4180_v41 = vcombine.high %v2021_v33, %v2028_v35  ;;  %v4182_v43 = vcombine.low %v2037_v0, %v2044_v36  ;;  %v4184_v44 = vcombine.high %v2037_v0, %v2044_v36  ;;  %v2229_v24 = vld [vmem:[#allocation2 + $0x40] sm:$0xff]  ;;  %v2231_v26 = vld [vmem:[#allocation2 + $0x50] sm:$0xff] }
 0x396   : > { %v2053_v49 = vrot.slane %v2045_v1, %v5424_v17  ;;  %v2060_v42 = vrot.slane %v2046_v37, %v5424_v17  ;;  %v2069_v50 = vrot.slane %v2061_v38, %v5424_v17  ;;  %v2076_v51 = vrot.slane %v2062_v39, %v5424_v17  ;;  %v2233_v37 = vld [vmem:[#allocation2 + $0x60] sm:$0xff]  ;;  %v2235_v38 = vld [vmem:[#allocation2 + $0x70] sm:$0xff] }
 0x397   : > { %v2093_v45 = vrot.slane %v4178_v40, %v5420_v10  ;;  %v2109_v46 = vrot.slane %v4180_v41, %v5420_v10  ;;  %v2125_v30 = vrot.slane %v4182_v43, %v5420_v10  ;;  %v2141_v48 = vrot.slane %v4184_v44, %v5420_v10  ;;  %v2230_v22 = vld [vmem:[#allocation2 + $0x48] sm:$0xff]  ;;  %v2232_v58 = vld [vmem:[#allocation2 + $0x58] sm:$0xff] }
 0x398   : > { %v4179_v60 = vcombine.low %v2053_v49, %v2060_v42  ;;  %v4181_v62 = vcombine.high %v2053_v49, %v2060_v42  ;;  %v4183_v63 = vcombine.low %v2069_v50, %v2076_v51  ;;  %v4185_v3 = vcombine.high %v2069_v50, %v2076_v51  ;;  %v2234_v32 = vld [vmem:[#allocation2 + $0x68] sm:$0xff]  ;;  %v2236_v33 = vld [vmem:[#allocation2 + $0x78] sm:$0xff] }
 0x399   : > { %v2149_v52 = vcombine.low %v2093_v45, %v2109_v46  ;;  %v2181_v53 = vcombine.low %v2125_v30, %v2141_v48  ;;  %v2150_v4 = vcombine.high %v2093_v45, %v2109_v46  ;;  %v2182_v5 = vcombine.high %v2125_v30, %v2141_v48  ;;  %v2254_v46 = vld [vmem:[#allocation13 + $0x8] sm:$0xff] }
 0x39a   : > { %v4471_v13 = vpack.c.bf16 %v2228_v11, %v2227_v57  ;;  %v2100_v14 = vrot.slane %v4179_v60, %v5420_v10  ;;  %v2116_v15 = vrot.slane %v4181_v62, %v5420_v10  ;;  %v2132_v16 = vrot.slane %v4183_v63, %v5420_v10 }
 0x39b   : > { %v2157_v54 = vrot.slane %v2149_v52, %v5424_v17  ;;  %v2189_v55 = vrot.slane %v2181_v53, %v5424_v17  ;;  %v2148_v18 = vrot.slane %v4185_v3, %v5420_v10  ;;  %v2164_v19 = vrot.slane %v2150_v4, %v5424_v17 }
 0x39c   : > { %v2196_v20 = vrot.slane %v2182_v5, %v5424_v17  ;;  %v2165_v56 = vcombine.low %v2100_v14, %v2116_v15  ;;  %v4475_v27 = vpack.c.bf16 %v2230_v22, %v2229_v24  ;;  %v4479_v28 = vpack.c.bf16 %v2232_v58, %v2231_v26  ;;  %v2257_v5 = vld [vmem:[#allocation13 + $0x20] sm:$0xff] }
 0x39d   : > { %v2213_v6 = vcombine.low %v2157_v54, %v2189_v55  ;;  %v2214_v7 = vcombine.high %v2157_v54, %v2189_v55  ;;  %v2197_v2 = vcombine.low %v2132_v16, %v2148_v18  ;;  %v2166_v35 = vcombine.high %v2100_v14, %v2116_v15  ;;  %v2255_v54 = vld [vmem:[#allocation13 + $0x10] sm:$0xff] }
 0x39e   : > { %v2215_v8 = vcombine.low %v2164_v19, %v2196_v20  ;;  %v2216_v23 = vcombine.high %v2164_v19, %v2196_v20  ;;  %v2173_v29 = vrot.slane %v2165_v56, %v5424_v17  ;;  %v2198_v0 = vcombine.high %v2132_v16, %v2148_v18  ;;  %v2259_v19 = vld [vmem:[#allocation13 + $0x30] sm:$0xff]  ;;  %v2260_v20 = vld [vmem:[#allocation13 + $0x38] sm:$0xff] }
 0x39f   : > { %4326 = vmatmul.mubr.msk.f32.vlgmr.msra.gmra.mrb[2].mxu0 %vm1787_vm2, %v2213_v6  ;;  %4333 = vmatmul.mubr.msk.f32.vlgmr.msra.gmra.mrb[2].mxu1 %vm1787_vm2, %v2214_v7  ;;  %v2205_v31 = vrot.slane %v2197_v2, %v5424_v17  ;;  %v4483_v39 = vpack.c.bf16 %v2234_v32, %v2233_v37  ;;  %v4487_v40 = vpack.c.bf16 %v2236_v33, %v2235_v38  ;;  %v2258_v6 = vld [vmem:[#allocation13 + $0x28] sm:$0xff] }
 0x3a0   : > { %4469 = vmatpush3.bf16.xpose.msk.msra.mxu0 %vm5548_vm3, %v4467_v12  ;;  %4473 = vmatpush3.bf16.xpose.msk.msra.mxu1 %vm5548_vm3, %v4471_v13  ;;  %v2180_v41 = vrot.slane %v2166_v35, %v5424_v17  ;;  %v2212_v43 = vrot.slane %v2198_v0, %v5424_v17 }
 0x3a1   : > { %4339 = vmatprep.mubr.msk.f32.mxu0 %vm4976_vm1, %v4977_v34  ;;  %4346 = vmatprep.mubr.msk.f32.mxu1 %vm4976_vm1, %v4977_v34  ;;  %v2217_v36 = vcombine.low %v2173_v29, %v2205_v31  ;;  %v2218_v1 = vcombine.high %v2173_v29, %v2205_v31  ;;  %v5679_v31 = vpop.permute.xlu0 %653 }
 0x3a2   : > { %4474 = vmatprep.subr.bf16.mxu0 %v4975_v25  ;;  %4478 = vmatprep.subr.bf16.mxu1 %v4975_v25  ;;  %v2219_v44 = vcombine.low %v2180_v41, %v2212_v43  ;;  %v2220_v45 = vcombine.high %v2180_v41, %v2212_v43 }
 0x3a7   : > { %4340 = vmatmul.mubr.msk.f32.vlgmr.msra.gmra.mrb[4].mxu0 %vm1787_vm2, %v2215_v8  ;;  %4347 = vmatmul.mubr.msk.f32.vlgmr.msra.gmra.mrb[4].mxu1 %vm1787_vm2, %v2216_v23 }
 0x3a8   : > { %4477 = vmatpush3.bf16.xpose.msk.msra.mxu0 %vm5548_vm3, %v4475_v27  ;;  %4481 = vmatpush3.bf16.xpose.msk.msra.mxu1 %vm5548_vm3, %v4479_v28  ;;  %v5677_v27 = vpop.permute.xlu1 %659 }
 0x3a9   : > { %4353 = vmatprep.mubr.msk.f32.mxu0 %vm4976_vm1, %v4977_v34  ;;  %4360 = vmatprep.mubr.msk.f32.mxu1 %vm4976_vm1, %v4977_v34 }
 0x3aa   : > { %4482 = vmatprep.subr.bf16.mxu0 %v4975_v25  ;;  %4486 = vmatprep.subr.bf16.mxu1 %v4975_v25 }
 0x3ac   : > { %v652_v28 = vpop.permute.xlu1 %651 }
 0x3af   : > { %4354 = vmatmul.mubr.msk.f32.vlgmr.msra.gmra.mrb[6].mxu0 %vm1787_vm2, %v2217_v36  ;;  %4361 = vmatmul.mubr.msk.f32.vlgmr.msra.gmra.mrb[6].mxu1 %vm1787_vm2, %v2218_v1 }
 0x3b0   : > { %4485 = vmatpush3.bf16.xpose.msk.msra.mxu0 %vm5548_vm3, %v4483_v39  ;;  %4489 = vmatpush3.bf16.xpose.msk.msra.mxu1 %vm5548_vm3, %v4487_v40  ;;  %v658_v29 = vpop.permute.xlu1 %657 }
 0x3b1   : > { %4367 = vmatprep.mubr.msk.f32.mxu0 %vm4976_vm1, %v4977_v34  ;;  %4374 = vmatprep.mubr.msk.f32.mxu1 %vm4976_vm1, %v4977_v34 }
 0x3b2   : > { %4490 = vmatprep.subr.bf16.mxu1 %v4975_v25  ;;  %4496 = vmatprep.subr.bf16.mxu0 %v4975_v25 }
 0x3b4   : > { %v664_v32 = vpop.permute.xlu1 %663 }
 0x3b7   : > { %4368 = vmatmul.mubr.msk.f32.vlgmr.msra.gmra.mrb[8].mxu0 %vm1787_vm2, %v2219_v44  ;;  %4375 = vmatmul.mubr.msk.f32.vlgmr.msra.gmra.mrb[8].mxu1 %vm1787_vm2, %v2220_v45 }
 0x3b8   : > { %4381 = vmatprep.mubr.msk.f32.mxu1 %vm4976_vm1, %v4977_v34  ;;  %4395 = vmatprep.mubr.msk.f32.mxu0 %vm4976_vm1, %v4977_v34 }
 0x472   : > { %v2337_v30 = vpop.f32.mrb[2].mxu0  ;;  %v2416_v48 = vpop.f32.mrb[2].mxu1 }
 0x473   : > { %v5636_v49 = vadd.f32 %v2337_v30, %v2253_v21  ;;  %v5638_v42 = vadd.f32 %v2416_v48, %v2254_v46  ;;  %v4327_v50 = vpop.f32.mrb[3].mxu0  ;;  %v4334_v51 = vpop.f32.mrb[3].mxu1 }
 0x475   : > { %v2898_v52 = vsel %vm2894_vm4, %v5638_v42, -inf  ;;  %v2895_v53 = vsel %vm2894_vm4, %v5636_v49, -inf }
 0x476   : > { %2899 = vmax.xlane.f32.xlu0 %v2898_v52  ;;  %2896 = vmax.xlane.f32.xlu1 %v2895_v53 }
 0x47a   : > { %v2495_v55 = vpop.f32.mrb[4].mxu0  ;;  %v2574_v57 = vpop.f32.mrb[4].mxu1 }
 0x47b   : > { %v5644_v60 = vadd.f32 %v2495_v55, %v2255_v54  ;;  %v4341_v62 = vpop.f32.mrb[5].mxu0  ;;  %v4348_v63 = vpop.f32.mrb[5].mxu1  ;;  %v2575_v3 = vadd.f32 %v2574_v57, %v2256_v47  ;;  %v835_v54 = vcombine.low %v652_v28, %v664_v32  ;;  %v836_v55 = vcombine.high %v652_v28, %v664_v32 }
 0x47d   : > { %v2901_v4 = vsel %vm2894_vm4, %v5644_v60, -inf  ;;  %v2904_v7 = vsel %vm2894_vm4, %v2575_v3, -inf }
 0x47e   : > { %2902 = vmax.xlane.f32.xlu0 %v2901_v4 }
 0x482   : > { %2905 = vmax.xlane.f32.xlu0 %v2904_v7  ;;  %v2653_v9 = vpop.f32.mrb[6].mxu0  ;;  %v2732_v11 = vpop.f32.mrb[6].mxu1  ;;  %v843_v7 = vrot.slane %v835_v54, %v5420_v10 }
 0x483   : > { %v5649_v12 = vadd.f32 %v2653_v9, %v2257_v5  ;;  %v5651_v13 = vadd.f32 %v2732_v11, %v2258_v6  ;;  %v4355_v14 = vpop.f32.mrb[7].mxu0  ;;  %v4362_v15 = vpop.f32.mrb[7].mxu1  ;;  %v850_v9 = vrot.slane %v836_v55, %v5420_v10 }
 0x485   : > { %v2910_v16 = vsel %vm2894_vm4, %v5651_v13, -inf  ;;  %v2907_v18 = vsel %vm2894_vm4, %v5649_v12, -inf }
 0x486   : > { %2911 = vmax.xlane.f32.xlu0 %v2910_v16  ;;  %2908 = vmax.xlane.f32.xlu1 %v2907_v18 }
 0x48a   : > { %v2811_v22 = vpop.f32.mrb[8].mxu0  ;;  %v2890_v58 = vpop.f32.mrb[8].mxu1 }
 0x48b   : > { %v5657_v56 = vadd.f32 %v2811_v22, %v2259_v19  ;;  %v5659_v2 = vadd.f32 %v2890_v58, %v2260_v20  ;;  %v4369_v8 = vpop.f32.mrb[9].mxu0  ;;  %v4376_v23 = vpop.f32.mrb[9].mxu1 }
 0x48d   : > { %v2916_v24 = vsel %vm2894_vm4, %v5659_v2, -inf  ;;  %v2913_v26 = vsel %vm2894_vm4, %v5657_v56, -inf }
 0x48e   : > { %2917 = vmax.xlane.f32.xlu0 %v2916_v24  ;;  %2914 = vmax.xlane.f32.xlu1 %v2913_v26 }
 0x49f   : > { %669 = vrot.lane.b32.xlu1 %v5390_v61, %s4990_s16 }
 0x4a3   : > { %677 = vrot.lane.b32.xlu1 %v5387_v59, %s4991_s18 }
 0x4a4   : > { %665 = vrot.lane.b32.xlu0 %v5387_v59, %s4987_s3  ;;  %s5997_s3 = sld [smem:[#allocation27_spill]] }
 0x4a7   : > { %681 = vrot.lane.b32.xlu1 %v5390_v61, %s4992_s15 }
 0x4a8   : > { %671 = vrot.lane.b32.xlu0 %v5387_v59, %s4990_s16  ;;  %s4229_s16 = sshll.u32 %s5996_s12, 7 }
 0x4ab   : > { %687 = vrot.lane.b32.xlu1 %v5390_v61, %s4993_s27 }
 0x4ac   : > { %675 = vrot.lane.b32.xlu0 %v5390_v61, %s4991_s18  ;;  %s469_s18 = scalar_lea.vmem [#allocation15], %s4136_s22  ;;  %s5002_s22 = smov [#allocation15]  }
 0x4b0   : > { %683 = vrot.lane.b32.xlu0 %v5387_v59, %s4992_s15  ;;  %s3979_s15 = sshll.u32 %s469_s18, 4  ;;  %s5900_s15 = int_to_ptr.vmem [resolvable:$true] %s3979_s15 }
 0x4b4   : > { %689 = vrot.lane.b32.xlu0 %v5387_v59, %s4993_s27 }
 0x4b8   : > { %695 = vrot.lane.b32.xlu0 %v5387_v59, %s4994_s9 }
 0x503   : > { %v2897_v33 = vpop.xlane.xlu1 %2896  ;;  %v2900_v35 = vpop.xlane.xlu0 %2899 }
 0x504   : > { %v2919_v0 = vsub.f32 %v5636_v49, %v2897_v33  ;;  %v2920_v36 = vsub.f32 %v5638_v42, %v2900_v35 }
 0x506   : > { %v2927_v1 = vmul.f32 1.442695, %v2919_v0  ;;  %v2929_v37 = vmul.f32 1.442695, %v2920_v36 }
 0x508   : > { %4663 = vpow2.f32 %v2927_v1 }
 0x509   : > { %4665 = vpow2.f32 %v2929_v37 }
 0x50b   : > { %v5683_v38 = vpop.xlane.xlu0 %2902 }
 0x50f   : > { %v2906_v59 = vpop.xlane.xlu0 %2905 }
 0x510   : > { %v2922_v39 = vsub.f32 %v2575_v3, %v2906_v59 }
 0x512   : > { %v5685_v40 = vpop.eup %4663  ;;  %v2933_v41 = vmul.f32 1.442695, %v2922_v39 }
 0x513   : > { %v5687_v43 = vpop.eup %4665  ;;  %v2909_v44 = vpop.xlane.xlu1 %2908  ;;  %v2943_v21 = vsel %vm2894_vm4, %v5685_v40, 0.0 }
 0x514   : > { %v2912_v45 = vpop.xlane.xlu0 %2911  ;;  %4667 = vpow2.f32 %v2933_v41  ;;  %v2923_v46 = vsub.f32 %v5649_v12, %v2909_v44  ;;  %2944 = vadd.xlane.f32.xlu1 %v2943_v21  ;;  %v2946_v48 = vsel %vm2894_vm4, %v5687_v43, 0.0 }
 0x515   : > { %v2924_v30 = vsub.f32 %v5651_v13, %v2912_v45  ;;  %2947 = vadd.xlane.f32.xlu0 %v2946_v48 }
 0x516   : > { %v2935_v49 = vmul.f32 1.442695, %v2923_v46 }
 0x517   : > { %v2937_v42 = vmul.f32 1.442695, %v2924_v30 }
 0x518   : > { %4669 = vpow2.f32 %v2935_v49 }
 0x519   : > { %4671 = vpow2.f32 %v2937_v42 }
 0x51b   : > { %v5695_v50 = vpop.xlane.xlu1 %2914  ;;  %v2918_v51 = vpop.xlane.xlu0 %2917 }
 0x51c   : > { %v2926_v52 = vsub.f32 %v5659_v2, %v2918_v51 }
 0x51e   : > { %v5698_v53 = vpop.eup %4667  ;;  %v2941_v4 = vmul.f32 1.442695, %v2926_v52 }
 0x51f   : > { %v670_v47 = vpop.permute.xlu1 %669  ;;  %v666_v57 = vpop.permute.xlu0 %665  ;;  %v2952_v62 = vsel %vm2894_vm4, %v5698_v53, 0.0 }
 0x520   : > { %v851_v63 = vcombine.low %v658_v29, %v670_v47  ;;  %v852_v3 = vcombine.high %v658_v29, %v670_v47  ;;  %2953 = vadd.xlane.f32.xlu0 %v2952_v62  ;;  %v1107_v5 = vcombine.low %v5679_v31, %v666_v57  ;;  %v1108_v13 = vcombine.high %v5679_v31, %v666_v57 }
 0x521   : > { %4673 = vpow2.f32 %v2941_v4 }
 0x522   : > { %v5703_v6 = vpop.eup %4669  ;;  %v859_v11 = vrot.slane %v851_v63, %v5420_v10  ;;  %v866_v12 = vrot.slane %v852_v3, %v5420_v10  ;;  %v1115_v58 = vrot.slane %v1107_v5, %v5420_v10  ;;  %v1122_v29 = vrot.slane %v1108_v13, %v5420_v10 }
 0x523   : > { %v672_v14 = vpop.permute.xlu0 %671  ;;  %v2955_v15 = vsel %vm2894_vm4, %v5703_v6, 0.0  ;;  %v5712_v16 = vpop.eup %4671 }
 0x524   : > { %v899_v18 = vcombine.low %v843_v7, %v859_v11  ;;  %v900_v19 = vcombine.high %v843_v7, %v859_v11  ;;  %v915_v20 = vcombine.low %v850_v9, %v866_v12  ;;  %v916_v22 = vcombine.high %v850_v9, %v866_v12  ;;  %2956 = vadd.xlane.f32.xlu0 %v2955_v15 }
 0x525   : > { %v1123_v2 = vcombine.low %v5677_v27, %v672_v14  ;;  %v1124_v8 = vcombine.high %v5677_v27, %v672_v14  ;;  %693 = vrot.lane.b32.xlu1 %v5390_v61, %s4994_s9  ;;  %v2958_v27 = vsel %vm2894_vm4, %v5712_v16, 0.0 }
 0x526   : > { %v907_v23 = vrot.slane %v899_v18, %v5424_v17  ;;  %v914_v24 = vrot.slane %v900_v19, %v5424_v17  ;;  %v923_v26 = vrot.slane %v915_v20, %v5424_v17  ;;  %v930_v28 = vrot.slane %v916_v22, %v5424_v17 }
 0x527   : > { %v1131_v31 = vrot.slane %v1123_v2, %v5420_v10  ;;  %v1138_v32 = vrot.slane %v1124_v8, %v5420_v10  ;;  %v5726_v33 = vpop.permute.xlu0 %675 }
 0x528   : > { %v4161_v61 = vcombine.low %v907_v23, %v914_v24  ;;  %v4163_v35 = vcombine.high %v907_v23, %v914_v24  ;;  %v4165_v0 = vcombine.low %v923_v26, %v930_v28  ;;  %v4167_v36 = vcombine.high %v923_v26, %v930_v28  ;;  %2959 = vadd.xlane.f32.xlu0 %v2958_v27  ;;  %v678_v28 = vpop.permute.xlu1 %677 }
 0x529   : > { %v1171_v1 = vcombine.low %v1115_v58, %v1131_v31  ;;  %v1172_v37 = vcombine.high %v1115_v58, %v1131_v31  ;;  %v1187_v59 = vcombine.low %v1122_v29, %v1138_v32  ;;  %v1188_v39 = vcombine.high %v1122_v29, %v1138_v32 }
 0x52a   : > { %v1523_v41 = vrot.slane %v4161_v61, %v5420_v10  ;;  %v1539_v44 = vrot.slane %v4163_v35, %v5420_v10  ;;  %v1555_v45 = vrot.slane %v4165_v0, %v5420_v10  ;;  %v1571_v21 = vrot.slane %v4167_v36, %v5420_v10 }
 0x52b   : > { %v1179_v46 = vrot.slane %v1171_v1, %v5424_v17  ;;  %v1186_v30 = vrot.slane %v1172_v37, %v5424_v17  ;;  %v1195_v48 = vrot.slane %v1187_v59, %v5424_v17  ;;  %v1202_v49 = vrot.slane %v1188_v39, %v5424_v17  ;;  %v684_v42 = vpop.permute.xlu0 %683  ;;  %v5742_v9 = vpop.eup %4673 }
 0x52c   : > { %v1579_v51 = vcombine.low %v1523_v41, %v1539_v44  ;;  %v1580_v52 = vcombine.high %v1523_v41, %v1539_v44  ;;  %v1611_v54 = vcombine.low %v1555_v45, %v1571_v21  ;;  %v1612_v55 = vcombine.high %v1555_v45, %v1571_v21 }
 0x52d   : > { %v4169_v47 = vcombine.low %v1179_v46, %v1186_v30  ;;  %v4171_v57 = vcombine.high %v1179_v46, %v1186_v30  ;;  %v4173_v62 = vcombine.low %v1195_v48, %v1202_v49  ;;  %v4175_v63 = vcombine.high %v1195_v48, %v1202_v49 }
 0x52e   : > { %v1587_v3 = vrot.slane %v1579_v51, %v5424_v17  ;;  %v1594_v4 = vrot.slane %v1580_v52, %v5424_v17  ;;  %v1619_v5 = vrot.slane %v1611_v54, %v5424_v17  ;;  %v1626_v7 = vrot.slane %v1612_v55, %v5424_v17 }
 0x52f   : > { %v1659_v11 = vrot.slane %v4169_v47, %v5420_v10  ;;  %v1675_v12 = vrot.slane %v4171_v57, %v5420_v10  ;;  %v1691_v13 = vrot.slane %v4173_v62, %v5420_v10  ;;  %v1707_v14 = vrot.slane %v4175_v63, %v5420_v10  ;;  %v690_v15 = vpop.permute.xlu0 %689 }
 0x530   : > { %v1643_v18 = vcombine.low %v1587_v3, %v1619_v5  ;;  %v1644_v19 = vcombine.high %v1587_v3, %v1619_v5  ;;  %v1645_v20 = vcombine.low %v1594_v4, %v1626_v7  ;;  %v1646_v22 = vcombine.high %v1594_v4, %v1626_v7 }
 0x531   : > { %v1715_v58 = vcombine.low %v1659_v11, %v1675_v12  ;;  %v1716_v2 = vcombine.high %v1659_v11, %v1675_v12  ;;  %v1747_v8 = vcombine.low %v1691_v13, %v1707_v14  ;;  %v1748_v23 = vcombine.high %v1691_v13, %v1707_v14 }
 0x532   : > { %v2921_v24 = vsub.f32 %v5644_v60, %v5683_v38  ;;  %1804 = vst.msk [vmem:[#allocation3] sm:$0xff] %vm1787_vm2, %v1643_v18  ;;  %1806 = vst.msk [vmem:[#allocation3 + $0x10] sm:$0xff] %vm1787_vm2, %v1644_v19  ;;  %v2964_v26 = vsel %vm2894_vm4, %v5742_v9, 0.0  ;;  %v1139_v27 = vcombine.low %v678_v28, %v690_v15  ;;  %v1140_v61 = vcombine.high %v678_v28, %v690_v15 }
 0x533   : > { %1808 = vst.msk [vmem:[#allocation3 + $0x20] sm:$0xff] %vm1787_vm2, %v1645_v20  ;;  %1810 = vst.msk [vmem:[#allocation3 + $0x30] sm:$0xff] %vm1787_vm2, %v1646_v22  ;;  %v1723_v29 = vrot.slane %v1715_v58, %v5424_v17  ;;  %v1730_v31 = vrot.slane %v1716_v2, %v5424_v17  ;;  %v1755_v32 = vrot.slane %v1747_v8, %v5424_v17  ;;  %2965 = vadd.xlane.f32.xlu0 %v2964_v26  ;;  %v696_v38 = vpop.permute.xlu0 %695 }
 0x534   : > { %v1762_v60 = vrot.slane %v1748_v23, %v5424_v17  ;;  %v1155_v37 = vcombine.low %v684_v42, %v696_v38  ;;  %v1156_v59 = vcombine.high %v684_v42, %v696_v38  ;;  %v2931_v39 = vmul.f32 1.442695, %v2921_v24 }
 0x535   : > { %v1779_v35 = vcombine.low %v1723_v29, %v1755_v32  ;;  %v1780_v0 = vcombine.high %v1723_v29, %v1755_v32  ;;  %v2925_v41 = vsub.f32 %v5657_v56, %v5695_v50  ;;  %v1147_v44 = vrot.slane %v1139_v27, %v5420_v10  ;;  %v682_v27 = vpop.permute.xlu1 %681 }
 0x536   : > { %v1781_v36 = vcombine.low %v1730_v31, %v1762_v60  ;;  %v1782_v1 = vcombine.high %v1730_v31, %v1762_v60  ;;  %v1154_v45 = vrot.slane %v1140_v61, %v5420_v10  ;;  %v1163_v21 = vrot.slane %v1155_v37, %v5420_v10 }
 0x537   : > { %1805 = vst.msk [vmem:[#allocation3 + $0x8] sm:$0xff] %vm1787_vm2, %v1779_v35  ;;  %1807 = vst.msk [vmem:[#allocation3 + $0x18] sm:$0xff] %vm1787_vm2, %v1780_v0  ;;  %v1170_v46 = vrot.slane %v1156_v59, %v5420_v10  ;;  %4675 = vpow2.f32 %v2931_v39  ;;  %v2939_v50 = vmul.f32 1.442695, %v2925_v41 }
 0x538   : > { %1809 = vst.msk [vmem:[#allocation3 + $0x28] sm:$0xff] %vm1787_vm2, %v1781_v36  ;;  %1811 = vst.msk [vmem:[#allocation3 + $0x38] sm:$0xff] %vm1787_vm2, %v1782_v1  ;;  %v1203_v30 = vcombine.low %v1147_v44, %v1163_v21  ;;  %v1204_v48 = vcombine.high %v1147_v44, %v1163_v21 }
 0x539   : > { %v1219_v49 = vcombine.low %v1154_v45, %v1170_v46  ;;  %v1220_v56 = vcombine.high %v1154_v45, %v1170_v46  ;;  %v2237_v55 = vld [vmem:[#allocation3] sm:$0xff]  ;;  %4677 = vpow2.f32 %v2939_v50  ;;  %v688_v61 = vpop.permute.xlu1 %687 }
 0x53a   : > { %v1211_v42 = vrot.slane %v1203_v30, %v5424_v17  ;;  %v1218_v51 = vrot.slane %v1204_v48, %v5424_v17  ;;  %v2241_v4 = vld [vmem:[#allocation3 + $0x20] sm:$0xff]  ;;  %v867_v36 = vcombine.low %v5726_v33, %v688_v61  ;;  %v868_v1 = vcombine.high %v5726_v33, %v688_v61 }
 0x53b   : > { %v1227_v52 = vrot.slane %v1219_v49, %v5424_v17  ;;  %v1234_v54 = vrot.slane %v1220_v56, %v5424_v17 }
 0x53c   : > { %v4170_v47 = vcombine.low %v1211_v42, %v1218_v51  ;;  %v4172_v57 = vcombine.high %v1211_v42, %v1218_v51  ;;  %v875_v41 = vrot.slane %v867_v36, %v5420_v10  ;;  %v882_v44 = vrot.slane %v868_v1, %v5420_v10 }
 0x53d   : > { %v4174_v62 = vcombine.low %v1227_v52, %v1234_v54  ;;  %v4176_v63 = vcombine.high %v1227_v52, %v1234_v54 }
 0x53e   : > { %v2238_v3 = vld [vmem:[#allocation3 + $0x8] sm:$0xff]  ;;  %v1666_v12 = vrot.slane %v4170_v47, %v5420_v10  ;;  %v1682_v13 = vrot.slane %v4172_v57, %v5420_v10  ;;  %v2240_v56 = vld [vmem:[#allocation3 + $0x18] sm:$0xff]  ;;  %v2239_v47 = vld [vmem:[#allocation3 + $0x10] sm:$0xff] }
 0x53f   : > { %v2242_v5 = vld [vmem:[#allocation3 + $0x28] sm:$0xff]  ;;  %v4491_v7 = vpack.c.bf16 %v2238_v3, %v2237_v55  ;;  %v1698_v14 = vrot.slane %v4174_v62, %v5420_v10  ;;  %v1714_v15 = vrot.slane %v4176_v63, %v5420_v10 }
 0x540   : > { %v4497_v11 = vpack.c.bf16 %v2242_v5, %v2241_v4  ;;  %v1731_v18 = vcombine.low %v1666_v12, %v1682_v13  ;;  %v1732_v19 = vcombine.high %v1666_v12, %v1682_v13  ;;  %v4494_v4 = vpack.c.bf16 %v2240_v56, %v2239_v47 }
 0x541   : > { %4492 = vmatpush3.bf16.msra.mxu1 %v4491_v7  ;;  %v1763_v20 = vcombine.low %v1698_v14, %v1714_v15  ;;  %v1764_v22 = vcombine.high %v1698_v14, %v1714_v15  ;;  %v5784_v24 = vpop.eup %4675  ;;  %v2244_v7 = vld [vmem:[#allocation3 + $0x38] sm:$0xff] }
 0x542   : > { %4498 = vmatpush3.bf16.msra.mxu0 %v4497_v11  ;;  %4493 = vmatprep.subr.bf16.mxu1 %v4975_v25  ;;  %v1739_v58 = vrot.slane %v1731_v18, %v5424_v17  ;;  %v1746_v2 = vrot.slane %v1732_v19, %v5424_v17  ;;  %v2949_v32 = vsel %vm2894_vm4, %v5784_v24, 0.0  ;;  %v2243_v18 = vld [vmem:[#allocation3 + $0x30] sm:$0xff] }
 0x543   : > { %4502 = vmatprep.subr.bf16.mxu0 %v4975_v25  ;;  %v1771_v8 = vrot.slane %v1763_v20, %v5424_v17  ;;  %v1778_v23 = vrot.slane %v1764_v22, %v5424_v17  ;;  %v5792_v60 = vpop.eup %4677  ;;  %v4500_v22 = vpack.c.bf16 %v2244_v7, %v2243_v18 }
 0x544   : > { %v2961_v38 = vsel %vm2894_vm4, %v5792_v60, 0.0 }
 0x545   : > { %v1783_v26 = vcombine.low %v1739_v58, %v1771_v8  ;;  %v1784_v28 = vcombine.high %v1739_v58, %v1771_v8  ;;  %v1785_v29 = vcombine.low %v1746_v2, %v1778_v23  ;;  %v1786_v31 = vcombine.high %v1746_v2, %v1778_v23 }
 0x547   : > { %1813 = vst.msk [vmem:[#allocation3 + $0x48] sm:$0xff] %vm1787_vm2, %v1783_v26  ;;  %1815 = vst.msk [vmem:[#allocation3 + $0x58] sm:$0xff] %vm1787_vm2, %v1784_v28 }
 0x548   : > { %1817 = vst.msk [vmem:[#allocation3 + $0x68] sm:$0xff] %vm1787_vm2, %v1785_v29  ;;  %1819 = vst.msk [vmem:[#allocation3 + $0x78] sm:$0xff] %vm1787_vm2, %v1786_v31 }
 0x549   : > { %2950 = vadd.xlane.f32.xlu1 %v2949_v32 }
 0x54d   : > { %2962 = vadd.xlane.f32.xlu1 %v2961_v38 }
 0x54e   : > { %v2248_v1 = vld [vmem:[#allocation3 + $0x58] sm:$0xff] }
 0x5a1   : > { %v2945_v35 = vpop.xlane.xlu1 %2944 }
 0x5a2   : > { %4679 = vrcp.f32 %v2945_v35  ;;  %v2948_v0 = vpop.xlane.xlu0 %2947 }
 0x5a3   : > { %4681 = vrcp.f32 %v2948_v0 }
 0x5a5   : > { %v694_v37 = vpop.permute.xlu1 %693 }
 0x5a6   : > { %v883_v59 = vcombine.low %v682_v27, %v694_v37  ;;  %v884_v39 = vcombine.high %v682_v27, %v694_v37 }
 0x5a8   : > { %v891_v45 = vrot.slane %v883_v59, %v5420_v10  ;;  %v898_v21 = vrot.slane %v884_v39, %v5420_v10 }
 0x5aa   : > { %v931_v46 = vcombine.low %v875_v41, %v891_v45  ;;  %v932_v30 = vcombine.high %v875_v41, %v891_v45  ;;  %v947_v48 = vcombine.low %v882_v44, %v898_v21  ;;  %v948_v49 = vcombine.high %v882_v44, %v898_v21  ;;  %v2252_v41 = vld [vmem:[#allocation3 + $0x78] sm:$0xff] }
 0x5ac   : > { %v4680_v50 = vpop.eup %4679  ;;  %v939_v33 = vrot.slane %v931_v46, %v5424_v17  ;;  %v946_v42 = vrot.slane %v932_v30, %v5424_v17  ;;  %v955_v51 = vrot.slane %v947_v48, %v5424_v17  ;;  %v962_v52 = vrot.slane %v948_v49, %v5424_v17  ;;  %v2246_v49 = vld [vmem:[#allocation3 + $0x48] sm:$0xff] }
 0x5ad   : > { %v2975_v54 = vmul.f32 %v4680_v50, %v5685_v40  ;;  %v2954_v55 = vpop.xlane.xlu0 %2953  ;;  %v4682_v57 = vpop.eup %4681 }
 0x5ae   : > { %v4162_v62 = vcombine.low %v939_v33, %v946_v42  ;;  %v4164_v63 = vcombine.high %v939_v33, %v946_v42  ;;  %v4166_v3 = vcombine.low %v955_v51, %v962_v52  ;;  %v4168_v5 = vcombine.high %v955_v51, %v962_v52  ;;  %v2250_v42 = vld [vmem:[#allocation3 + $0x68] sm:$0xff] }
 0x5af   : > { %4683 = vrcp.f32 %v2954_v55  ;;  %4382 = vmatmul.mubr.msk.f32.vlgmr.msra.gmra.mrb[10].mxu1 %vm2894_vm4, %v2975_v54  ;;  %v2976_v40 = vmul.f32 %v4682_v57, %v5687_v43 }
 0x5b0   : > { %v1530_v11 = vrot.slane %v4162_v62, %v5420_v10  ;;  %v1546_v12 = vrot.slane %v4164_v63, %v5420_v10  ;;  %v1562_v13 = vrot.slane %v4166_v3, %v5420_v10  ;;  %4495 = vmatpush3.bf16.msra.mxu1 %v4494_v4  ;;  %4388 = vmatprep.mubr.msk.f32.mxu1 %vm4976_vm1, %v4977_v34 }
 0x5b1   : > { %v1578_v14 = vrot.slane %v4168_v5, %v5420_v10  ;;  %v2957_v15 = vpop.xlane.xlu0 %2956  ;;  %4499 = vmatprep.subr.bf16.mxu1 %v4975_v25 }
 0x5b2   : > { %v1595_v19 = vcombine.low %v1530_v11, %v1546_v12  ;;  %v1596_v20 = vcombine.high %v1530_v11, %v1546_v12 }
 0x5b3   : > { %v1627_v58 = vcombine.low %v1562_v13, %v1578_v14  ;;  %v1628_v2 = vcombine.high %v1562_v13, %v1578_v14  ;;  %4389 = vmatmul.mubr.msk.f32.vlgmr.msra.gmra.mrb[12].mxu1 %vm2894_vm4, %v2976_v40 }
 0x5b4   : > { %v1603_v8 = vrot.slane %v1595_v19, %v5424_v17  ;;  %v1610_v23 = vrot.slane %v1596_v20, %v5424_v17  ;;  %4501 = vmatpush3.bf16.msra.mxu1 %v4500_v22  ;;  %4402 = vmatprep.mubr.msk.f32.mxu1 %vm4976_vm1, %v4977_v34 }
 0x5b5   : > { %v1635_v43 = vrot.slane %v1627_v58, %v5424_v17  ;;  %v1642_v26 = vrot.slane %v1628_v2, %v5424_v17  ;;  %v2960_v28 = vpop.xlane.xlu0 %2959  ;;  %4505 = vmatprep.subr.bf16.mxu1 %v4975_v25 }
 0x5b6   : > { %4685 = vrcp.f32 %v2960_v28 }
 0x5b7   : > { %v1647_v29 = vcombine.low %v1603_v8, %v1635_v43  ;;  %v1648_v31 = vcombine.high %v1603_v8, %v1635_v43  ;;  %v1649_v32 = vcombine.low %v1610_v23, %v1642_v26  ;;  %v1650_v38 = vcombine.high %v1610_v23, %v1642_v26 }
 0x5b9   : > { %v4684_v27 = vpop.eup %4683  ;;  %1812 = vst.msk [vmem:[#allocation3 + $0x40] sm:$0xff] %vm1787_vm2, %v1647_v29  ;;  %1814 = vst.msk [vmem:[#allocation3 + $0x50] sm:$0xff] %vm1787_vm2, %v1648_v31 }
 0x5ba   : > { %1816 = vst.msk [vmem:[#allocation3 + $0x60] sm:$0xff] %vm1787_vm2, %v1649_v32  ;;  %1818 = vst.msk [vmem:[#allocation3 + $0x70] sm:$0xff] %vm1787_vm2, %v1650_v38  ;;  %v2978_v61 = vmul.f32 %v4684_v27, %v5698_v53 }
 0x5bc   : > { %4403 = vmatmul.mubr.msk.f32.vlgmr.msra.gmra.mrb[14].mxu1 %vm2894_vm4, %v2978_v61 }
 0x5bd   : > { %4416 = vmatprep.mubr.msk.f32.mxu1 %vm4976_vm1, %v4977_v34 }
 0x5c0   : > { %v4686_v35 = vpop.eup %4685  ;;  %v2966_v0 = vpop.xlane.xlu0 %2965  ;;  %v2247_v36 = vld [vmem:[#allocation3 + $0x50] sm:$0xff] }
 0x5c1   : > { %4687 = vrcp.f32 %v2966_v0  ;;  %v4506_v37 = vpack.c.bf16 %v2248_v1, %v2247_v36  ;;  %v2251_v59 = vld [vmem:[#allocation3 + $0x70] sm:$0xff]  ;;  %v2980_v39 = vmul.f32 %v4686_v35, %v5712_v16  ;;  %v2245_v16 = vld [vmem:[#allocation3 + $0x40] sm:$0xff] }
 0x5c2   : > { %v4512_v44 = vpack.c.bf16 %v2252_v41, %v2251_v59  ;;  %v4503_v50 = vpack.c.bf16 %v2246_v49, %v2245_v16  ;;  %v2249_v33 = vld [vmem:[#allocation3 + $0x60] sm:$0xff] }
 0x5c3   : > { %4507 = vmatpush3.bf16.msra.mxu1 %v4506_v37  ;;  %v4509_v52 = vpack.c.bf16 %v2250_v42, %v2249_v33 }
 0x5c4   : > { %4511 = vmatprep.subr.bf16.mxu1 %v4975_v25 }
 0x5c6   : > { %4417 = vmatmul.mubr.msk.f32.vlgmr.msra.gmra.mrb[16].mxu1 %vm2894_vm4, %v2980_v39 }
 0x5c7   : > { %4513 = vmatpush3.bf16.msra.mxu1 %v4512_v44  ;;  %4430 = vmatprep.mubr.msk.f32.mxu1 %vm4976_vm1, %v4977_v34 }
 0x5cb   : > { %v4688_v53 = vpop.eup %4687 }
 0x5cc   : > { %v2982_v45 = vmul.f32 %v4688_v53, %v5742_v9 }
 0x5ce   : > { %4431 = vmatmul.mubr.msk.f32.vlgmr.msra.gmra.mrb[18].mxu1 %vm2894_vm4, %v2982_v45 }
 0x5d6   : > { %v2951_v21 = vpop.xlane.xlu1 %2950 }
 0x5d7   : > { %4689 = vrcp.f32 %v2951_v21 }
 0x5d8   : > { %4691 = vrcp.f32 %v2957_v15 }
 0x5da   : > { %v2963_v46 = vpop.xlane.xlu1 %2962 }
 0x5db   : > { %4693 = vrcp.f32 %v2963_v46 }
 0x5e1   : > { %v4690_v30 = vpop.eup %4689 }
 0x5e2   : > { %v2977_v48 = vmul.f32 %v4690_v30, %v5784_v24  ;;  %v4692_v56 = vpop.eup %4691 }
 0x5e3   : > { %v2979_v9 = vmul.f32 %v4692_v56, %v5703_v6 }
 0x5e4   : > { %4396 = vmatmul.mubr.msk.f32.vlgmr.msra.gmra.mrb[10].mxu0 %vm2894_vm4, %v2977_v48 }
 0x5e5   : > { %4504 = vmatpush3.bf16.msra.mxu0 %v4503_v50  ;;  %4409 = vmatprep.mubr.msk.f32.mxu0 %vm4976_vm1, %v4977_v34  ;;  %v4694_v51 = vpop.eup %4693 }
 0x5e6   : > { %4508 = vmatprep.subr.bf16.mxu0 %v4975_v25  ;;  %v2981_v24 = vmul.f32 %v4694_v51, %v5792_v60 }
 0x5e8   : > { %4410 = vmatmul.mubr.msk.f32.vlgmr.msra.gmra.mrb[12].mxu0 %vm2894_vm4, %v2979_v9 }
 0x5e9   : > { %4510 = vmatpush3.bf16.msra.mxu0 %v4509_v52  ;;  %4423 = vmatprep.mubr.msk.f32.mxu0 %vm4976_vm1, %v4977_v34 }
 0x5ea   : > { %4514 = vmatprep.subr.bf16.mxu0 %v4975_v25 }
 0x5ec   : > { %4424 = vmatmul.mubr.msk.f32.vlgmr.msra.gmra.mrb[14].mxu0 %vm2894_vm4, %v2981_v24 }
 0x5ed   : > { %4441 = vmatprep.mubr.msk.f32.mxu0 %vm4976_vm1, %v4977_v34 }
 0x682   : > { %v3052_v6 = vpop.f32.mrb[10].mxu1 }
 0x683   : > { %v4383_v54 = vpop.f32.mrb[11].mxu1 }
 0x686   : > { %v3125_v55 = vpop.f32.mrb[12].mxu1 }
 0x687   : > { %v4390_v47 = vpop.f32.mrb[13].mxu1 }
 0x688   : > { %v3879_v47 = vld [vmem:[#allocation12] sm:$0xff] }
 0x68f   : > { %v3271_v57 = vpop.f32.mrb[14].mxu1 }
 0x690   : > { %v3583_v62 = vcombine.low %v3125_v55, %v3271_v57  ;;  %v3584_v63 = vcombine.high %v3125_v55, %v3271_v57  ;;  %v4404_v3 = vpop.f32.mrb[15].mxu1  ;;  %v3880_v57 = vld [vmem:[#allocation12 + $0x8] sm:$0xff] }
 0x692   : > { %v3591_v34 = vrot.slane %v3583_v62, %v5420_v10  ;;  %v3598_v18 = vrot.slane %v3584_v63, %v5420_v10 }
 0x699   : > { %v3417_v4 = vpop.f32.mrb[16].mxu1 }
 0x69a   : > { %v4418_v5 = vpop.f32.mrb[17].mxu1 }
 0x6a1   : > { %v3563_v7 = vpop.f32.mrb[18].mxu1 }
 0x6a2   : > { %v3615_v11 = vcombine.low %v3417_v4, %v3563_v7  ;;  %v3616_v60 = vcombine.high %v3417_v4, %v3563_v7  ;;  %v4432_v12 = vpop.f32.mrb[19].mxu1 }
 0x6a3   : > { %v4515_v12 = vpack.c.bf16 %v3880_v57, %v3879_v47 }
 0x6a4   : > { %v3623_v44 = vrot.slane %v3615_v11, %v5420_v10  ;;  %v3630_v53 = vrot.slane %v3616_v60, %v5420_v10 }
 0x6a5   : > { %4516 = vmatpush3.bf16.msra.mxu0 %v4515_v12 }
 0x6a6   : > { %4517 = vmatprep.subr.bf16.mxu0 %v4975_v25 }
 0x6b7   : > { %v3198_v13 = vpop.f32.mrb[10].mxu0 }
 0x6b8   : > { %v3567_v40 = vcombine.low %v3052_v6, %v3198_v13  ;;  %v3568_v14 = vcombine.high %v3052_v6, %v3198_v13  ;;  %v4397_v15 = vpop.f32.mrb[11].mxu0  ;;  %v3881_v13 = vld [vmem:[#allocation12 + $0x10] sm:$0xff] }
 0x6ba   : > { %v3575_v19 = vrot.slane %v3567_v40, %v5420_v10  ;;  %v3582_v20 = vrot.slane %v3568_v14, %v5420_v10  ;;  %v3882_v40 = vld [vmem:[#allocation12 + $0x18] sm:$0xff] }
 0x6bb   : > { %v3344_v22 = vpop.f32.mrb[12].mxu0 }
 0x6bc   : > { %v3631_v58 = vcombine.low %v3575_v19, %v3591_v34  ;;  %v3632_v2 = vcombine.high %v3575_v19, %v3591_v34  ;;  %v3647_v8 = vcombine.low %v3582_v20, %v3598_v18  ;;  %v3648_v23 = vcombine.high %v3582_v20, %v3598_v18  ;;  %v4411_v43 = vpop.f32.mrb[13].mxu0 }
 0x6bd   : > { %v4518_v19 = vpack.c.bf16 %v3882_v40, %v3881_v13 }
 0x6be   : > { %v3639_v26 = vrot.slane %v3631_v58, %v5424_v17  ;;  %v3646_v28 = vrot.slane %v3632_v2, %v5424_v17  ;;  %v3655_v29 = vrot.slane %v3647_v8, %v5424_v17  ;;  %v3662_v31 = vrot.slane %v3648_v23, %v5424_v17 }
 0x6bf   : > { %v3490_v32 = vpop.f32.mrb[14].mxu0  ;;  %4519 = vmatpush3.bf16.msra.mxu0 %v4518_v19 }
 0x6c0   : > { %v4218_v38 = vcombine.low %v3639_v26, %v3646_v28  ;;  %v4220_v27 = vcombine.high %v3639_v26, %v3646_v28  ;;  %v4222_v61 = vcombine.low %v3655_v29, %v3662_v31  ;;  %v4224_v35 = vcombine.high %v3655_v29, %v3662_v31  ;;  %v4425_v0 = vpop.f32.mrb[15].mxu0 }
 0x6c1   : > { %v3599_v36 = vcombine.low %v3344_v22, %v3490_v32  ;;  %v3600_v1 = vcombine.high %v3344_v22, %v3490_v32 }
 0x6c2   : > { %v3711_v37 = vrot.slane %v4218_v38, %v5420_v10  ;;  %v3727_v59 = vrot.slane %v4220_v27, %v5420_v10  ;;  %v3743_v39 = vrot.slane %v4222_v61, %v5420_v10  ;;  %v3759_v41 = vrot.slane %v4224_v35, %v5420_v10 }
 0x6c3   : > { %v3607_v45 = vrot.slane %v3599_v36, %v5420_v10  ;;  %v3614_v21 = vrot.slane %v3600_v1, %v5420_v10 }
 0x6c4   : > { %v3768_v46 = vcombine.high %v3711_v37, %v3727_v59  ;;  %v3800_v16 = vcombine.high %v3743_v39, %v3759_v41  ;;  %v3767_v30 = vcombine.low %v3711_v37, %v3727_v59  ;;  %v3799_v48 = vcombine.low %v3743_v39, %v3759_v41 }
 0x6c5   : > { %v3663_v49 = vcombine.low %v3607_v45, %v3623_v44  ;;  %v3664_v56 = vcombine.high %v3607_v45, %v3623_v44  ;;  %v3679_v50 = vcombine.low %v3614_v21, %v3630_v53  ;;  %v3680_v33 = vcombine.high %v3614_v21, %v3630_v53  ;;  %v4226_v44 = vld [vmem:[%s5997_s3] ss:$0 sm:$0xff] }
 0x6c6   : > { %v3782_v9 = vrot.slane %v3768_v46, %v5424_v17  ;;  %v3814_v42 = vrot.slane %v3800_v16, %v5424_v17  ;;  %v3775_v51 = vrot.slane %v3767_v30, %v5424_v17  ;;  %v3807_v52 = vrot.slane %v3799_v48, %v5424_v17 }
 0x6c7   : > { %v3671_v24 = vrot.slane %v3663_v49, %v5424_v17  ;;  %v3678_v6 = vrot.slane %v3664_v56, %v5424_v17  ;;  %v3687_v54 = vrot.slane %v3679_v50, %v5424_v17  ;;  %v3694_v55 = vrot.slane %v3680_v33, %v5424_v17 }
 0x6c8   : > { %v3833_v62 = vcombine.low %v3782_v9, %v3814_v42  ;;  %v3832_v63 = vcombine.high %v3775_v51, %v3807_v52  ;;  %v3834_v3 = vcombine.high %v3782_v9, %v3814_v42  ;;  %v3831_v4 = vcombine.low %v3775_v51, %v3807_v52 }
 0x6c9   : > { %v4219_v5 = vcombine.low %v3671_v24, %v3678_v6  ;;  %v4221_v7 = vcombine.high %v3671_v24, %v3678_v6  ;;  %v4223_v11 = vcombine.low %v3687_v54, %v3694_v55  ;;  %v4225_v60 = vcombine.high %v3687_v54, %v3694_v55 }
 0x6ca   : > { %3844 = vrot.lane.b32.xlu0 %v3833_v62, %s4995_s23  ;;  %3840 = vrot.lane.b32.xlu1 %v3832_v63, %s4996_s21  ;;  %s5998_s23 = sld [smem:[#allocation28_spill]] }
 0x6cb   : > { %v3718_v14 = vrot.slane %v4219_v5, %v5420_v10  ;;  %v3734_v15 = vrot.slane %v4221_v7, %v5420_v10  ;;  %v3750_v34 = vrot.slane %v4223_v11, %v5420_v10  ;;  %v3766_v18 = vrot.slane %v4225_v60, %v5420_v10 }
 0x6cd   : > { %v3784_v20 = vcombine.high %v3718_v14, %v3734_v15  ;;  %v3816_v22 = vcombine.high %v3750_v34, %v3766_v18  ;;  %v3783_v58 = vcombine.low %v3718_v14, %v3734_v15  ;;  %v3815_v2 = vcombine.low %v3750_v34, %v3766_v18 }
 0x6ce   : > { %3848 = vrot.lane.b32.xlu1 %v3834_v3, %s4997_s19  ;;  %s3965_s19 = scalar_lea.sflag [#allocation6], %s5332_s2 }
 0x6cf   : > { %v3798_v8 = vrot.slane %v3784_v20, %v5424_v17  ;;  %v3830_v23 = vrot.slane %v3816_v22, %v5424_v17  ;;  %v3791_v43 = vrot.slane %v3783_v58, %v5424_v17  ;;  %v3823_v26 = vrot.slane %v3815_v2, %v5424_v17 }
 0x6d0   : > { %s5898_s21 = scalar_lea.hbm %s5998_s23, %s4229_s16 }
 0x6d1   : > { %v3837_v10 = vcombine.low %v3798_v8, %v3830_v23  ;;  %v3835_v28 = vcombine.low %v3791_v43, %v3823_v26  ;;  %v3836_v29 = vcombine.high %v3791_v43, %v3823_v26  ;;  %v3838_v31 = vcombine.high %v3798_v8, %v3830_v23 }
 0x6d3   : > { %3860 = vrot.lane.b32.xlu0 %v3837_v10, %s4998_s26  ;;  %3852 = vrot.lane.b32.xlu1 %v3835_v28, %s4999_s25  ;;  %s4867_s26 = scalar_lea.vmem %s5900_s15, 128  ;;  %s4871_s25 = sshll.u32 %s5002_s22, 4  ;;  %s4872_s25 = int_to_ptr.vmem [resolvable:$false] %s4871_s25 }
 0x6d4   : > { %p4868_p2 = scmp.ne.s32.totalorder %s5900_s15, %s4867_s26  ;;  %p4874_p0 = scmp.lt.s32.totalorder %s5900_s15, %s4872_s25 }
 0x6d6   : > { %p4869_p4 = pnand %p4868_p2, %p5999_p13 }
 0x6d7   : > { %3856 = vrot.lane.b32.xlu1 %v3836_v29, %s5000_s4  ;;  %s4873_s4 = scalar_lea.vmem %s4872_s25, 256 }
 0x6d8   : > { %p4870_p9 = pneg %p4869_p4  ;;  %p4875_p7 = scmp.lt.s32.totalorder %s4873_s4, %s4867_s26 }
 0x6da   : > { %p4876_p5 = por %p4875_p7, %p4874_p0 }
 0x6db   : > { %3864 = vrot.lane.b32.xlu1 %v3838_v31, %s5001_s5 }
 0x6dc   : > { %p4877_p1 = pnand %p4876_p5, %p4870_p9 }
 0x73c   : > { %v3841_v25 = vpop.permute.xlu1 %3840  ;;  %v3845_v27 = vpop.permute.xlu0 %3844 }
 0x73d   : > { %v3867_v38 = vsel %vm1787_vm2, %v3831_v4, %v3841_v25 }
 0x73e   : > { %v3869_v61 = vsel %vm3868_vm5, %v3867_v38, %v3845_v27 }
 0x740   : > { %v3849_v32 = vpop.permute.xlu1 %3848 }
 0x741   : > { %v3871_v35 = vsel %vm3870_vm6, %v3869_v61, %v3849_v32 }
 0x745   : > { %v3853_v17 = vpop.permute.xlu1 %3852  ;;  %v3861_v37 = vpop.permute.xlu0 %3860 }
 0x746   : > { %v3872_v0 = vsel %vm2894_vm4, %v3871_v35, %v3853_v17 }
 0x749   : > { %v3857_v36 = vpop.permute.xlu1 %3856 }
 0x74a   : > { %v3874_v1 = vsel %vm3873_vm7, %v3872_v0, %v3857_v36 }
 0x74b   : > { %v3876_v39 = vsel %vm3875_vm8, %v3874_v1, %v3861_v37 }
 0x74d   : > { %v3865_v59 = vpop.permute.xlu1 %3864 }
 0x74e   : > { %v3878_v41 = vsel %vm3877_vm9, %v3876_v39, %v3865_v59 }
 0x74f   : > { %4442 = vmatmul.mubr.msk.f32.vlgmr.msra.gmra.mrb[16].mxu0 %vm478_vm0, %v3878_v41 }
 0x822   : > { %v3959_v53 = vpop.f32.mrb[16].mxu0 }
 0x823   : > { %v3960_v45 = vadd.f32 %v4226_v44, %v3959_v53  ;;  %v4443_v21 = vpop.f32.mrb[17].mxu0 }
 0x825   : > { %3963 = vst.msk [vmem:[%s469_s18] sm:$0xff] %vm478_vm0, %v3960_v45 }
 0x826   : > { %4880 = shalt.err (!%p4877_p1)
}
 0x827   : > { %s4881_s2 = scalar_lea.hbm %s5898_s21, 128  ;;  %s4885_s24 = scalar_lea.hbm %s5998_s23, 256 }
 0x828   : > { %p4882_p10 = scmp.ne.s32.totalorder %s5898_s21, %s4881_s2  ;;  %p4886_p3 = scmp.lt.u32.totalorder %s5898_s21, %s5998_s23 }
 0x829   : > { %p4887_p11 = scmp.lt.u32.totalorder %s4885_s24, %s4881_s2  ;;  %p4889_p2 = scmp.lt.u32.totalorder %s4881_s2, %s5898_s21 }
 0x82a   : > { %p4883_p12 = pnand %p4882_p10, %p5999_p13 }
 0x82b   : > { %p4888_p6 = por %p4887_p11, %p4886_p3 }
 0x82c   : > { %p4884_p8 = pneg %p4883_p12 }
 0x82d   : > { %p4890_p4 = por %p4889_p2, %p4888_p6 }
 0x82f   : > { %p4891_p9 = pnand %p4890_p4, %p4884_p8 }
 0x831   : > { %4894 = shalt.err (!%p4891_p9)
}
 0x832   : > { %4540 = dma.vmem_to_hbm [thread:$0]  (%p5999_p13), %s5900_s15, 128, %s5898_s21, %s3965_s19  }
 0x833 PF: > { %s3991_s16 = sand.u32 1, %s4945_s30   ;;  %p6000_p0 = scmp.ne.s32.totalorder %s5981_s20, 0 }
 0x834   : > { %p6001_p7 = scmp.ge.s32.totalorder %s4965_s14, 2  ;;  %s3992_s18 = scalar_lea.sflag [#allocation6], %s3991_s16 }
 0x836   : > { %p4563_p5 = pnand %p6001_p7, %p6000_p0 }
 0x838   : > { %4940 = dma.done.wait (!%p4563_p5), %s3992_s18, 128  }
 0x839   : > { %4942 = vsyncadd (!%p4563_p5), %s3992_s18, 4294967168  ;;  %s30_s14 = sadd.s32 1, %s4965_s14   ;;  %s6002_s30 = smov %s4949_s10 }
 0x83a   : > { %p27_p1 = scmp.ge.s32.totalorder %s30_s14, 4   ;;  %s6003_s10 = smov %s4953_s11 }
 0x83b   : > { %s6004_s11 = smov %s5237_s17  ;;  %s6005_s12 = smov %s4961_s13 }
 0x83c   : > { %s6006_s13 = smov %s6008_s29  ;;  %29 = sbr.rel (!%p27_p1) target bundleno = 17 (0x11), region = 135 }
 0x843   :  { %3997 = vsyncpa [#allocation5], 1 }
 0x844   :  { %3999 = vsyncpa [#allocation5 + $0x1], 1 }
 0x845   :  { %4000 = vsyncpa [#allocation8], 1 }
 0x846   :  { %4002 = vsyncpa [#allocation8 + $0x1], 1 }
 0x847   :  { %4003 = vsyncpa [#allocation11], 1 }
 0x848   :  { %4004 = vsyncpa [#allocation14], 1 }
 0x849   :  { %4005 = vsyncpa [#allocation6], 1 }
 0x84a   :  { %4007 = vsyncpa [#allocation6 + $0x1], 1 }

// kernel: tpu_custom_call.1
= control target key start
LH: loop header
LB: loop body
LE: loop exit
PB: predicated region body
PF: predicated region fallthrough
CT: control target
= control target key end

     0   :  { %s5948_s0 = inlined_call_operand.hbm [shape: f32[2,8,32], index: 0, kind: input, shape index: {}]   ;;  %s5949_s1 = inlined_call_operand.hbm [shape: f32[2,16,32], index: 1, kind: input, shape index: {}]   ;;  %s5950_s2 = inlined_call_operand.hbm [shape: f32[32,32], index: 2, kind: input, shape index: {}]   ;;  %s5951_s3 = inlined_call_operand.hbm [shape: f32[32,64], index: 3, kind: input, shape index: {}]   ;;  %s5952_s4 = inlined_call_operand.hbm [shape: f32[32,32], index: 4, kind: input, shape index: {}]   ;;  %s5953_s5 = inlined_call_operand.vmem [shape: f32[1,32], index: 5, kind: input, shape index: {}]   ;;  %s5954_s6 = inlined_call_operand.vmem [shape: f32[1,32], index: 6, kind: input, shape index: {}]   ;;  %s5955_s7 = inlined_call_operand.vmem [shape: f32[1,32], index: 7, kind: input, shape index: {}]   ;;  %s5956_s8 = inlined_call_operand.hbm [shape: f32[8,8,16], index: 8, kind: input, shape index: {}]   ;;  %s5957_s9 = inlined_call_operand.hbm [shape: f32[2,8,32], index: 9, kind: output, shape index: {}]  }
   0x1   :  { %5964 = sst [smem:[#allocation23_spill]] %s5948_s0 }
   0x2   :  { %5965 = sst [smem:[#allocation24_spill]] %s5950_s2 }
   0x3   :  { %5966 = sst [smem:[#allocation25_spill]] %s5951_s3 }
   0x4   :  { %5967 = sst [smem:[#allocation26_spill]] %s5952_s4 }
   0x5   :  { %5968 = sst [smem:[#allocation27_spill]] %s5953_s5 }
   0x6   :  { %5969 = sst [smem:[#allocation28_spill]] %s5957_s9 }
   0x7   :  { %14 = vsyncpa [#allocation5], 0 }
   0x8   :  { %16 = vsyncpa [#allocation5 + $0x1], 0 }
   0x9   :  { %17 = vsyncpa [#allocation8], 0 }
   0xa   :  { %19 = vsyncpa [#allocation8 + $0x1], 0 }
   0xb   :  { %20 = vsyncpa [#allocation11], 0 }
   0xc   :  { %21 = vsyncpa [#allocation14], 0 }
   0xd   :  { %22 = vsyncpa [#allocation6], 0 }
   0xe   :  { %24 = vsyncpa [#allocation6 + $0x1], 0  ;;  %s5053_s30 = smov 0   ;;  %s5055_s10 = smov 0  }
   0xf   :  { %s5057_s11 = smov 0   ;;  %s5059_s12 = smov 0  }
  0x10   :  { %s5061_s13 = smov 0   ;;  %s5063_s14 = smov 0  }
  0x11 LB: > { %5970 = sst [smem:[#allocation22_spill]] %s4957_s12  ;;  %s5084_s15 = sadd.s32 4294967295, %s4965_s14   ;;  %s4965_s14 = sphi %s5063_s14, %s30_s14   ;;  %s4961_s13 = sphi %s5061_s13, %s6006_s13   ;;  %s4957_s12 = sphi %s5059_s12, %s6005_s12   ;;  %s4953_s11 = sphi %s5057_s11, %s6004_s11   ;;  %s4949_s10 = sphi %s5055_s10, %s6003_s10   ;;  %s4945_s30 = sphi %s5053_s30, %s6002_s30  }
  0x12   : > { %p4124_p0 = scmp.ge.s32.totalorder %s4965_s14, 1  ;;  %p5959_p1 = scmp.eq.s32.totalorder %s5084_s15, 0 }
  0x13   : > { %p281_p2 = scmp.lt.s32.totalorder %s4965_s14, 3  ;;  %s4967_s17 = smov [#allocation9]  }
  0x14   : > { %s293_s18 = sshll.u32 %s4967_s17, 4  ;;  %s4968_s20 = smov [#allocation10]   ;;  %s5093_s18 = int_to_ptr.vmem [resolvable:$true] %s293_s18 }
  0x15   : > { %p5089_p3 = pnand %p4124_p0, %p281_p2  ;;  %s306_s21 = sshll.u32 %s4968_s20, 4  ;;  %s5104_s21 = int_to_ptr.vmem [resolvable:$true] %s306_s21 }
  0x16   : > { %s4969_s22 = smov [#allocation12]   ;;  %s5973_s2 = sld [smem:[#allocation24_spill]] }
  0x17   : > { %s5971_s16 = scalar_select %p5089_p3, 1, 0 }
  0x18   : > { %p4542_p4 = pneg %p5089_p3  ;;  %s5106_s23 = sshll.u32 %s4969_s22, 4  ;;  %s320_s23 = int_to_ptr.vmem [resolvable:$true] %s5106_s23 }
  0x1a   : > { %p5100_p6 = pnand %p4542_p4, %p5959_p1 }
  0x1c   : > { %s4695_s26 = scalar_lea.hbm %s5973_s2, 512  ;;  %p5116_p8 = pneg %p5100_p6 }
  0x1d   : > { %p4696_p7 = scmp.ne.s32.totalorder %s5973_s2, %s4695_s26  ;;  %p4702_p11 = scmp.lt.u32.totalorder %s4695_s26, %s5973_s2 }
  0x1f   : > { %p4698_p9 = pnand %p5116_p8, %p4696_p7 }
  0x21   : > { %p4699_p10 = pneg %p4698_p9 }
  0x23   : > { %p4704_p12 = pnand %p4702_p11, %p4699_p10 }
  0x25   : > { %4707 = shalt.err (!%p4704_p12)
}
  0x26   : > { %s4708_s22 = scalar_lea.vmem %s5093_s18, 512  ;;  %p4716_p4 = scmp.lt.s32.totalorder %s5093_s18, %s5093_s18 }
  0x27   : > { %p4709_p13 = scmp.ne.s32.totalorder %s5093_s18, %s4708_s22  ;;  %p4717_p5 = scmp.lt.s32.totalorder %s4708_s22, %s4708_s22 }
  0x29   : > { %p4711_p0 = pnand %p4709_p13, %p5116_p8  ;;  %p4718_p7 = por %p4717_p5, %p4716_p4 }
  0x2b   : > { %p4712_p2 = pneg %p4711_p0 }
  0x2d   : > { %p4719_p9 = pnand %p4718_p7, %p4712_p2 }
  0x2f   : > { %4722 = shalt.err (!%p4719_p9)
}
  0x30   : > { %s5961_s24 = smov 128   ;;  %s5962_s25 = smov 8  }
  0x31   : > { %4545 = dma.hbm_to_vmem [thread:$0]  (!%p5100_p6), %s5973_s2, 512, %s5093_s18, [#allocation8], %s5961_s24, %s5961_s24, %s5962_s25  }
  0x32   : > { %s5975_s3 = sld [smem:[#allocation25_spill]] }
  0x38   : > { %s4723_s20 = scalar_lea.hbm %s5975_s3, 512 }
  0x39   : > { %p4724_p5 = scmp.ne.s32.totalorder %s5975_s3, %s4723_s20  ;;  %p4730_p12 = scmp.lt.u32.totalorder %s4723_s20, %s5975_s3 }
  0x3b   : > { %p4726_p10 = pnand %p4724_p5, %p5116_p8 }
  0x3d   : > { %p4727_p11 = pneg %p4726_p10 }
  0x3f   : > { %p4732_p13 = pnand %p4730_p12, %p4727_p11 }
  0x41   : > { %4735 = shalt.err (!%p4732_p13)
}
  0x42   : > { %s4736_s18 = scalar_lea.vmem %s5104_s21, 512  ;;  %p4744_p7 = scmp.lt.s32.totalorder %s5104_s21, %s5104_s21 }
  0x43   : > { %p4737_p0 = scmp.ne.s32.totalorder %s5104_s21, %s4736_s18  ;;  %p4745_p9 = scmp.lt.s32.totalorder %s4736_s18, %s4736_s18 }
  0x45   : > { %p4739_p2 = pnand %p4737_p0, %p5116_p8  ;;  %p4746_p5 = por %p4745_p9, %p4744_p7 }
  0x47   : > { %p4740_p4 = pneg %p4739_p2 }
  0x49   : > { %p4747_p10 = pnand %p4746_p5, %p4740_p4 }
  0x4b   : > { %4750 = shalt.err (!%p4747_p10)
}
  0x4c   : > { %4548 = dma.hbm_to_vmem [thread:$0]  (!%p5100_p6), %s5975_s3, 512, %s5104_s21, [#allocation11], %s5961_s24, %s5961_s24, %s5962_s25  }
  0x4d   : > { %s5976_s4 = sld [smem:[#allocation26_spill]] }
  0x53   : > { %s4751_s27 = scalar_lea.hbm %s5976_s4, 512 }
  0x54   : > { %p4752_p11 = scmp.ne.s32.totalorder %s5976_s4, %s4751_s27  ;;  %p4758_p0 = scmp.lt.u32.totalorder %s4751_s27, %s5976_s4 }
  0x56   : > { %p4754_p12 = pnand %p4752_p11, %p5116_p8 }
  0x58   : > { %p4755_p13 = pneg %p4754_p12 }
  0x5a   : > { %p4760_p2 = pnand %p4758_p0, %p4755_p13 }
  0x5c   : > { %4763 = shalt.err (!%p4760_p2)
}
  0x5d   : > { %s4764_s18 = scalar_lea.vmem %s320_s23, 512  ;;  %p4772_p5 = scmp.lt.s32.totalorder %s320_s23, %s320_s23 }
  0x5e   : > { %p4765_p4 = scmp.ne.s32.totalorder %s320_s23, %s4764_s18  ;;  %p4773_p10 = scmp.lt.s32.totalorder %s4764_s18, %s4764_s18 }
  0x60   : > { %p4767_p7 = pnand %p4765_p4, %p5116_p8  ;;  %p4774_p1 = por %p4773_p10, %p4772_p5 }
  0x62   : > { %p4768_p9 = pneg %p4767_p7 }
  0x64   : > { %p4775_p3 = pnand %p4774_p1, %p4768_p9 }
  0x66   : > { %4778 = shalt.err (!%p4775_p3)
}
  0x67   : > { %4551 = dma.hbm_to_vmem [thread:$0]  (!%p5100_p6), %s5976_s4, 512, %s320_s23, [#allocation11], %s5961_s24, %s5961_s24, %s5962_s25  }
  0x68   : > { %s4972_s9 = smov [#allocation13]   ;;  %s4779_s28 = scalar_lea.hbm %s5956_s8, 1024 }
  0x69   : > { %s343_s12 = sshll.u32 %s4972_s9, 4  ;;  %p4780_p1 = scmp.ne.s32.totalorder %s5956_s8, %s4779_s28  ;;  %s344_s12 = int_to_ptr.vmem [resolvable:$true] %s343_s12 }
  0x6a   : > { %p4786_p12 = scmp.lt.u32.totalorder %s4779_s28, %s5956_s8 }
  0x6b   : > { %p4782_p3 = pnand %p4780_p1, %p5116_p8 }
  0x6d   : > { %p4783_p11 = pneg %p4782_p3 }
  0x6f   : > { %p4788_p13 = pnand %p4786_p12, %p4783_p11 }
  0x71   : > { %4791 = shalt.err (!%p4788_p13)
}
  0x72   : > { %s4792_s23 = scalar_lea.vmem %s344_s12, 1024  ;;  %p4800_p7 = scmp.lt.s32.totalorder %s344_s12, %s344_s12 }
  0x73   : > { %p4793_p0 = scmp.ne.s32.totalorder %s344_s12, %s4792_s23  ;;  %p4801_p9 = scmp.lt.s32.totalorder %s4792_s23, %s4792_s23 }
  0x75   : > { %p4795_p2 = pnand %p4793_p0, %p5116_p8  ;;  %p4802_p5 = por %p4801_p9, %p4800_p7 }
  0x77   : > { %p4796_p4 = pneg %p4795_p2 }
  0x79   : > { %p4803_p10 = pnand %p4802_p5, %p4796_p4 }
  0x7b   : > { %4806 = shalt.err (!%p4803_p10)
}
  0x7c   : > { %4554 = dma.hbm_to_vmem [thread:$0]  (!%p5100_p6), %s5956_s8, 1024, %s344_s12, [#allocation14], %s5961_s24, %s5961_s24, %s5962_s25  }
  0x7d   : > { %s4123_s19 = sadd.s32 4294967294, %s4965_s14   ;;  %s42_s29 = sadd.s32 1, %s4961_s13 }
  0x7e   : > { %p44_p8 = scmp.ge.s32.totalorder %s42_s29, 2  ;;  %s51_s9 = sadd.s32 1, %s4953_s11 }
  0x7f   : > { %p58_p1 = scmp.ne.s32.totalorder %s4953_s11, %s4949_s10  ;;  %p59_p3 = scmp.eq.s32.totalorder %s4965_s14, 0 }
  0x80   : > { %s6008_s29 = smov (%p44_p8, %s42_s29), 0  ;;  %p64_p12 = scmp.ne.s32.totalorder %s4949_s10, %s4945_s30 }
  0x81   : > { %p5217_p11 = por %p59_p3, %p58_p1  ;;  %s46_s12 = ssub.s32 %s4961_s13, %s6008_s29 }
  0x82   : > { %p268_p6 = scmp.eq.s32.totalorder %s5084_s15, 1  ;;  %p49_p13 = scmp.eq.s32.totalorder %s46_s12, 0 }
  0x83   : > { %p5978_p0 = scmp.eq.s32.totalorder %s5084_s15, 0  ;;  %p274_p7 = scmp.eq.s32.totalorder %s4123_s19, 1 }
  0x84   : > { %p5232_p4 = por %p268_p6, %p58_p1  ;;  %p4570_p5 = scmp.lt.s32.totalorder %s4965_s14, 2 }
  0x85   : > { %p5228_p2 = por %p5978_p0, %p64_p12  ;;  %p5239_p9 = por %p274_p7, %p64_p12 }
  0x86   : > { %s5980_s28 = scalar_select %p5232_p4, 1, 0 }
  0x87   : > { %s5237_s17 = scalar_select %p49_p13, %s4953_s11, %s51_s9  }
  0x88   : > { %s5981_s20 = scalar_select %p5239_p9, 1, 0 }
  0x89   : > { %s5245_s22 = sand.u32 1, %s4953_s11   ;;  %s4131_s18 = sshll.u32 %s4961_s13, 7 }
  0x8a   : > { %s4130_s23 = sshll.u32 %s5245_s22, 3  ;;  %s5982_s0 = sld [smem:[#allocation23_spill]] }
  0x8b   : > { %s361_s19 = scalar_lea.vmem [#allocation4], %s4130_s23  ;;  %p5256_p10 = pnand %p4570_p5, %p5217_p11 }
  0x8c   : > { %s369_s9 = sshll.u32 %s361_s19, 4  ;;  %s358_s2 = scalar_lea.sflag [#allocation5], %s5245_s22  ;;  %s5260_s9 = int_to_ptr.vmem [resolvable:$true] %s369_s9 }
  0x8d   : > { %p4809_p1 = pneg %p5256_p10 }
  0x90   : > { %s5252_s12 = scalar_lea.hbm %s5982_s0, %s4131_s18  ;;  %s4812_s23 = scalar_lea.hbm %s5982_s0, 256 }
  0x91   : > { %s4807_s21 = scalar_lea.hbm %s5252_s12, 128  ;;  %p4813_p11 = scmp.lt.u32.totalorder %s5252_s12, %s5982_s0 }
  0x92   : > { %p4808_p8 = scmp.ne.s32.totalorder %s5252_s12, %s4807_s21  ;;  %p4814_p6 = scmp.lt.u32.totalorder %s4812_s23, %s4807_s21 }
  0x93   : > { %p4816_p0 = scmp.lt.u32.totalorder %s4807_s21, %s5252_s12 }
  0x94   : > { %p4810_p3 = pnand %p4809_p1, %p4808_p8  ;;  %p4815_p13 = por %p4814_p6, %p4813_p11 }
  0x96   : > { %p4811_p12 = pneg %p4810_p3  ;;  %p4817_p7 = por %p4816_p0, %p4815_p13 }
  0x98   : > { %p4818_p5 = pnand %p4817_p7, %p4811_p12 }
  0x9a   : > { %4821 = shalt.err (!%p4818_p5)
}
  0x9b   : > { %s4822_s25 = scalar_lea.vmem %s5260_s9, 128  ;;  %s4973_s18 = smov [#allocation4]  }
  0x9c   : > { %p4823_p8 = scmp.ne.s32.totalorder %s5260_s9, %s4822_s25  ;;  %s4827_s26 = sshll.u32 %s4973_s18, 4  ;;  %s4828_s26 = int_to_ptr.vmem [resolvable:$false] %s4827_s26 }
  0x9d   : > { %s4829_s5 = scalar_lea.vmem %s4828_s26, 256  ;;  %p4830_p4 = scmp.lt.s32.totalorder %s5260_s9, %s4828_s26 }
  0x9e   : > { %p4825_p3 = pnand %p4823_p8, %p4809_p1  ;;  %p4831_p11 = scmp.lt.s32.totalorder %s4829_s5, %s4822_s25 }
  0xa0   : > { %p4826_p9 = pneg %p4825_p3  ;;  %p4832_p6 = por %p4831_p11, %p4830_p4 }
  0xa2   : > { %p4833_p13 = pnand %p4832_p6, %p4826_p9 }
  0xa4   : > { %4836 = shalt.err (!%p4833_p13)
}
  0xa5   : > { %4558 = dma.hbm_to_vmem [thread:$0]  (!%p5256_p10), %s5252_s12, 128, %s5260_s9, %s358_s2  }
  0xa6   : > { %s4232_s21 = sshll.u32 %s4961_s13, 8  ;;  %s5984_s23 = sshll.u32 %s5245_s22, 4 }
  0xa7   : > { %s380_s19 = scalar_lea.vmem [#allocation7], %s5984_s23  ;;  %s376_s26 = sand.u32 1, %s4965_s14  }
  0xa8   : > { %s387_s18 = sshll.u32 %s380_s19, 4  ;;  %s5298_s0 = scalar_lea.hbm %s5949_s1, %s4232_s21  ;;  %s5292_s18 = int_to_ptr.vmem [resolvable:$true] %s387_s18 }
  0xa9   : > { %s5300_s3 = scalar_lea.sflag [#allocation8], %s376_s26  ;;  %s4837_s4 = scalar_lea.hbm %s5298_s0, 256 }
  0xaa   : > { %p4838_p4 = scmp.ne.s32.totalorder %s5298_s0, %s4837_s4  ;;  %s4842_s12 = scalar_lea.hbm %s5949_s1, 512 }
  0xab   : > { %p4843_p0 = scmp.lt.u32.totalorder %s5298_s0, %s5949_s1  ;;  %p4844_p7 = scmp.lt.u32.totalorder %s4842_s12, %s4837_s4 }
  0xac   : > { %p4840_p9 = pnand %p4838_p4, %p4809_p1  ;;  %p4846_p8 = scmp.lt.u32.totalorder %s4837_s4, %s5298_s0 }
  0xad   : > { %p4845_p5 = por %p4844_p7, %p4843_p0 }
  0xae   : > { %p4841_p12 = pneg %p4840_p9 }
  0xaf   : > { %p4847_p3 = por %p4846_p8, %p4845_p5 }
  0xb1   : > { %p4848_p11 = pnand %p4847_p3, %p4841_p12 }
  0xb3   : > { %4851 = shalt.err (!%p4848_p11)
}
  0xb4   : > { %s4852_s21 = scalar_lea.vmem %s5292_s18, 256  ;;  %s4974_s19 = smov [#allocation7]  }
  0xb5   : > { %p4853_p6 = scmp.ne.s32.totalorder %s5292_s18, %s4852_s21  ;;  %s4857_s26 = sshll.u32 %s4974_s19, 4  ;;  %s4858_s26 = int_to_ptr.vmem [resolvable:$false] %s4857_s26 }
  0xb6   : > { %s4859_s25 = scalar_lea.vmem %s4858_s26, 512  ;;  %p4860_p9 = scmp.lt.s32.totalorder %s5292_s18, %s4858_s26 }
  0xb7   : > { %p4855_p13 = pnand %p4853_p6, %p4809_p1  ;;  %p4861_p0 = scmp.lt.s32.totalorder %s4859_s25, %s4852_s21 }
  0xb9   : > { %p4856_p4 = pneg %p4855_p13  ;;  %p4862_p7 = por %p4861_p0, %p4860_p9 }
  0xbb   : > { %p4863_p5 = pnand %p4862_p7, %p4856_p4 }
  0xbd   : > { %4866 = shalt.err (!%p4863_p5)
}
  0xbe   : > { %s5985_s4 = smov 8   ;;  %s5986_s5 = smov 128  }
  0xbf   : > { %4561 = dma.hbm_to_vmem [thread:$0]  (!%p5256_p10), %s5298_s0, 256, %s5292_s18, %s5300_s3, %s5986_s5, %s5986_s5, %s5985_s4  }
  0xc0   : > { %p5987_p1 = scmp.ne.s32.totalorder %s5971_s16, 0 }
  0xc1   : > { %s5332_s2 = sand.u32 (!%p5987_p1), 1, %s4949_s10  }
  0xc2   : > { %399 = sbr.rel (%p5987_p1) target bundleno = 2099 (0x833), region = 56  ;;  %s4136_s22 = sshll.u32 (!%p5987_p1), %s5332_s2, 3 }
  0xc3   : > { %s402_s12 = scalar_lea.sflag (!%p5987_p1), [#allocation5], %s5332_s2  ;;  %s405_s24 = scalar_lea.vmem (!%p5987_p1), [#allocation4], %s4136_s22 }
  0xc9   : > { %4920 = dma.done.wait (%p5228_p2), %s402_s12, 128  }
  0xca   : > { %4922 = vsyncadd (%p5228_p2), %s402_s12, 4294967168  ;;  %s410_s0 = sand.u32 1, %s5084_s15   ;;  %s4137_s3 = sshll.u32 %s5332_s2, 4 }
  0xcb   : > { %s411_s16 = scalar_lea.sflag [#allocation8], %s410_s0  ;;  %s414_s18 = scalar_lea.vmem [#allocation7], %s4137_s3 }
  0xcc   : > { %4924 = dma.done.wait (%p5228_p2), %s411_s16, 256  }
  0xcd   : > { %4926 = vsyncadd (%p5228_p2), %s411_s16, 4294967040  ;;  %p5988_p10 = scmp.eq.s32.totalorder %s5084_s15, 0 }
  0xcf   : > { %4928 = dma.done.wait (%p5988_p10), [#allocation8], 512   ;;  %p5989_p12 = pmov %p5988_p10 }
  0xd0   : > { %p5990_p8 = pmov %p5988_p10 }
  0xd1   : > { %4930 = vsyncadd (%p5989_p12), [#allocation8], 4294966784 }
  0xd2   : > { %4932 = dma.done.wait (%p5990_p8), [#allocation11], 1024   ;;  %p5991_p3 = pmov %p5990_p8 }
  0xd4   : > { %4934 = vsyncadd (%p5991_p3), [#allocation11], 4294966272  ;;  %p5992_p11 = pmov %p5991_p3 }
  0xd5   : > { %p5993_p6 = pmov %p5991_p3 }
  0xd6   : > { %4936 = dma.done.wait (%p5992_p11), [#allocation14], 1024  }
  0xd7   : > { %4938 = vsyncadd (%p5993_p6), [#allocation14], 4294966272  ;;  %vm478_vm0 = vcmask 261120   ;;  %v476_v0 = vld [vmem:[%s414_s18] sm:$0xff]  ;;  %v1820_v1 = vld [vmem:[%s405_s24] sm:$0xff]  ;;  %v4975_v25 = vmov 0.0|0.0   ;;  %v507_v62 = vlaneseq }
  0xd8   : > { %v477_v2 = vld [vmem:[%s414_s18 + $0x8] sm:$0xff]  ;;  %v479_v3 = vsel %vm478_vm0, %v476_v0, 0.0  ;;  %v1822_v4 = vsel %vm478_vm0, %v1820_v1, 0.0  ;;  %v522_v21 = vld [vmem:[#allocation10] sm:$0xff]  ;;  %4452 = vmatprep.subr.bf16.mxu1 %v4975_v25  ;;  %v524_v27 = vld [vmem:[#allocation10 + $0x10] sm:$0xff]  ;;  %vm4976_vm1 = vmmov 0  }
  0xd9   : > { %480 = vadd.xlane.f32.xlu0 %v479_v3  ;;  %1823 = vadd.xlane.f32.xlu1 %v1822_v4  ;;  %v482_v5 = vsel %vm478_vm0, %v477_v2, 0.0  ;;  %v523_v22 = vld [vmem:[#allocation10 + $0x8] sm:$0xff]  ;;  %v1850_v23 = vld [vmem:[#allocation9] sm:$0xff]  ;;  %v525_v28 = vld [vmem:[#allocation10 + $0x18] sm:$0xff]  ;;  %v4977_v34 = vmov 0.0   ;;  %s4978_s21 = smov 124  }
  0xda   : > { %v4444_v24 = vpack.c.bf16 %v523_v22, %v522_v21  ;;  %v1851_v26 = vld [vmem:[#allocation9 + $0x8] sm:$0xff]  ;;  %v4448_v30 = vpack.c.bf16 %v525_v28, %v524_v27  ;;  %v1852_v31 = vld [vmem:[#allocation9 + $0x10] sm:$0xff]  ;;  %v1853_v32 = vld [vmem:[#allocation9 + $0x18] sm:$0xff]  ;;  %4318 = vmatprep.mubr.msk.f32.mxu1 %vm4976_vm1, %v4977_v34  ;;  %s4979_s19 = smov 120   ;;  %s4980_s26 = smov 116   ;;  %vm1787_vm2 = vcmask 31744  }
  0xdb   : > { %v4453_v29 = vpack.c.bf16 %v1851_v26, %v1850_v23  ;;  %v4456_v33 = vpack.c.bf16 %v1853_v32, %v1852_v31  ;;  %v4233_v45 = vld [vmem:[%s5954_s6] ss:$0 sm:$0xff]  ;;  %s4981_s25 = smov 112   ;;  %s4982_s4 = smov 108   ;;  %v4988_v63 = vmov 1983009808   ;;  %vm5548_vm3 = vmpackc.low %vm1787_vm2, %vm1787_vm2 }
  0xdc   : > { %4445 = vmatprep.subr.bf16.mxu0 %v4444_v24  ;;  %v4234_v47 = vld [vmem:[%s5955_s7] ss:$0 sm:$0xff]  ;;  %s4983_s5 = smov 104   ;;  %s4984_s12 = smov 100   ;;  %v4989_v3 = vmov 1934713408  }
  0xdd   : > { %483 = vadd.xlane.f32.xlu0 %v482_v5  ;;  %4447 = vmatpush3.bf16.msra.mxu0 %v4444_v24  ;;  %s4985_s24 = smov 96   ;;  %s4986_s0 = smov 92   ;;  %v766_v4 = vunpack.c.l.s4 %v4989_v3  ;;  %v508_v5 = vshrl.u32 %v507_v62, 7  ;;  %vm2894_vm4 = vcmask 130048   ;;  %vm3868_vm5 = vcmask 64512  }
  0xde   : > { %4454 = vmatpush3.bf16.msra.mxu1 %v4453_v29  ;;  %4449 = vmatprep.subr.bf16.mxu0 %v4448_v30  ;;  %s4987_s3 = smov 88   ;;  %s4990_s16 = smov 84   ;;  %vm3870_vm6 = vcmask 97280   ;;  %vm3873_vm7 = vcmask 162816   ;;  %vm3875_vm8 = vcmask 195584   ;;  %vm3877_vm9 = vcmask 228352  }
  0xdf   : > { %4455 = vmatprep.subr.bf16.mxu1 %v4975_v25  ;;  %s4991_s18 = smov 80   ;;  %s4992_s15 = smov 76  }
  0xe0   : > { %s4993_s27 = smov 72   ;;  %s4994_s9 = smov 68  }
  0xe1   : > { %4451 = vmatpush3.bf16.msra.mxu0 %v4448_v30  ;;  %s4995_s23 = smov 8   ;;  %p5999_p13 = scmp.ne.s32.totalorder %s5980_s28, 0 }
  0xe2   : > { %4458 = vmatprep.subr.bf16.mxu0 %v4975_v25  ;;  %4457 = vmatpush3.bf16.msra.mxu1 %v4456_v33 }
  0xe3   : > { %4462 = vmatprep.subr.bf16.mxu1 %v4975_v25 }
 0x166   : > { %v481_v6 = vpop.xlane.xlu0 %480  ;;  %v1824_v7 = vpop.xlane.xlu1 %1823 }
 0x167   : > { %v486_v8 = vmul.f32 0.03125, %v481_v6  ;;  %v1826_v9 = vmul.f32 0.03125, %v1824_v7 }
 0x169   : > { %v488_v10 = vsub.f32 %v476_v0, %v486_v8  ;;  %v1827_v11 = vsub.f32 %v1820_v1, %v1826_v9  ;;  %v702_v0 = vunpack.c.l.s4 %v4988_v63  ;;  %v767_v9 = vunpack.c.0.s8 %v766_v4 }
 0x16a   : > { %v484_v12 = vpop.xlane.xlu0 %483 }
 0x16b   : > { %v487_v13 = vmul.f32 0.03125, %v484_v12  ;;  %v490_v14 = vmul.f32 %v488_v10, %v488_v10  ;;  %v1828_v15 = vmul.f32 %v1827_v11, %v1827_v11  ;;  %v703_v6 = vunpack.c.0.s8 %v702_v0 }
 0x16d   : > { %v489_v16 = vsub.f32 %v477_v2, %v487_v13  ;;  %v492_v17 = vsel %vm478_vm0, %v490_v14, 0.0  ;;  %v1829_v18 = vsel %vm478_vm0, %v1828_v15, 0.0 }
 0x16e   : > { %493 = vadd.xlane.f32.xlu1 %v492_v17  ;;  %v5424_v17 = vsub.s32 %v767_v9, %v508_v5 }
 0x16f   : > { %v491_v19 = vmul.f32 %v489_v16, %v489_v16 }
 0x171   : > { %v495_v20 = vsel %vm478_vm0, %v491_v19, 0.0 }
 0x172   : > { %1830 = vadd.xlane.f32.xlu1 %v1829_v18  ;;  %496 = vadd.xlane.f32.xlu0 %v495_v20 }
 0x1fb   : > { %v494_v35 = vpop.xlane.xlu1 %493 }
 0x1fc   : > { %v498_v36 = vmul.f32 0.03125, %v494_v35 }
 0x1fe   : > { %v500_v37 = vadd.f32 1e-05, %v498_v36 }
 0x1ff   : > { %v1831_v38 = vpop.xlane.xlu1 %1830  ;;  %v497_v39 = vpop.xlane.xlu0 %496 }
 0x200   : > { %4657 = vrsqrt.f32 %v500_v37  ;;  %v1832_v40 = vmul.f32 0.03125, %v1831_v38  ;;  %v499_v41 = vmul.f32 0.03125, %v497_v39 }
 0x202   : > { %v1833_v42 = vadd.f32 1e-05, %v1832_v40  ;;  %v501_v43 = vadd.f32 1e-05, %v499_v41 }
 0x204   : > { %4659 = vrsqrt.f32 %v1833_v42 }
 0x205   : > { %4661 = vrsqrt.f32 %v501_v43 }
 0x20a   : > { %v4658_v44 = vpop.eup %4657 }
 0x20b   : > { %v504_v46 = vmul.f32 %v4658_v44, %v488_v10  ;;  %v5420_v10 = vsub.s32 %v703_v6, %v508_v5 }
 0x20d   : > { %v512_v48 = vmul.f32 %v4233_v45, %v504_v46 }
 0x20e   : > { %v4660_v49 = vpop.eup %4659 }
 0x20f   : > { %v4662_v50 = vpop.eup %4661  ;;  %v520_v51 = vadd.f32 %v4234_v47, %v512_v48  ;;  %v1835_v52 = vmul.f32 %v4660_v49, %v1827_v11 }
 0x210   : > { %v505_v53 = vmul.f32 %v4662_v50, %v489_v16 }
 0x211   : > { %4307 = vmatprep.mubr.msk.f32.mxu0 %vm478_vm0, %v520_v51  ;;  %v1842_v54 = vmul.f32 %v4233_v45, %v1835_v52 }
 0x212   : > { %v513_v55 = vmul.f32 %v4233_v45, %v505_v53 }
 0x213   : > { %v1849_v56 = vadd.f32 %v4234_v47, %v1842_v54 }
 0x214   : > { %v521_v57 = vadd.f32 %v4234_v47, %v513_v55 }
 0x215   : > { %4319 = vmatmul.mubr.msk.f32.vlgmr.msra.gmra.mrb[0].mxu1 %vm478_vm0, %v1849_v56 }
 0x216   : > { %4308 = vmatmul.mubr.msk.f32.vlgmr.msra.gmra.mrb[0].mxu0 %vm478_vm0, %v521_v57  ;;  %4332 = vmatprep.mubr.msk.f32.mxu1 %vm4976_vm1, %v4977_v34 }
 0x217   : > { %4325 = vmatprep.mubr.msk.f32.mxu0 %vm4976_vm1, %v4977_v34 }
 0x2e8   : > { %v5385_v58 = vpop.f32.mrb[0].mxu1 }
 0x2e9   : > { %v5387_v59 = vpop.f32.mrb[0].mxu0  ;;  %v4320_v60 = vpop.f32.mrb[1].mxu1 }
 0x2ea   : > { %611 = vrot.lane.b32.xlu1 %v5387_v59, %s4978_s21  ;;  %v5390_v61 = vpop.f32.mrb[1].mxu0 }
 0x2eb   : > { %609 = vrot.lane.b32.xlu0 %v5390_v61, %s4978_s21 }
 0x2ee   : > { %617 = vrot.lane.b32.xlu1 %v5387_v59, %s4979_s19 }
 0x2ef   : > { %1928 = vrot.lane.b32.xlu0 %v5385_v58, %s4978_s21  ;;  %s4996_s21 = smov 4  }
 0x2f2   : > { %623 = vrot.lane.b32.xlu1 %v5387_v59, %s4980_s26 }
 0x2f3   : > { %621 = vrot.lane.b32.xlu0 %v5390_v61, %s4980_s26 }
 0x2f6   : > { %615 = vrot.lane.b32.xlu1 %v5390_v61, %s4979_s19 }
 0x2f7   : > { %627 = vrot.lane.b32.xlu0 %v5390_v61, %s4981_s25 }
 0x2fa   : > { %629 = vrot.lane.b32.xlu1 %v5387_v59, %s4981_s25 }
 0x2fb   : > { %633 = vrot.lane.b32.xlu0 %v5390_v61, %s4982_s4 }
 0x2fe   : > { %635 = vrot.lane.b32.xlu1 %v5387_v59, %s4982_s4 }
 0x2ff   : > { %639 = vrot.lane.b32.xlu0 %v5390_v61, %s4983_s5 }
 0x302   : > { %641 = vrot.lane.b32.xlu1 %v5387_v59, %s4983_s5 }
 0x303   : > { %645 = vrot.lane.b32.xlu0 %v5390_v61, %s4984_s12 }
 0x306   : > { %647 = vrot.lane.b32.xlu1 %v5387_v59, %s4984_s12 }
 0x307   : > { %1934 = vrot.lane.b32.xlu0 %v5385_v58, %s4980_s26  ;;  %s4998_s26 = smov 24  }
 0x30a   : > { %1931 = vrot.lane.b32.xlu1 %v5385_v58, %s4979_s19  ;;  %s4997_s19 = smov 12  }
 0x30b   : > { %1940 = vrot.lane.b32.xlu0 %v5385_v58, %s4982_s4  ;;  %s5000_s4 = smov 20  }
 0x30e   : > { %1937 = vrot.lane.b32.xlu1 %v5385_v58, %s4981_s25  ;;  %s4999_s25 = smov 16  }
 0x30f   : > { %1946 = vrot.lane.b32.xlu0 %v5385_v58, %s4984_s12  ;;  %s5996_s12 = sld [smem:[#allocation22_spill]] }
 0x312   : > { %1943 = vrot.lane.b32.xlu1 %v5385_v58, %s4983_s5  ;;  %s5001_s5 = smov 28  }
 0x313   : > { %653 = vrot.lane.b32.xlu0 %v5387_v59, %s4985_s24 }
 0x316   : > { %659 = vrot.lane.b32.xlu1 %v5387_v59, %s4986_s0 }
 0x31a   : > { %651 = vrot.lane.b32.xlu1 %v5390_v61, %s4985_s24 }
 0x31e   : > { %657 = vrot.lane.b32.xlu1 %v5390_v61, %s4986_s0 }
 0x322   : > { %663 = vrot.lane.b32.xlu1 %v5390_v61, %s4987_s3 }
 0x35c   : > { %v612_v1 = vpop.permute.xlu1 %611 }
 0x35d   : > { %v610_v2 = vpop.permute.xlu0 %609 }
 0x360   : > { %v618_v7 = vpop.permute.xlu1 %617 }
 0x361   : > { %v5418_v8 = vpop.permute.xlu0 %1928  ;;  %v971_v11 = vcombine.low %v5387_v59, %v618_v7  ;;  %v972_v12 = vcombine.high %v5387_v59, %v618_v7 }
 0x363   : > { %v979_v18 = vrot.slane %v971_v11, %v5420_v10  ;;  %v986_v19 = vrot.slane %v972_v12, %v5420_v10 }
 0x364   : > { %v624_v13 = vpop.permute.xlu1 %623 }
 0x365   : > { %v987_v14 = vcombine.low %v612_v1, %v624_v13  ;;  %v988_v15 = vcombine.high %v612_v1, %v624_v13  ;;  %v622_v16 = vpop.permute.xlu0 %621 }
 0x366   : > { %v715_v22 = vcombine.low %v610_v2, %v622_v16  ;;  %v716_v23 = vcombine.high %v610_v2, %v622_v16 }
 0x367   : > { %v995_v20 = vrot.slane %v987_v14, %v5420_v10  ;;  %v1002_v21 = vrot.slane %v988_v15, %v5420_v10 }
 0x368   : > { %v616_v24 = vpop.permute.xlu1 %615  ;;  %v723_v38 = vrot.slane %v715_v22, %v5420_v10  ;;  %v730_v39 = vrot.slane %v716_v23, %v5420_v10 }
 0x369   : > { %v1035_v26 = vcombine.low %v979_v18, %v995_v20  ;;  %v1036_v27 = vcombine.high %v979_v18, %v995_v20  ;;  %v1051_v28 = vcombine.low %v986_v19, %v1002_v21  ;;  %v1052_v29 = vcombine.high %v986_v19, %v1002_v21  ;;  %v5430_v30 = vpop.permute.xlu0 %627 }
 0x36a   : > { %v699_v31 = vcombine.low %v5390_v61, %v616_v24  ;;  %v700_v32 = vcombine.high %v5390_v61, %v616_v24 }
 0x36b   : > { %v1043_v33 = vrot.slane %v1035_v26, %v5424_v17  ;;  %v1050_v35 = vrot.slane %v1036_v27, %v5424_v17  ;;  %v1059_v36 = vrot.slane %v1051_v28, %v5424_v17  ;;  %v1066_v37 = vrot.slane %v1052_v29, %v5424_v17 }
 0x36c   : > { %v707_v40 = vrot.slane %v699_v31, %v5420_v10  ;;  %v714_v41 = vrot.slane %v700_v32, %v5420_v10  ;;  %v5442_v42 = vpop.permute.xlu1 %629 }
 0x36d   : > { %v4153_v43 = vcombine.low %v1043_v33, %v1050_v35  ;;  %v4155_v44 = vcombine.high %v1043_v33, %v1050_v35  ;;  %v4157_v45 = vcombine.low %v1059_v36, %v1066_v37  ;;  %v4159_v46 = vcombine.high %v1059_v36, %v1066_v37  ;;  %v5444_v47 = vpop.permute.xlu0 %633 }
 0x36e   : > { %v763_v48 = vcombine.low %v707_v40, %v723_v38  ;;  %v764_v49 = vcombine.high %v707_v40, %v723_v38  ;;  %v779_v50 = vcombine.low %v714_v41, %v730_v39  ;;  %v780_v51 = vcombine.high %v714_v41, %v730_v39 }
 0x36f   : > { %v1387_v52 = vrot.slane %v4153_v43, %v5420_v10  ;;  %v1403_v53 = vrot.slane %v4155_v44, %v5420_v10  ;;  %v1419_v54 = vrot.slane %v4157_v45, %v5420_v10  ;;  %v1435_v55 = vrot.slane %v4159_v46, %v5420_v10 }
 0x370   : > { %v771_v56 = vrot.slane %v763_v48, %v5424_v17  ;;  %v778_v57 = vrot.slane %v764_v49, %v5424_v17  ;;  %v787_v60 = vrot.slane %v779_v50, %v5424_v17  ;;  %v794_v62 = vrot.slane %v780_v51, %v5424_v17  ;;  %v5454_v63 = vpop.permute.xlu1 %635 }
 0x371   : > { %v1443_v0 = vcombine.low %v1387_v52, %v1403_v53  ;;  %v1444_v1 = vcombine.high %v1387_v52, %v1403_v53  ;;  %v1475_v2 = vcombine.low %v1419_v54, %v1435_v55  ;;  %v1476_v3 = vcombine.high %v1419_v54, %v1435_v55  ;;  %v640_v4 = vpop.permute.xlu0 %639 }
 0x372   : > { %v4145_v5 = vcombine.low %v771_v56, %v778_v57  ;;  %v4147_v6 = vcombine.high %v771_v56, %v778_v57  ;;  %v4149_v7 = vcombine.low %v787_v60, %v794_v62  ;;  %v4151_v9 = vcombine.high %v787_v60, %v794_v62 }
 0x373   : > { %v1451_v11 = vrot.slane %v1443_v0, %v5424_v17  ;;  %v1458_v12 = vrot.slane %v1444_v1, %v5424_v17  ;;  %v1483_v13 = vrot.slane %v1475_v2, %v5424_v17  ;;  %v1490_v14 = vrot.slane %v1476_v3, %v5424_v17 }
 0x374   : > { %v1251_v15 = vrot.slane %v4145_v5, %v5420_v10  ;;  %v1267_v16 = vrot.slane %v4147_v6, %v5420_v10  ;;  %v1283_v18 = vrot.slane %v4149_v7, %v5420_v10  ;;  %v1299_v19 = vrot.slane %v4151_v9, %v5420_v10  ;;  %v642_v20 = vpop.permute.xlu1 %641 }
 0x375   : > { %v1507_v21 = vcombine.low %v1451_v11, %v1483_v13  ;;  %v1508_v22 = vcombine.high %v1451_v11, %v1483_v13  ;;  %v1509_v23 = vcombine.low %v1458_v12, %v1490_v14  ;;  %v1510_v24 = vcombine.high %v1458_v12, %v1490_v14  ;;  %v646_v26 = vpop.permute.xlu0 %645 }
 0x376   : > { %v1307_v27 = vcombine.low %v1251_v15, %v1267_v16  ;;  %v1308_v28 = vcombine.high %v1251_v15, %v1267_v16  ;;  %v1339_v29 = vcombine.low %v1283_v18, %v1299_v19  ;;  %v1340_v31 = vcombine.high %v1283_v18, %v1299_v19 }
 0x377   : > { %1789 = vst.msk [vmem:[#allocation2 + $0x8] sm:$0xff] %vm1787_vm2, %v1507_v21  ;;  %1791 = vst.msk [vmem:[#allocation2 + $0x18] sm:$0xff] %vm1787_vm2, %v1508_v22  ;;  %v731_v32 = vcombine.low %v5430_v30, %v640_v4  ;;  %v732_v33 = vcombine.high %v5430_v30, %v640_v4  ;;  %v1003_v35 = vcombine.low %v5442_v42, %v642_v20 }
 0x378   : > { %1793 = vst.msk [vmem:[#allocation2 + $0x28] sm:$0xff] %vm1787_vm2, %v1509_v23  ;;  %1795 = vst.msk [vmem:[#allocation2 + $0x38] sm:$0xff] %vm1787_vm2, %v1510_v24  ;;  %v1004_v36 = vcombine.high %v5442_v42, %v642_v20  ;;  %v1315_v37 = vrot.slane %v1307_v27, %v5424_v17  ;;  %v1322_v38 = vrot.slane %v1308_v28, %v5424_v17  ;;  %v648_v41 = vpop.permute.xlu1 %647 }
 0x379   : > { %v1347_v39 = vrot.slane %v1339_v29, %v5424_v17  ;;  %v1354_v40 = vrot.slane %v1340_v31, %v5424_v17  ;;  %v739_v43 = vrot.slane %v731_v32, %v5420_v10  ;;  %v746_v44 = vrot.slane %v732_v33, %v5420_v10  ;;  %v1935_v45 = vpop.permute.xlu0 %1934 }
 0x37a   : > { %v747_v42 = vcombine.low %v5444_v47, %v646_v26  ;;  %v748_v50 = vcombine.high %v5444_v47, %v646_v26  ;;  %v1019_v51 = vcombine.low %v5454_v63, %v648_v41  ;;  %v1020_v52 = vcombine.high %v5454_v63, %v648_v41 }
 0x37b   : > { %v1371_v46 = vcombine.low %v1315_v37, %v1347_v39  ;;  %v1372_v30 = vcombine.high %v1315_v37, %v1347_v39  ;;  %v1373_v48 = vcombine.low %v1322_v38, %v1354_v40  ;;  %v1374_v49 = vcombine.high %v1322_v38, %v1354_v40 }
 0x37c   : > { %v1011_v53 = vrot.slane %v1003_v35, %v5420_v10  ;;  %v1018_v54 = vrot.slane %v1004_v36, %v5420_v10  ;;  %v1965_v55 = vcombine.low %v5418_v8, %v1935_v45  ;;  %v1966_v47 = vcombine.high %v5418_v8, %v1935_v45  ;;  %v5490_v56 = vpop.permute.xlu1 %1931 }
 0x37d   : > { %1788 = vst.msk [vmem:[#allocation2] sm:$0xff] %vm1787_vm2, %v1371_v46  ;;  %1790 = vst.msk [vmem:[#allocation2 + $0x10] sm:$0xff] %vm1787_vm2, %v1372_v30  ;;  %v755_v57 = vrot.slane %v747_v42, %v5420_v10  ;;  %v762_v60 = vrot.slane %v748_v50, %v5420_v10  ;;  %v1027_v62 = vrot.slane %v1019_v51, %v5420_v10  ;;  %v5514_v32 = vpop.permute.xlu0 %1940 }
 0x37e   : > { %1792 = vst.msk [vmem:[#allocation2 + $0x20] sm:$0xff] %vm1787_vm2, %v1373_v48  ;;  %1794 = vst.msk [vmem:[#allocation2 + $0x30] sm:$0xff] %vm1787_vm2, %v1374_v49  ;;  %v1034_v63 = vrot.slane %v1020_v52, %v5420_v10  ;;  %v5497_v0 = vrot.slane %v1965_v55, %v5420_v10  ;;  %v5500_v1 = vrot.slane %v1966_v47, %v5420_v10 }
 0x37f   : > { %v1949_v2 = vcombine.low %v5385_v58, %v5490_v56  ;;  %v1950_v8 = vcombine.high %v5385_v58, %v5490_v56  ;;  %v795_v3 = vcombine.low %v739_v43, %v755_v57  ;;  %v796_v4 = vcombine.high %v739_v43, %v755_v57 }
 0x380   : > { %v811_v5 = vcombine.low %v746_v44, %v762_v60  ;;  %v812_v6 = vcombine.high %v746_v44, %v762_v60  ;;  %v1067_v7 = vcombine.low %v1011_v53, %v1027_v62  ;;  %v1068_v9 = vcombine.high %v1011_v53, %v1027_v62  ;;  %v1938_v38 = vpop.permute.xlu1 %1937 }
 0x381   : > { %v1083_v11 = vcombine.low %v1018_v54, %v1034_v63  ;;  %v1084_v12 = vcombine.high %v1018_v54, %v1034_v63  ;;  %v803_v13 = vrot.slane %v795_v3, %v5424_v17  ;;  %v810_v14 = vrot.slane %v796_v4, %v5424_v17  ;;  %v1947_v62 = vpop.permute.xlu0 %1946 }
 0x382   : > { %v819_v15 = vrot.slane %v811_v5, %v5424_v17  ;;  %v826_v16 = vrot.slane %v812_v6, %v5424_v17  ;;  %v1075_v18 = vrot.slane %v1067_v7, %v5424_v17  ;;  %v1082_v19 = vrot.slane %v1068_v9, %v5424_v17 }
 0x383   : > { %v1091_v20 = vrot.slane %v1083_v11, %v5424_v17  ;;  %v1098_v21 = vrot.slane %v1084_v12, %v5424_v17  ;;  %v4146_v22 = vcombine.low %v803_v13, %v810_v14  ;;  %v4148_v23 = vcombine.high %v803_v13, %v810_v14 }
 0x384   : > { %v4150_v24 = vcombine.low %v819_v15, %v826_v16  ;;  %v4152_v26 = vcombine.high %v819_v15, %v826_v16  ;;  %v4154_v27 = vcombine.low %v1075_v18, %v1082_v19  ;;  %v4156_v28 = vcombine.high %v1075_v18, %v1082_v19  ;;  %v1944_v6 = vpop.permute.xlu1 %1943  ;;  %v2221_v7 = vld [vmem:[#allocation2] sm:$0xff]  ;;  %v2223_v9 = vld [vmem:[#allocation2 + $0x10] sm:$0xff] }
 0x385   : > { %v4158_v29 = vcombine.low %v1091_v20, %v1098_v21  ;;  %v4160_v31 = vcombine.high %v1091_v20, %v1098_v21  ;;  %v1258_v33 = vrot.slane %v4146_v22, %v5420_v10  ;;  %v1274_v35 = vrot.slane %v4148_v23, %v5420_v10  ;;  %v2222_v20 = vld [vmem:[#allocation2 + $0x8] sm:$0xff]  ;;  %v2224_v22 = vld [vmem:[#allocation2 + $0x18] sm:$0xff]  ;;  %v2253_v21 = vld [vmem:[#allocation13] sm:$0xff] }
 0x386   : > { %v1290_v36 = vrot.slane %v4150_v24, %v5420_v10  ;;  %v1306_v37 = vrot.slane %v4152_v26, %v5420_v10  ;;  %v1394_v39 = vrot.slane %v4154_v27, %v5420_v10  ;;  %v1410_v40 = vrot.slane %v4156_v28, %v5420_v10 }
 0x387   : > { %v1426_v41 = vrot.slane %v4158_v29, %v5420_v10  ;;  %v1442_v43 = vrot.slane %v4160_v31, %v5420_v10  ;;  %v1323_v44 = vcombine.low %v1258_v33, %v1274_v35  ;;  %v1324_v45 = vcombine.high %v1258_v33, %v1274_v35 }
 0x388   : > { %v1355_v46 = vcombine.low %v1290_v36, %v1306_v37  ;;  %v1356_v30 = vcombine.high %v1290_v36, %v1306_v37  ;;  %v1459_v48 = vcombine.low %v1394_v39, %v1410_v40  ;;  %v1460_v49 = vcombine.high %v1394_v39, %v1410_v40 }
 0x389   : > { %v1491_v42 = vcombine.low %v1426_v41, %v1442_v43  ;;  %v1492_v50 = vcombine.high %v1426_v41, %v1442_v43  ;;  %v1331_v51 = vrot.slane %v1323_v44, %v5424_v17  ;;  %v1338_v52 = vrot.slane %v1324_v45, %v5424_v17 }
 0x38a   : > { %v1363_v53 = vrot.slane %v1355_v46, %v5424_v17  ;;  %v1370_v54 = vrot.slane %v1356_v30, %v5424_v17  ;;  %v1467_v55 = vrot.slane %v1459_v48, %v5424_v17  ;;  %v1474_v47 = vrot.slane %v1460_v49, %v5424_v17 }
 0x38b   : > { %v1499_v57 = vrot.slane %v1491_v42, %v5424_v17  ;;  %v1506_v60 = vrot.slane %v1492_v50, %v5424_v17  ;;  %v1957_v15 = vrot.slane %v1949_v2, %v5420_v10  ;;  %v1964_v16 = vrot.slane %v1950_v8, %v5420_v10 }
 0x38c   : > { %v1375_v63 = vcombine.low %v1331_v51, %v1363_v53  ;;  %v1376_v3 = vcombine.high %v1331_v51, %v1363_v53  ;;  %v1377_v4 = vcombine.low %v1338_v52, %v1370_v54  ;;  %v1378_v5 = vcombine.high %v1338_v52, %v1370_v54 }
 0x38d   : > { %v1511_v11 = vcombine.low %v1467_v55, %v1499_v57  ;;  %v1512_v12 = vcombine.high %v1467_v55, %v1499_v57  ;;  %v1513_v13 = vcombine.low %v1474_v47, %v1506_v60  ;;  %v1514_v14 = vcombine.high %v1474_v47, %v1506_v60  ;;  %v2225_v47 = vld [vmem:[#allocation2 + $0x20] sm:$0xff]  ;;  %v2227_v57 = vld [vmem:[#allocation2 + $0x30] sm:$0xff] }
 0x38e   : > { %1796 = vst.msk [vmem:[#allocation2 + $0x40] sm:$0xff] %vm1787_vm2, %v1375_v63  ;;  %1798 = vst.msk [vmem:[#allocation2 + $0x50] sm:$0xff] %vm1787_vm2, %v1376_v3  ;;  %v1997_v18 = vcombine.low %v5514_v32, %v1947_v62  ;;  %v1998_v19 = vcombine.high %v5514_v32, %v1947_v62  ;;  %v1981_v58 = vcombine.low %v1938_v38, %v1944_v6 }
 0x38f   : > { %1800 = vst.msk [vmem:[#allocation2 + $0x60] sm:$0xff] %vm1787_vm2, %v1377_v4  ;;  %1802 = vst.msk [vmem:[#allocation2 + $0x70] sm:$0xff] %vm1787_vm2, %v1378_v5  ;;  %v1982_v56 = vcombine.high %v1938_v38, %v1944_v6  ;;  %v4459_v2 = vpack.c.bf16 %v2222_v20, %v2221_v7  ;;  %v4463_v8 = vpack.c.bf16 %v2224_v22, %v2223_v9  ;;  %v2226_v9 = vld [vmem:[#allocation2 + $0x28] sm:$0xff] }
 0x390   : > { %1797 = vst.msk [vmem:[#allocation2 + $0x48] sm:$0xff] %vm1787_vm2, %v1511_v11  ;;  %1799 = vst.msk [vmem:[#allocation2 + $0x58] sm:$0xff] %vm1787_vm2, %v1512_v12  ;;  %v2013_v23 = vcombine.low %v1957_v15, %v5497_v0  ;;  %v2014_v24 = vcombine.high %v1957_v15, %v5497_v0  ;;  %v2029_v26 = vcombine.low %v1964_v16, %v5500_v1  ;;  %v2228_v11 = vld [vmem:[#allocation2 + $0x38] sm:$0xff] }
 0x391   : > { %1801 = vst.msk [vmem:[#allocation2 + $0x68] sm:$0xff] %vm1787_vm2, %v1513_v13  ;;  %1803 = vst.msk [vmem:[#allocation2 + $0x78] sm:$0xff] %vm1787_vm2, %v1514_v14  ;;  %v2030_v27 = vcombine.high %v1964_v16, %v5500_v1  ;;  %v2005_v28 = vrot.slane %v1997_v18, %v5420_v10  ;;  %v2012_v29 = vrot.slane %v1998_v19, %v5420_v10  ;;  %4461 = vmatpush3.bf16.xpose.msk.msra.mxu0 %vm5548_vm3, %v4459_v2 }
 0x392   : > { %v1989_v31 = vrot.slane %v1981_v58, %v5420_v10  ;;  %v1996_v32 = vrot.slane %v1982_v56, %v5420_v10  ;;  %v2021_v33 = vrot.slane %v2013_v23, %v5424_v17  ;;  %v2028_v35 = vrot.slane %v2014_v24, %v5424_v17  ;;  %4465 = vmatpush3.bf16.xpose.msk.msra.mxu1 %vm5548_vm3, %v4463_v8 }
 0x393   : > { %v2037_v0 = vrot.slane %v2029_v26, %v5424_v17  ;;  %v2044_v36 = vrot.slane %v2030_v27, %v5424_v17  ;;  %4466 = vmatprep.subr.bf16.mxu0 %v4975_v25  ;;  %4470 = vmatprep.subr.bf16.mxu1 %v4975_v25  ;;  %v4467_v12 = vpack.c.bf16 %v2226_v9, %v2225_v47  ;;  %v2256_v47 = vld [vmem:[#allocation13 + $0x18] sm:$0xff] }
 0x394   : > { %v2045_v1 = vcombine.low %v1989_v31, %v2005_v28  ;;  %v2046_v37 = vcombine.high %v1989_v31, %v2005_v28  ;;  %v2061_v38 = vcombine.low %v1996_v32, %v2012_v29  ;;  %v2062_v39 = vcombine.high %v1996_v32, %v2012_v29 }
 0x395   : > { %v4178_v40 = vcombine.low %v2021_v33, %v2028_v35  ;;  %v4180_v41 = vcombine.high %v2021_v33, %v2028_v35  ;;  %v4182_v43 = vcombine.low %v2037_v0, %v2044_v36  ;;  %v4184_v44 = vcombine.high %v2037_v0, %v2044_v36  ;;  %v2229_v24 = vld [vmem:[#allocation2 + $0x40] sm:$0xff]  ;;  %v2231_v26 = vld [vmem:[#allocation2 + $0x50] sm:$0xff] }
 0x396   : > { %v2053_v49 = vrot.slane %v2045_v1, %v5424_v17  ;;  %v2060_v42 = vrot.slane %v2046_v37, %v5424_v17  ;;  %v2069_v50 = vrot.slane %v2061_v38, %v5424_v17  ;;  %v2076_v51 = vrot.slane %v2062_v39, %v5424_v17  ;;  %v2233_v37 = vld [vmem:[#allocation2 + $0x60] sm:$0xff]  ;;  %v2235_v38 = vld [vmem:[#allocation2 + $0x70] sm:$0xff] }
 0x397   : > { %v2093_v45 = vrot.slane %v4178_v40, %v5420_v10  ;;  %v2109_v46 = vrot.slane %v4180_v41, %v5420_v10  ;;  %v2125_v30 = vrot.slane %v4182_v43, %v5420_v10  ;;  %v2141_v48 = vrot.slane %v4184_v44, %v5420_v10  ;;  %v2230_v22 = vld [vmem:[#allocation2 + $0x48] sm:$0xff]  ;;  %v2232_v58 = vld [vmem:[#allocation2 + $0x58] sm:$0xff] }
 0x398   : > { %v4179_v60 = vcombine.low %v2053_v49, %v2060_v42  ;;  %v4181_v62 = vcombine.high %v2053_v49, %v2060_v42  ;;  %v4183_v63 = vcombine.low %v2069_v50, %v2076_v51  ;;  %v4185_v3 = vcombine.high %v2069_v50, %v2076_v51  ;;  %v2234_v32 = vld [vmem:[#allocation2 + $0x68] sm:$0xff]  ;;  %v2236_v33 = vld [vmem:[#allocation2 + $0x78] sm:$0xff] }
 0x399   : > { %v2149_v52 = vcombine.low %v2093_v45, %v2109_v46  ;;  %v2181_v53 = vcombine.low %v2125_v30, %v2141_v48  ;;  %v2150_v4 = vcombine.high %v2093_v45, %v2109_v46  ;;  %v2182_v5 = vcombine.high %v2125_v30, %v2141_v48  ;;  %v2254_v46 = vld [vmem:[#allocation13 + $0x8] sm:$0xff] }
 0x39a   : > { %v4471_v13 = vpack.c.bf16 %v2228_v11, %v2227_v57  ;;  %v2100_v14 = vrot.slane %v4179_v60, %v5420_v10  ;;  %v2116_v15 = vrot.slane %v4181_v62, %v5420_v10  ;;  %v2132_v16 = vrot.slane %v4183_v63, %v5420_v10 }
 0x39b   : > { %v2157_v54 = vrot.slane %v2149_v52, %v5424_v17  ;;  %v2189_v55 = vrot.slane %v2181_v53, %v5424_v17  ;;  %v2148_v18 = vrot.slane %v4185_v3, %v5420_v10  ;;  %v2164_v19 = vrot.slane %v2150_v4, %v5424_v17 }
 0x39c   : > { %v2196_v20 = vrot.slane %v2182_v5, %v5424_v17  ;;  %v2165_v56 = vcombine.low %v2100_v14, %v2116_v15  ;;  %v4475_v27 = vpack.c.bf16 %v2230_v22, %v2229_v24  ;;  %v4479_v28 = vpack.c.bf16 %v2232_v58, %v2231_v26  ;;  %v2257_v5 = vld [vmem:[#allocation13 + $0x20] sm:$0xff] }
 0x39d   : > { %v2213_v6 = vcombine.low %v2157_v54, %v2189_v55  ;;  %v2214_v7 = vcombine.high %v2157_v54, %v2189_v55  ;;  %v2197_v2 = vcombine.low %v2132_v16, %v2148_v18  ;;  %v2166_v35 = vcombine.high %v2100_v14, %v2116_v15  ;;  %v2255_v54 = vld [vmem:[#allocation13 + $0x10] sm:$0xff] }
 0x39e   : > { %v2215_v8 = vcombine.low %v2164_v19, %v2196_v20  ;;  %v2216_v23 = vcombine.high %v2164_v19, %v2196_v20  ;;  %v2173_v29 = vrot.slane %v2165_v56, %v5424_v17  ;;  %v2198_v0 = vcombine.high %v2132_v16, %v2148_v18  ;;  %v2259_v19 = vld [vmem:[#allocation13 + $0x30] sm:$0xff]  ;;  %v2260_v20 = vld [vmem:[#allocation13 + $0x38] sm:$0xff] }
 0x39f   : > { %4326 = vmatmul.mubr.msk.f32.vlgmr.msra.gmra.mrb[2].mxu0 %vm1787_vm2, %v2213_v6  ;;  %4333 = vmatmul.mubr.msk.f32.vlgmr.msra.gmra.mrb[2].mxu1 %vm1787_vm2, %v2214_v7  ;;  %v2205_v31 = vrot.slane %v2197_v2, %v5424_v17  ;;  %v4483_v39 = vpack.c.bf16 %v2234_v32, %v2233_v37  ;;  %v4487_v40 = vpack.c.bf16 %v2236_v33, %v2235_v38  ;;  %v2258_v6 = vld [vmem:[#allocation13 + $0x28] sm:$0xff] }
 0x3a0   : > { %4469 = vmatpush3.bf16.xpose.msk.msra.mxu0 %vm5548_vm3, %v4467_v12  ;;  %4473 = vmatpush3.bf16.xpose.msk.msra.mxu1 %vm5548_vm3, %v4471_v13  ;;  %v2180_v41 = vrot.slane %v2166_v35, %v5424_v17  ;;  %v2212_v43 = vrot.slane %v2198_v0, %v5424_v17 }
 0x3a1   : > { %4339 = vmatprep.mubr.msk.f32.mxu0 %vm4976_vm1, %v4977_v34  ;;  %4346 = vmatprep.mubr.msk.f32.mxu1 %vm4976_vm1, %v4977_v34  ;;  %v2217_v36 = vcombine.low %v2173_v29, %v2205_v31  ;;  %v2218_v1 = vcombine.high %v2173_v29, %v2205_v31  ;;  %v5679_v31 = vpop.permute.xlu0 %653 }
 0x3a2   : > { %4474 = vmatprep.subr.bf16.mxu0 %v4975_v25  ;;  %4478 = vmatprep.subr.bf16.mxu1 %v4975_v25  ;;  %v2219_v44 = vcombine.low %v2180_v41, %v2212_v43  ;;  %v2220_v45 = vcombine.high %v2180_v41, %v2212_v43 }
 0x3a7   : > { %4340 = vmatmul.mubr.msk.f32.vlgmr.msra.gmra.mrb[4].mxu0 %vm1787_vm2, %v2215_v8  ;;  %4347 = vmatmul.mubr.msk.f32.vlgmr.msra.gmra.mrb[4].mxu1 %vm1787_vm2, %v2216_v23 }
 0x3a8   : > { %4477 = vmatpush3.bf16.xpose.msk.msra.mxu0 %vm5548_vm3, %v4475_v27  ;;  %4481 = vmatpush3.bf16.xpose.msk.msra.mxu1 %vm5548_vm3, %v4479_v28  ;;  %v5677_v27 = vpop.permute.xlu1 %659 }
 0x3a9   : > { %4353 = vmatprep.mubr.msk.f32.mxu0 %vm4976_vm1, %v4977_v34  ;;  %4360 = vmatprep.mubr.msk.f32.mxu1 %vm4976_vm1, %v4977_v34 }
 0x3aa   : > { %4482 = vmatprep.subr.bf16.mxu0 %v4975_v25  ;;  %4486 = vmatprep.subr.bf16.mxu1 %v4975_v25 }
 0x3ac   : > { %v652_v28 = vpop.permute.xlu1 %651 }
 0x3af   : > { %4354 = vmatmul.mubr.msk.f32.vlgmr.msra.gmra.mrb[6].mxu0 %vm1787_vm2, %v2217_v36  ;;  %4361 = vmatmul.mubr.msk.f32.vlgmr.msra.gmra.mrb[6].mxu1 %vm1787_vm2, %v2218_v1 }
 0x3b0   : > { %4485 = vmatpush3.bf16.xpose.msk.msra.mxu0 %vm5548_vm3, %v4483_v39  ;;  %4489 = vmatpush3.bf16.xpose.msk.msra.mxu1 %vm5548_vm3, %v4487_v40  ;;  %v658_v29 = vpop.permute.xlu1 %657 }
 0x3b1   : > { %4367 = vmatprep.mubr.msk.f32.mxu0 %vm4976_vm1, %v4977_v34  ;;  %4374 = vmatprep.mubr.msk.f32.mxu1 %vm4976_vm1, %v4977_v34 }
 0x3b2   : > { %4490 = vmatprep.subr.bf16.mxu1 %v4975_v25  ;;  %4496 = vmatprep.subr.bf16.mxu0 %v4975_v25 }
 0x3b4   : > { %v664_v32 = vpop.permute.xlu1 %663 }
 0x3b7   : > { %4368 = vmatmul.mubr.msk.f32.vlgmr.msra.gmra.mrb[8].mxu0 %vm1787_vm2, %v2219_v44  ;;  %4375 = vmatmul.mubr.msk.f32.vlgmr.msra.gmra.mrb[8].mxu1 %vm1787_vm2, %v2220_v45 }
 0x3b8   : > { %4381 = vmatprep.mubr.msk.f32.mxu1 %vm4976_vm1, %v4977_v34  ;;  %4395 = vmatprep.mubr.msk.f32.mxu0 %vm4976_vm1, %v4977_v34 }
 0x472   : > { %v2337_v30 = vpop.f32.mrb[2].mxu0  ;;  %v2416_v48 = vpop.f32.mrb[2].mxu1 }
 0x473   : > { %v5636_v49 = vadd.f32 %v2337_v30, %v2253_v21  ;;  %v5638_v42 = vadd.f32 %v2416_v48, %v2254_v46  ;;  %v4327_v50 = vpop.f32.mrb[3].mxu0  ;;  %v4334_v51 = vpop.f32.mrb[3].mxu1 }
 0x475   : > { %v2898_v52 = vsel %vm2894_vm4, %v5638_v42, -inf  ;;  %v2895_v53 = vsel %vm2894_vm4, %v5636_v49, -inf }
 0x476   : > { %2899 = vmax.xlane.f32.xlu0 %v2898_v52  ;;  %2896 = vmax.xlane.f32.xlu1 %v2895_v53 }
 0x47a   : > { %v2495_v55 = vpop.f32.mrb[4].mxu0  ;;  %v2574_v57 = vpop.f32.mrb[4].mxu1 }
 0x47b   : > { %v5644_v60 = vadd.f32 %v2495_v55, %v2255_v54  ;;  %v4341_v62 = vpop.f32.mrb[5].mxu0  ;;  %v4348_v63 = vpop.f32.mrb[5].mxu1  ;;  %v2575_v3 = vadd.f32 %v2574_v57, %v2256_v47  ;;  %v835_v54 = vcombine.low %v652_v28, %v664_v32  ;;  %v836_v55 = vcombine.high %v652_v28, %v664_v32 }
 0x47d   : > { %v2901_v4 = vsel %vm2894_vm4, %v5644_v60, -inf  ;;  %v2904_v7 = vsel %vm2894_vm4, %v2575_v3, -inf }
 0x47e   : > { %2902 = vmax.xlane.f32.xlu0 %v2901_v4 }
 0x482   : > { %2905 = vmax.xlane.f32.xlu0 %v2904_v7  ;;  %v2653_v9 = vpop.f32.mrb[6].mxu0  ;;  %v2732_v11 = vpop.f32.mrb[6].mxu1  ;;  %v843_v7 = vrot.slane %v835_v54, %v5420_v10 }
 0x483   : > { %v5649_v12 = vadd.f32 %v2653_v9, %v2257_v5  ;;  %v5651_v13 = vadd.f32 %v2732_v11, %v2258_v6  ;;  %v4355_v14 = vpop.f32.mrb[7].mxu0  ;;  %v4362_v15 = vpop.f32.mrb[7].mxu1  ;;  %v850_v9 = vrot.slane %v836_v55, %v5420_v10 }
 0x485   : > { %v2910_v16 = vsel %vm2894_vm4, %v5651_v13, -inf  ;;  %v2907_v18 = vsel %vm2894_vm4, %v5649_v12, -inf }
 0x486   : > { %2911 = vmax.xlane.f32.xlu0 %v2910_v16  ;;  %2908 = vmax.xlane.f32.xlu1 %v2907_v18 }
 0x48a   : > { %v2811_v22 = vpop.f32.mrb[8].mxu0  ;;  %v2890_v58 = vpop.f32.mrb[8].mxu1 }
 0x48b   : > { %v5657_v56 = vadd.f32 %v2811_v22, %v2259_v19  ;;  %v5659_v2 = vadd.f32 %v2890_v58, %v2260_v20  ;;  %v4369_v8 = vpop.f32.mrb[9].mxu0  ;;  %v4376_v23 = vpop.f32.mrb[9].mxu1 }
 0x48d   : > { %v2916_v24 = vsel %vm2894_vm4, %v5659_v2, -inf  ;;  %v2913_v26 = vsel %vm2894_vm4, %v5657_v56, -inf }
 0x48e   : > { %2917 = vmax.xlane.f32.xlu0 %v2916_v24  ;;  %2914 = vmax.xlane.f32.xlu1 %v2913_v26 }
 0x49f   : > { %669 = vrot.lane.b32.xlu1 %v5390_v61, %s4990_s16 }
 0x4a3   : > { %677 = vrot.lane.b32.xlu1 %v5387_v59, %s4991_s18 }
 0x4a4   : > { %665 = vrot.lane.b32.xlu0 %v5387_v59, %s4987_s3  ;;  %s5997_s3 = sld [smem:[#allocation27_spill]] }
 0x4a7   : > { %681 = vrot.lane.b32.xlu1 %v5390_v61, %s4992_s15 }
 0x4a8   : > { %671 = vrot.lane.b32.xlu0 %v5387_v59, %s4990_s16  ;;  %s4229_s16 = sshll.u32 %s5996_s12, 7 }
 0x4ab   : > { %687 = vrot.lane.b32.xlu1 %v5390_v61, %s4993_s27 }
 0x4ac   : > { %675 = vrot.lane.b32.xlu0 %v5390_v61, %s4991_s18  ;;  %s469_s18 = scalar_lea.vmem [#allocation15], %s4136_s22  ;;  %s5002_s22 = smov [#allocation15]  }
 0x4b0   : > { %683 = vrot.lane.b32.xlu0 %v5387_v59, %s4992_s15  ;;  %s3979_s15 = sshll.u32 %s469_s18, 4  ;;  %s5900_s15 = int_to_ptr.vmem [resolvable:$true] %s3979_s15 }
 0x4b4   : > { %689 = vrot.lane.b32.xlu0 %v5387_v59, %s4993_s27 }
 0x4b8   : > { %695 = vrot.lane.b32.xlu0 %v5387_v59, %s4994_s9 }
 0x503   : > { %v2897_v33 = vpop.xlane.xlu1 %2896  ;;  %v2900_v35 = vpop.xlane.xlu0 %2899 }
 0x504   : > { %v2919_v0 = vsub.f32 %v5636_v49, %v2897_v33  ;;  %v2920_v36 = vsub.f32 %v5638_v42, %v2900_v35 }
 0x506   : > { %v2927_v1 = vmul.f32 1.442695, %v2919_v0  ;;  %v2929_v37 = vmul.f32 1.442695, %v2920_v36 }
 0x508   : > { %4663 = vpow2.f32 %v2927_v1 }
 0x509   : > { %4665 = vpow2.f32 %v2929_v37 }
 0x50b   : > { %v5683_v38 = vpop.xlane.xlu0 %2902 }
 0x50f   : > { %v2906_v59 = vpop.xlane.xlu0 %2905 }
 0x510   : > { %v2922_v39 = vsub.f32 %v2575_v3, %v2906_v59 }
 0x512   : > { %v5685_v40 = vpop.eup %4663  ;;  %v2933_v41 = vmul.f32 1.442695, %v2922_v39 }
 0x513   : > { %v5687_v43 = vpop.eup %4665  ;;  %v2909_v44 = vpop.xlane.xlu1 %2908  ;;  %v2943_v21 = vsel %vm2894_vm4, %v5685_v40, 0.0 }
 0x514   : > { %v2912_v45 = vpop.xlane.xlu0 %2911  ;;  %4667 = vpow2.f32 %v2933_v41  ;;  %v2923_v46 = vsub.f32 %v5649_v12, %v2909_v44  ;;  %2944 = vadd.xlane.f32.xlu1 %v2943_v21  ;;  %v2946_v48 = vsel %vm2894_vm4, %v5687_v43, 0.0 }
 0x515   : > { %v2924_v30 = vsub.f32 %v5651_v13, %v2912_v45  ;;  %2947 = vadd.xlane.f32.xlu0 %v2946_v48 }
 0x516   : > { %v2935_v49 = vmul.f32 1.442695, %v2923_v46 }
 0x517   : > { %v2937_v42 = vmul.f32 1.442695, %v2924_v30 }
 0x518   : > { %4669 = vpow2.f32 %v2935_v49 }
 0x519   : > { %4671 = vpow2.f32 %v2937_v42 }
 0x51b   : > { %v5695_v50 = vpop.xlane.xlu1 %2914  ;;  %v2918_v51 = vpop.xlane.xlu0 %2917 }
 0x51c   : > { %v2926_v52 = vsub.f32 %v5659_v2, %v2918_v51 }
 0x51e   : > { %v5698_v53 = vpop.eup %4667  ;;  %v2941_v4 = vmul.f32 1.442695, %v2926_v52 }
 0x51f   : > { %v670_v47 = vpop.permute.xlu1 %669  ;;  %v666_v57 = vpop.permute.xlu0 %665  ;;  %v2952_v62 = vsel %vm2894_vm4, %v5698_v53, 0.0 }
 0x520   : > { %v851_v63 = vcombine.low %v658_v29, %v670_v47  ;;  %v852_v3 = vcombine.high %v658_v29, %v670_v47  ;;  %2953 = vadd.xlane.f32.xlu0 %v2952_v62  ;;  %v1107_v5 = vcombine.low %v5679_v31, %v666_v57  ;;  %v1108_v13 = vcombine.high %v5679_v31, %v666_v57 }
 0x521   : > { %4673 = vpow2.f32 %v2941_v4 }
 0x522   : > { %v5703_v6 = vpop.eup %4669  ;;  %v859_v11 = vrot.slane %v851_v63, %v5420_v10  ;;  %v866_v12 = vrot.slane %v852_v3, %v5420_v10  ;;  %v1115_v58 = vrot.slane %v1107_v5, %v5420_v10  ;;  %v1122_v29 = vrot.slane %v1108_v13, %v5420_v10 }
 0x523   : > { %v672_v14 = vpop.permute.xlu0 %671  ;;  %v2955_v15 = vsel %vm2894_vm4, %v5703_v6, 0.0  ;;  %v5712_v16 = vpop.eup %4671 }
 0x524   : > { %v899_v18 = vcombine.low %v843_v7, %v859_v11  ;;  %v900_v19 = vcombine.high %v843_v7, %v859_v11  ;;  %v915_v20 = vcombine.low %v850_v9, %v866_v12  ;;  %v916_v22 = vcombine.high %v850_v9, %v866_v12  ;;  %2956 = vadd.xlane.f32.xlu0 %v2955_v15 }
 0x525   : > { %v1123_v2 = vcombine.low %v5677_v27, %v672_v14  ;;  %v1124_v8 = vcombine.high %v5677_v27, %v672_v14  ;;  %693 = vrot.lane.b32.xlu1 %v5390_v61, %s4994_s9  ;;  %v2958_v27 = vsel %vm2894_vm4, %v5712_v16, 0.0 }
 0x526   : > { %v907_v23 = vrot.slane %v899_v18, %v5424_v17  ;;  %v914_v24 = vrot.slane %v900_v19, %v5424_v17  ;;  %v923_v26 = vrot.slane %v915_v20, %v5424_v17  ;;  %v930_v28 = vrot.slane %v916_v22, %v5424_v17 }
 0x527   : > { %v1131_v31 = vrot.slane %v1123_v2, %v5420_v10  ;;  %v1138_v32 = vrot.slane %v1124_v8, %v5420_v10  ;;  %v5726_v33 = vpop.permute.xlu0 %675 }
 0x528   : > { %v4161_v61 = vcombine.low %v907_v23, %v914_v24  ;;  %v4163_v35 = vcombine.high %v907_v23, %v914_v24  ;;  %v4165_v0 = vcombine.low %v923_v26, %v930_v28  ;;  %v4167_v36 = vcombine.high %v923_v26, %v930_v28  ;;  %2959 = vadd.xlane.f32.xlu0 %v2958_v27  ;;  %v678_v28 = vpop.permute.xlu1 %677 }
 0x529   : > { %v1171_v1 = vcombine.low %v1115_v58, %v1131_v31  ;;  %v1172_v37 = vcombine.high %v1115_v58, %v1131_v31  ;;  %v1187_v59 = vcombine.low %v1122_v29, %v1138_v32  ;;  %v1188_v39 = vcombine.high %v1122_v29, %v1138_v32 }
 0x52a   : > { %v1523_v41 = vrot.slane %v4161_v61, %v5420_v10  ;;  %v1539_v44 = vrot.slane %v4163_v35, %v5420_v10  ;;  %v1555_v45 = vrot.slane %v4165_v0, %v5420_v10  ;;  %v1571_v21 = vrot.slane %v4167_v36, %v5420_v10 }
 0x52b   : > { %v1179_v46 = vrot.slane %v1171_v1, %v5424_v17  ;;  %v1186_v30 = vrot.slane %v1172_v37, %v5424_v17  ;;  %v1195_v48 = vrot.slane %v1187_v59, %v5424_v17  ;;  %v1202_v49 = vrot.slane %v1188_v39, %v5424_v17  ;;  %v684_v42 = vpop.permute.xlu0 %683  ;;  %v5742_v9 = vpop.eup %4673 }
 0x52c   : > { %v1579_v51 = vcombine.low %v1523_v41, %v1539_v44  ;;  %v1580_v52 = vcombine.high %v1523_v41, %v1539_v44  ;;  %v1611_v54 = vcombine.low %v1555_v45, %v1571_v21  ;;  %v1612_v55 = vcombine.high %v1555_v45, %v1571_v21 }
 0x52d   : > { %v4169_v47 = vcombine.low %v1179_v46, %v1186_v30  ;;  %v4171_v57 = vcombine.high %v1179_v46, %v1186_v30  ;;  %v4173_v62 = vcombine.low %v1195_v48, %v1202_v49  ;;  %v4175_v63 = vcombine.high %v1195_v48, %v1202_v49 }
 0x52e   : > { %v1587_v3 = vrot.slane %v1579_v51, %v5424_v17  ;;  %v1594_v4 = vrot.slane %v1580_v52, %v5424_v17  ;;  %v1619_v5 = vrot.slane %v1611_v54, %v5424_v17  ;;  %v1626_v7 = vrot.slane %v1612_v55, %v5424_v17 }
 0x52f   : > { %v1659_v11 = vrot.slane %v4169_v47, %v5420_v10  ;;  %v1675_v12 = vrot.slane %v4171_v57, %v5420_v10  ;;  %v1691_v13 = vrot.slane %v4173_v62, %v5420_v10  ;;  %v1707_v14 = vrot.slane %v4175_v63, %v5420_v10  ;;  %v690_v15 = vpop.permute.xlu0 %689 }
 0x530   : > { %v1643_v18 = vcombine.low %v1587_v3, %v1619_v5  ;;  %v1644_v19 = vcombine.high %v1587_v3, %v1619_v5  ;;  %v1645_v20 = vcombine.low %v1594_v4, %v1626_v7  ;;  %v1646_v22 = vcombine.high %v1594_v4, %v1626_v7 }
 0x531   : > { %v1715_v58 = vcombine.low %v1659_v11, %v1675_v12  ;;  %v1716_v2 = vcombine.high %v1659_v11, %v1675_v12  ;;  %v1747_v8 = vcombine.low %v1691_v13, %v1707_v14  ;;  %v1748_v23 = vcombine.high %v1691_v13, %v1707_v14 }
 0x532   : > { %v2921_v24 = vsub.f32 %v5644_v60, %v5683_v38  ;;  %1804 = vst.msk [vmem:[#allocation3] sm:$0xff] %vm1787_vm2, %v1643_v18  ;;  %1806 = vst.msk [vmem:[#allocation3 + $0x10] sm:$0xff] %vm1787_vm2, %v1644_v19  ;;  %v2964_v26 = vsel %vm2894_vm4, %v5742_v9, 0.0  ;;  %v1139_v27 = vcombine.low %v678_v28, %v690_v15  ;;  %v1140_v61 = vcombine.high %v678_v28, %v690_v15 }
 0x533   : > { %1808 = vst.msk [vmem:[#allocation3 + $0x20] sm:$0xff] %vm1787_vm2, %v1645_v20  ;;  %1810 = vst.msk [vmem:[#allocation3 + $0x30] sm:$0xff] %vm1787_vm2, %v1646_v22  ;;  %v1723_v29 = vrot.slane %v1715_v58, %v5424_v17  ;;  %v1730_v31 = vrot.slane %v1716_v2, %v5424_v17  ;;  %v1755_v32 = vrot.slane %v1747_v8, %v5424_v17  ;;  %2965 = vadd.xlane.f32.xlu0 %v2964_v26  ;;  %v696_v38 = vpop.permute.xlu0 %695 }
 0x534   : > { %v1762_v60 = vrot.slane %v1748_v23, %v5424_v17  ;;  %v1155_v37 = vcombine.low %v684_v42, %v696_v38  ;;  %v1156_v59 = vcombine.high %v684_v42, %v696_v38  ;;  %v2931_v39 = vmul.f32 1.442695, %v2921_v24 }
 0x535   : > { %v1779_v35 = vcombine.low %v1723_v29, %v1755_v32  ;;  %v1780_v0 = vcombine.high %v1723_v29, %v1755_v32  ;;  %v2925_v41 = vsub.f32 %v5657_v56, %v5695_v50  ;;  %v1147_v44 = vrot.slane %v1139_v27, %v5420_v10  ;;  %v682_v27 = vpop.permute.xlu1 %681 }
 0x536   : > { %v1781_v36 = vcombine.low %v1730_v31, %v1762_v60  ;;  %v1782_v1 = vcombine.high %v1730_v31, %v1762_v60  ;;  %v1154_v45 = vrot.slane %v1140_v61, %v5420_v10  ;;  %v1163_v21 = vrot.slane %v1155_v37, %v5420_v10 }
 0x537   : > { %1805 = vst.msk [vmem:[#allocation3 + $0x8] sm:$0xff] %vm1787_vm2, %v1779_v35  ;;  %1807 = vst.msk [vmem:[#allocation3 + $0x18] sm:$0xff] %vm1787_vm2, %v1780_v0  ;;  %v1170_v46 = vrot.slane %v1156_v59, %v5420_v10  ;;  %4675 = vpow2.f32 %v2931_v39  ;;  %v2939_v50 = vmul.f32 1.442695, %v2925_v41 }
 0x538   : > { %1809 = vst.msk [vmem:[#allocation3 + $0x28] sm:$0xff] %vm1787_vm2, %v1781_v36  ;;  %1811 = vst.msk [vmem:[#allocation3 + $0x38] sm:$0xff] %vm1787_vm2, %v1782_v1  ;;  %v1203_v30 = vcombine.low %v1147_v44, %v1163_v21  ;;  %v1204_v48 = vcombine.high %v1147_v44, %v1163_v21 }
 0x539   : > { %v1219_v49 = vcombine.low %v1154_v45, %v1170_v46  ;;  %v1220_v56 = vcombine.high %v1154_v45, %v1170_v46  ;;  %v2237_v55 = vld [vmem:[#allocation3] sm:$0xff]  ;;  %4677 = vpow2.f32 %v2939_v50  ;;  %v688_v61 = vpop.permute.xlu1 %687 }
 0x53a   : > { %v1211_v42 = vrot.slane %v1203_v30, %v5424_v17  ;;  %v1218_v51 = vrot.slane %v1204_v48, %v5424_v17  ;;  %v2241_v4 = vld [vmem:[#allocation3 + $0x20] sm:$0xff]  ;;  %v867_v36 = vcombine.low %v5726_v33, %v688_v61  ;;  %v868_v1 = vcombine.high %v5726_v33, %v688_v61 }
 0x53b   : > { %v1227_v52 = vrot.slane %v1219_v49, %v5424_v17  ;;  %v1234_v54 = vrot.slane %v1220_v56, %v5424_v17 }
 0x53c   : > { %v4170_v47 = vcombine.low %v1211_v42, %v1218_v51  ;;  %v4172_v57 = vcombine.high %v1211_v42, %v1218_v51  ;;  %v875_v41 = vrot.slane %v867_v36, %v5420_v10  ;;  %v882_v44 = vrot.slane %v868_v1, %v5420_v10 }
 0x53d   : > { %v4174_v62 = vcombine.low %v1227_v52, %v1234_v54  ;;  %v4176_v63 = vcombine.high %v1227_v52, %v1234_v54 }
 0x53e   : > { %v2238_v3 = vld [vmem:[#allocation3 + $0x8] sm:$0xff]  ;;  %v1666_v12 = vrot.slane %v4170_v47, %v5420_v10  ;;  %v1682_v13 = vrot.slane %v4172_v57, %v5420_v10  ;;  %v2240_v56 = vld [vmem:[#allocation3 + $0x18] sm:$0xff]  ;;  %v2239_v47 = vld [vmem:[#allocation3 + $0x10] sm:$0xff] }
 0x53f   : > { %v2242_v5 = vld [vmem:[#allocation3 + $0x28] sm:$0xff]  ;;  %v4491_v7 = vpack.c.bf16 %v2238_v3, %v2237_v55  ;;  %v1698_v14 = vrot.slane %v4174_v62, %v5420_v10  ;;  %v1714_v15 = vrot.slane %v4176_v63, %v5420_v10 }
 0x540   : > { %v4497_v11 = vpack.c.bf16 %v2242_v5, %v2241_v4  ;;  %v1731_v18 = vcombine.low %v1666_v12, %v1682_v13  ;;  %v1732_v19 = vcombine.high %v1666_v12, %v1682_v13  ;;  %v4494_v4 = vpack.c.bf16 %v2240_v56, %v2239_v47 }
 0x541   : > { %4492 = vmatpush3.bf16.msra.mxu1 %v4491_v7  ;;  %v1763_v20 = vcombine.low %v1698_v14, %v1714_v15  ;;  %v1764_v22 = vcombine.high %v1698_v14, %v1714_v15  ;;  %v5784_v24 = vpop.eup %4675  ;;  %v2244_v7 = vld [vmem:[#allocation3 + $0x38] sm:$0xff] }
 0x542   : > { %4498 = vmatpush3.bf16.msra.mxu0 %v4497_v11  ;;  %4493 = vmatprep.subr.bf16.mxu1 %v4975_v25  ;;  %v1739_v58 = vrot.slane %v1731_v18, %v5424_v17  ;;  %v1746_v2 = vrot.slane %v1732_v19, %v5424_v17  ;;  %v2949_v32 = vsel %vm2894_vm4, %v5784_v24, 0.0  ;;  %v2243_v18 = vld [vmem:[#allocation3 + $0x30] sm:$0xff] }
 0x543   : > { %4502 = vmatprep.subr.bf16.mxu0 %v4975_v25  ;;  %v1771_v8 = vrot.slane %v1763_v20, %v5424_v17  ;;  %v1778_v23 = vrot.slane %v1764_v22, %v5424_v17  ;;  %v5792_v60 = vpop.eup %4677  ;;  %v4500_v22 = vpack.c.bf16 %v2244_v7, %v2243_v18 }
 0x544   : > { %v2961_v38 = vsel %vm2894_vm4, %v5792_v60, 0.0 }
 0x545   : > { %v1783_v26 = vcombine.low %v1739_v58, %v1771_v8  ;;  %v1784_v28 = vcombine.high %v1739_v58, %v1771_v8  ;;  %v1785_v29 = vcombine.low %v1746_v2, %v1778_v23  ;;  %v1786_v31 = vcombine.high %v1746_v2, %v1778_v23 }
 0x547   : > { %1813 = vst.msk [vmem:[#allocation3 + $0x48] sm:$0xff] %vm1787_vm2, %v1783_v26  ;;  %1815 = vst.msk [vmem:[#allocation3 + $0x58] sm:$0xff] %vm1787_vm2, %v1784_v28 }
 0x548   : > { %1817 = vst.msk [vmem:[#allocation3 + $0x68] sm:$0xff] %vm1787_vm2, %v1785_v29  ;;  %1819 = vst.msk [vmem:[#allocation3 + $0x78] sm:$0xff] %vm1787_vm2, %v1786_v31 }
 0x549   : > { %2950 = vadd.xlane.f32.xlu1 %v2949_v32 }
 0x54d   : > { %2962 = vadd.xlane.f32.xlu1 %v2961_v38 }
 0x54e   : > { %v2248_v1 = vld [vmem:[#allocation3 + $0x58] sm:$0xff] }
 0x5a1   : > { %v2945_v35 = vpop.xlane.xlu1 %2944 }
 0x5a2   : > { %4679 = vrcp.f32 %v2945_v35  ;;  %v2948_v0 = vpop.xlane.xlu0 %2947 }
 0x5a3   : > { %4681 = vrcp.f32 %v2948_v0 }
 0x5a5   : > { %v694_v37 = vpop.permute.xlu1 %693 }
 0x5a6   : > { %v883_v59 = vcombine.low %v682_v27, %v694_v37  ;;  %v884_v39 = vcombine.high %v682_v27, %v694_v37 }
 0x5a8   : > { %v891_v45 = vrot.slane %v883_v59, %v5420_v10  ;;  %v898_v21 = vrot.slane %v884_v39, %v5420_v10 }
 0x5aa   : > { %v931_v46 = vcombine.low %v875_v41, %v891_v45  ;;  %v932_v30 = vcombine.high %v875_v41, %v891_v45  ;;  %v947_v48 = vcombine.low %v882_v44, %v898_v21  ;;  %v948_v49 = vcombine.high %v882_v44, %v898_v21  ;;  %v2252_v41 = vld [vmem:[#allocation3 + $0x78] sm:$0xff] }
 0x5ac   : > { %v4680_v50 = vpop.eup %4679  ;;  %v939_v33 = vrot.slane %v931_v46, %v5424_v17  ;;  %v946_v42 = vrot.slane %v932_v30, %v5424_v17  ;;  %v955_v51 = vrot.slane %v947_v48, %v5424_v17  ;;  %v962_v52 = vrot.slane %v948_v49, %v5424_v17  ;;  %v2246_v49 = vld [vmem:[#allocation3 + $0x48] sm:$0xff] }
 0x5ad   : > { %v2975_v54 = vmul.f32 %v4680_v50, %v5685_v40  ;;  %v2954_v55 = vpop.xlane.xlu0 %2953  ;;  %v4682_v57 = vpop.eup %4681 }
 0x5ae   : > { %v4162_v62 = vcombine.low %v939_v33, %v946_v42  ;;  %v4164_v63 = vcombine.high %v939_v33, %v946_v42  ;;  %v4166_v3 = vcombine.low %v955_v51, %v962_v52  ;;  %v4168_v5 = vcombine.high %v955_v51, %v962_v52  ;;  %v2250_v42 = vld [vmem:[#allocation3 + $0x68] sm:$0xff] }
 0x5af   : > { %4683 = vrcp.f32 %v2954_v55  ;;  %4382 = vmatmul.mubr.msk.f32.vlgmr.msra.gmra.mrb[10].mxu1 %vm2894_vm4, %v2975_v54  ;;  %v2976_v40 = vmul.f32 %v4682_v57, %v5687_v43 }
 0x5b0   : > { %v1530_v11 = vrot.slane %v4162_v62, %v5420_v10  ;;  %v1546_v12 = vrot.slane %v4164_v63, %v5420_v10  ;;  %v1562_v13 = vrot.slane %v4166_v3, %v5420_v10  ;;  %4495 = vmatpush3.bf16.msra.mxu1 %v4494_v4  ;;  %4388 = vmatprep.mubr.msk.f32.mxu1 %vm4976_vm1, %v4977_v34 }
 0x5b1   : > { %v1578_v14 = vrot.slane %v4168_v5, %v5420_v10  ;;  %v2957_v15 = vpop.xlane.xlu0 %2956  ;;  %4499 = vmatprep.subr.bf16.mxu1 %v4975_v25 }
 0x5b2   : > { %v1595_v19 = vcombine.low %v1530_v11, %v1546_v12  ;;  %v1596_v20 = vcombine.high %v1530_v11, %v1546_v12 }
 0x5b3   : > { %v1627_v58 = vcombine.low %v1562_v13, %v1578_v14  ;;  %v1628_v2 = vcombine.high %v1562_v13, %v1578_v14  ;;  %4389 = vmatmul.mubr.msk.f32.vlgmr.msra.gmra.mrb[12].mxu1 %vm2894_vm4, %v2976_v40 }
 0x5b4   : > { %v1603_v8 = vrot.slane %v1595_v19, %v5424_v17  ;;  %v1610_v23 = vrot.slane %v1596_v20, %v5424_v17  ;;  %4501 = vmatpush3.bf16.msra.mxu1 %v4500_v22  ;;  %4402 = vmatprep.mubr.msk.f32.mxu1 %vm4976_vm1, %v4977_v34 }
 0x5b5   : > { %v1635_v43 = vrot.slane %v1627_v58, %v5424_v17  ;;  %v1642_v26 = vrot.slane %v1628_v2, %v5424_v17  ;;  %v2960_v28 = vpop.xlane.xlu0 %2959  ;;  %4505 = vmatprep.subr.bf16.mxu1 %v4975_v25 }
 0x5b6   : > { %4685 = vrcp.f32 %v2960_v28 }
 0x5b7   : > { %v1647_v29 = vcombine.low %v1603_v8, %v1635_v43  ;;  %v1648_v31 = vcombine.high %v1603_v8, %v1635_v43  ;;  %v1649_v32 = vcombine.low %v1610_v23, %v1642_v26  ;;  %v1650_v38 = vcombine.high %v1610_v23, %v1642_v26 }
 0x5b9   : > { %v4684_v27 = vpop.eup %4683  ;;  %1812 = vst.msk [vmem:[#allocation3 + $0x40] sm:$0xff] %vm1787_vm2, %v1647_v29  ;;  %1814 = vst.msk [vmem:[#allocation3 + $0x50] sm:$0xff] %vm1787_vm2, %v1648_v31 }
 0x5ba   : > { %1816 = vst.msk [vmem:[#allocation3 + $0x60] sm:$0xff] %vm1787_vm2, %v1649_v32  ;;  %1818 = vst.msk [vmem:[#allocation3 + $0x70] sm:$0xff] %vm1787_vm2, %v1650_v38  ;;  %v2978_v61 = vmul.f32 %v4684_v27, %v5698_v53 }
 0x5bc   : > { %4403 = vmatmul.mubr.msk.f32.vlgmr.msra.gmra.mrb[14].mxu1 %vm2894_vm4, %v2978_v61 }
 0x5bd   : > { %4416 = vmatprep.mubr.msk.f32.mxu1 %vm4976_vm1, %v4977_v34 }
 0x5c0   : > { %v4686_v35 = vpop.eup %4685  ;;  %v2966_v0 = vpop.xlane.xlu0 %2965  ;;  %v2247_v36 = vld [vmem:[#allocation3 + $0x50] sm:$0xff] }
 0x5c1   : > { %4687 = vrcp.f32 %v2966_v0  ;;  %v4506_v37 = vpack.c.bf16 %v2248_v1, %v2247_v36  ;;  %v2251_v59 = vld [vmem:[#allocation3 + $0x70] sm:$0xff]  ;;  %v2980_v39 = vmul.f32 %v4686_v35, %v5712_v16  ;;  %v2245_v16 = vld [vmem:[#allocation3 + $0x40] sm:$0xff] }
 0x5c2   : > { %v4512_v44 = vpack.c.bf16 %v2252_v41, %v2251_v59  ;;  %v4503_v50 = vpack.c.bf16 %v2246_v49, %v2245_v16  ;;  %v2249_v33 = vld [vmem:[#allocation3 + $0x60] sm:$0xff] }
 0x5c3   : > { %4507 = vmatpush3.bf16.msra.mxu1 %v4506_v37  ;;  %v4509_v52 = vpack.c.bf16 %v2250_v42, %v2249_v33 }
 0x5c4   : > { %4511 = vmatprep.subr.bf16.mxu1 %v4975_v25 }
 0x5c6   : > { %4417 = vmatmul.mubr.msk.f32.vlgmr.msra.gmra.mrb[16].mxu1 %vm2894_vm4, %v2980_v39 }
 0x5c7   : > { %4513 = vmatpush3.bf16.msra.mxu1 %v4512_v44  ;;  %4430 = vmatprep.mubr.msk.f32.mxu1 %vm4976_vm1, %v4977_v34 }
 0x5cb   : > { %v4688_v53 = vpop.eup %4687 }
 0x5cc   : > { %v2982_v45 = vmul.f32 %v4688_v53, %v5742_v9 }
 0x5ce   : > { %4431 = vmatmul.mubr.msk.f32.vlgmr.msra.gmra.mrb[18].mxu1 %vm2894_vm4, %v2982_v45 }
 0x5d6   : > { %v2951_v21 = vpop.xlane.xlu1 %2950 }
 0x5d7   : > { %4689 = vrcp.f32 %v2951_v21 }
 0x5d8   : > { %4691 = vrcp.f32 %v2957_v15 }
 0x5da   : > { %v2963_v46 = vpop.xlane.xlu1 %2962 }
 0x5db   : > { %4693 = vrcp.f32 %v2963_v46 }
 0x5e1   : > { %v4690_v30 = vpop.eup %4689 }
 0x5e2   : > { %v2977_v48 = vmul.f32 %v4690_v30, %v5784_v24  ;;  %v4692_v56 = vpop.eup %4691 }
 0x5e3   : > { %v2979_v9 = vmul.f32 %v4692_v56, %v5703_v6 }
 0x5e4   : > { %4396 = vmatmul.mubr.msk.f32.vlgmr.msra.gmra.mrb[10].mxu0 %vm2894_vm4, %v2977_v48 }
 0x5e5   : > { %4504 = vmatpush3.bf16.msra.mxu0 %v4503_v50  ;;  %4409 = vmatprep.mubr.msk.f32.mxu0 %vm4976_vm1, %v4977_v34  ;;  %v4694_v51 = vpop.eup %4693 }
 0x5e6   : > { %4508 = vmatprep.subr.bf16.mxu0 %v4975_v25  ;;  %v2981_v24 = vmul.f32 %v4694_v51, %v5792_v60 }
 0x5e8   : > { %4410 = vmatmul.mubr.msk.f32.vlgmr.msra.gmra.mrb[12].mxu0 %vm2894_vm4, %v2979_v9 }
 0x5e9   : > { %4510 = vmatpush3.bf16.msra.mxu0 %v4509_v52  ;;  %4423 = vmatprep.mubr.msk.f32.mxu0 %vm4976_vm1, %v4977_v34 }
 0x5ea   : > { %4514 = vmatprep.subr.bf16.mxu0 %v4975_v25 }
 0x5ec   : > { %4424 = vmatmul.mubr.msk.f32.vlgmr.msra.gmra.mrb[14].mxu0 %vm2894_vm4, %v2981_v24 }
 0x5ed   : > { %4441 = vmatprep.mubr.msk.f32.mxu0 %vm4976_vm1, %v4977_v34 }
 0x682   : > { %v3052_v6 = vpop.f32.mrb[10].mxu1 }
 0x683   : > { %v4383_v54 = vpop.f32.mrb[11].mxu1 }
 0x686   : > { %v3125_v55 = vpop.f32.mrb[12].mxu1 }
 0x687   : > { %v4390_v47 = vpop.f32.mrb[13].mxu1 }
 0x688   : > { %v3879_v47 = vld [vmem:[#allocation12] sm:$0xff] }
 0x68f   : > { %v3271_v57 = vpop.f32.mrb[14].mxu1 }
 0x690   : > { %v3583_v62 = vcombine.low %v3125_v55, %v3271_v57  ;;  %v3584_v63 = vcombine.high %v3125_v55, %v3271_v57  ;;  %v4404_v3 = vpop.f32.mrb[15].mxu1  ;;  %v3880_v57 = vld [vmem:[#allocation12 + $0x8] sm:$0xff] }
 0x692   : > { %v3591_v34 = vrot.slane %v3583_v62, %v5420_v10  ;;  %v3598_v18 = vrot.slane %v3584_v63, %v5420_v10 }
 0x699   : > { %v3417_v4 = vpop.f32.mrb[16].mxu1 }
 0x69a   : > { %v4418_v5 = vpop.f32.mrb[17].mxu1 }
 0x6a1   : > { %v3563_v7 = vpop.f32.mrb[18].mxu1 }
 0x6a2   : > { %v3615_v11 = vcombine.low %v3417_v4, %v3563_v7  ;;  %v3616_v60 = vcombine.high %v3417_v4, %v3563_v7  ;;  %v4432_v12 = vpop.f32.mrb[19].mxu1 }
 0x6a3   : > { %v4515_v12 = vpack.c.bf16 %v3880_v57, %v3879_v47 }
 0x6a4   : > { %v3623_v44 = vrot.slane %v3615_v11, %v5420_v10  ;;  %v3630_v53 = vrot.slane %v3616_v60, %v5420_v10 }
 0x6a5   : > { %4516 = vmatpush3.bf16.msra.mxu0 %v4515_v12 }
 0x6a6   : > { %4517 = vmatprep.subr.bf16.mxu0 %v4975_v25 }
 0x6b7   : > { %v3198_v13 = vpop.f32.mrb[10].mxu0 }
 0x6b8   : > { %v3567_v40 = vcombine.low %v3052_v6, %v3198_v13  ;;  %v3568_v14 = vcombine.high %v3052_v6, %v3198_v13  ;;  %v4397_v15 = vpop.f32.mrb[11].mxu0  ;;  %v3881_v13 = vld [vmem:[#allocation12 + $0x10] sm:$0xff] }
 0x6ba   : > { %v3575_v19 = vrot.slane %v3567_v40, %v5420_v10  ;;  %v3582_v20 = vrot.slane %v3568_v14, %v5420_v10  ;;  %v3882_v40 = vld [vmem:[#allocation12 + $0x18] sm:$0xff] }
 0x6bb   : > { %v3344_v22 = vpop.f32.mrb[12].mxu0 }
 0x6bc   : > { %v3631_v58 = vcombine.low %v3575_v19, %v3591_v34  ;;  %v3632_v2 = vcombine.high %v3575_v19, %v3591_v34  ;;  %v3647_v8 = vcombine.low %v3582_v20, %v3598_v18  ;;  %v3648_v23 = vcombine.high %v3582_v20, %v3598_v18  ;;  %v4411_v43 = vpop.f32.mrb[13].mxu0 }
 0x6bd   : > { %v4518_v19 = vpack.c.bf16 %v3882_v40, %v3881_v13 }
 0x6be   : > { %v3639_v26 = vrot.slane %v3631_v58, %v5424_v17  ;;  %v3646_v28 = vrot.slane %v3632_v2, %v5424_v17  ;;  %v3655_v29 = vrot.slane %v3647_v8, %v5424_v17  ;;  %v3662_v31 = vrot.slane %v3648_v23, %v5424_v17 }
 0x6bf   : > { %v3490_v32 = vpop.f32.mrb[14].mxu0  ;;  %4519 = vmatpush3.bf16.msra.mxu0 %v4518_v19 }
 0x6c0   : > { %v4218_v38 = vcombine.low %v3639_v26, %v3646_v28  ;;  %v4220_v27 = vcombine.high %v3639_v26, %v3646_v28  ;;  %v4222_v61 = vcombine.low %v3655_v29, %v3662_v31  ;;  %v4224_v35 = vcombine.high %v3655_v29, %v3662_v31  ;;  %v4425_v0 = vpop.f32.mrb[15].mxu0 }
 0x6c1   : > { %v3599_v36 = vcombine.low %v3344_v22, %v3490_v32  ;;  %v3600_v1 = vcombine.high %v3344_v22, %v3490_v32 }
 0x6c2   : > { %v3711_v37 = vrot.slane %v4218_v38, %v5420_v10  ;;  %v3727_v59 = vrot.slane %v4220_v27, %v5420_v10  ;;  %v3743_v39 = vrot.slane %v4222_v61, %v5420_v10  ;;  %v3759_v41 = vrot.slane %v4224_v35, %v5420_v10 }
 0x6c3   : > { %v3607_v45 = vrot.slane %v3599_v36, %v5420_v10  ;;  %v3614_v21 = vrot.slane %v3600_v1, %v5420_v10 }
 0x6c4   : > { %v3768_v46 = vcombine.high %v3711_v37, %v3727_v59  ;;  %v3800_v16 = vcombine.high %v3743_v39, %v3759_v41  ;;  %v3767_v30 = vcombine.low %v3711_v37, %v3727_v59  ;;  %v3799_v48 = vcombine.low %v3743_v39, %v3759_v41 }
 0x6c5   : > { %v3663_v49 = vcombine.low %v3607_v45, %v3623_v44  ;;  %v3664_v56 = vcombine.high %v3607_v45, %v3623_v44  ;;  %v3679_v50 = vcombine.low %v3614_v21, %v3630_v53  ;;  %v3680_v33 = vcombine.high %v3614_v21, %v3630_v53  ;;  %v4226_v44 = vld [vmem:[%s5997_s3] ss:$0 sm:$0xff] }
 0x6c6   : > { %v3782_v9 = vrot.slane %v3768_v46, %v5424_v17  ;;  %v3814_v42 = vrot.slane %v3800_v16, %v5424_v17  ;;  %v3775_v51 = vrot.slane %v3767_v30, %v5424_v17  ;;  %v3807_v52 = vrot.slane %v3799_v48, %v5424_v17 }
 0x6c7   : > { %v3671_v24 = vrot.slane %v3663_v49, %v5424_v17  ;;  %v3678_v6 = vrot.slane %v3664_v56, %v5424_v17  ;;  %v3687_v54 = vrot.slane %v3679_v50, %v5424_v17  ;;  %v3694_v55 = vrot.slane %v3680_v33, %v5424_v17 }
 0x6c8   : > { %v3833_v62 = vcombine.low %v3782_v9, %v3814_v42  ;;  %v3832_v63 = vcombine.high %v3775_v51, %v3807_v52  ;;  %v3834_v3 = vcombine.high %v3782_v9, %v3814_v42  ;;  %v3831_v4 = vcombine.low %v3775_v51, %v3807_v52 }
 0x6c9   : > { %v4219_v5 = vcombine.low %v3671_v24, %v3678_v6  ;;  %v4221_v7 = vcombine.high %v3671_v24, %v3678_v6  ;;  %v4223_v11 = vcombine.low %v3687_v54, %v3694_v55  ;;  %v4225_v60 = vcombine.high %v3687_v54, %v3694_v55 }
 0x6ca   : > { %3844 = vrot.lane.b32.xlu0 %v3833_v62, %s4995_s23  ;;  %3840 = vrot.lane.b32.xlu1 %v3832_v63, %s4996_s21  ;;  %s5998_s23 = sld [smem:[#allocation28_spill]] }
 0x6cb   : > { %v3718_v14 = vrot.slane %v4219_v5, %v5420_v10  ;;  %v3734_v15 = vrot.slane %v4221_v7, %v5420_v10  ;;  %v3750_v34 = vrot.slane %v4223_v11, %v5420_v10  ;;  %v3766_v18 = vrot.slane %v4225_v60, %v5420_v10 }
 0x6cd   : > { %v3784_v20 = vcombine.high %v3718_v14, %v3734_v15  ;;  %v3816_v22 = vcombine.high %v3750_v34, %v3766_v18  ;;  %v3783_v58 = vcombine.low %v3718_v14, %v3734_v15  ;;  %v3815_v2 = vcombine.low %v3750_v34, %v3766_v18 }
 0x6ce   : > { %3848 = vrot.lane.b32.xlu1 %v3834_v3, %s4997_s19  ;;  %s3965_s19 = scalar_lea.sflag [#allocation6], %s5332_s2 }
 0x6cf   : > { %v3798_v8 = vrot.slane %v3784_v20, %v5424_v17  ;;  %v3830_v23 = vrot.slane %v3816_v22, %v5424_v17  ;;  %v3791_v43 = vrot.slane %v3783_v58, %v5424_v17  ;;  %v3823_v26 = vrot.slane %v3815_v2, %v5424_v17 }
 0x6d0   : > { %s5898_s21 = scalar_lea.hbm %s5998_s23, %s4229_s16 }
 0x6d1   : > { %v3837_v10 = vcombine.low %v3798_v8, %v3830_v23  ;;  %v3835_v28 = vcombine.low %v3791_v43, %v3823_v26  ;;  %v3836_v29 = vcombine.high %v3791_v43, %v3823_v26  ;;  %v3838_v31 = vcombine.high %v3798_v8, %v3830_v23 }
 0x6d3   : > { %3860 = vrot.lane.b32.xlu0 %v3837_v10, %s4998_s26  ;;  %3852 = vrot.lane.b32.xlu1 %v3835_v28, %s4999_s25  ;;  %s4867_s26 = scalar_lea.vmem %s5900_s15, 128  ;;  %s4871_s25 = sshll.u32 %s5002_s22, 4  ;;  %s4872_s25 = int_to_ptr.vmem [resolvable:$false] %s4871_s25 }
 0x6d4   : > { %p4868_p2 = scmp.ne.s32.totalorder %s5900_s15, %s4867_s26  ;;  %p4874_p0 = scmp.lt.s32.totalorder %s5900_s15, %s4872_s25 }
 0x6d6   : > { %p4869_p4 = pnand %p4868_p2, %p5999_p13 }
 0x6d7   : > { %3856 = vrot.lane.b32.xlu1 %v3836_v29, %s5000_s4  ;;  %s4873_s4 = scalar_lea.vmem %s4872_s25, 256 }
 0x6d8   : > { %p4870_p9 = pneg %p4869_p4  ;;  %p4875_p7 = scmp.lt.s32.totalorder %s4873_s4, %s4867_s26 }
 0x6da   : > { %p4876_p5 = por %p4875_p7, %p4874_p0 }
 0x6db   : > { %3864 = vrot.lane.b32.xlu1 %v3838_v31, %s5001_s5 }
 0x6dc   : > { %p4877_p1 = pnand %p4876_p5, %p4870_p9 }
 0x73c   : > { %v3841_v25 = vpop.permute.xlu1 %3840  ;;  %v3845_v27 = vpop.permute.xlu0 %3844 }
 0x73d   : > { %v3867_v38 = vsel %vm1787_vm2, %v3831_v4, %v3841_v25 }
 0x73e   : > { %v3869_v61 = vsel %vm3868_vm5, %v3867_v38, %v3845_v27 }
 0x740   : > { %v3849_v32 = vpop.permute.xlu1 %3848 }
 0x741   : > { %v3871_v35 = vsel %vm3870_vm6, %v3869_v61, %v3849_v32 }
 0x745   : > { %v3853_v17 = vpop.permute.xlu1 %3852  ;;  %v3861_v37 = vpop.permute.xlu0 %3860 }
 0x746   : > { %v3872_v0 = vsel %vm2894_vm4, %v3871_v35, %v3853_v17 }
 0x749   : > { %v3857_v36 = vpop.permute.xlu1 %3856 }
 0x74a   : > { %v3874_v1 = vsel %vm3873_vm7, %v3872_v0, %v3857_v36 }
 0x74b   : > { %v3876_v39 = vsel %vm3875_vm8, %v3874_v1, %v3861_v37 }
 0x74d   : > { %v3865_v59 = vpop.permute.xlu1 %3864 }
 0x74e   : > { %v3878_v41 = vsel %vm3877_vm9, %v3876_v39, %v3865_v59 }
 0x74f   : > { %4442 = vmatmul.mubr.msk.f32.vlgmr.msra.gmra.mrb[16].mxu0 %vm478_vm0, %v3878_v41 }
 0x822   : > { %v3959_v53 = vpop.f32.mrb[16].mxu0 }
 0x823   : > { %v3960_v45 = vadd.f32 %v4226_v44, %v3959_v53  ;;  %v4443_v21 = vpop.f32.mrb[17].mxu0 }
 0x825   : > { %3963 = vst.msk [vmem:[%s469_s18] sm:$0xff] %vm478_vm0, %v3960_v45 }
 0x826   : > { %4880 = shalt.err (!%p4877_p1)
}
 0x827   : > { %s4881_s2 = scalar_lea.hbm %s5898_s21, 128  ;;  %s4885_s24 = scalar_lea.hbm %s5998_s23, 256 }
 0x828   : > { %p4882_p10 = scmp.ne.s32.totalorder %s5898_s21, %s4881_s2  ;;  %p4886_p3 = scmp.lt.u32.totalorder %s5898_s21, %s5998_s23 }
 0x829   : > { %p4887_p11 = scmp.lt.u32.totalorder %s4885_s24, %s4881_s2  ;;  %p4889_p2 = scmp.lt.u32.totalorder %s4881_s2, %s5898_s21 }
 0x82a   : > { %p4883_p12 = pnand %p4882_p10, %p5999_p13 }
 0x82b   : > { %p4888_p6 = por %p4887_p11, %p4886_p3 }
 0x82c   : > { %p4884_p8 = pneg %p4883_p12 }
 0x82d   : > { %p4890_p4 = por %p4889_p2, %p4888_p6 }
 0x82f   : > { %p4891_p9 = pnand %p4890_p4, %p4884_p8 }
 0x831   : > { %4894 = shalt.err (!%p4891_p9)
}
 0x832   : > { %4540 = dma.vmem_to_hbm [thread:$0]  (%p5999_p13), %s5900_s15, 128, %s5898_s21, %s3965_s19  }
 0x833 PF: > { %s3991_s16 = sand.u32 1, %s4945_s30   ;;  %p6000_p0 = scmp.ne.s32.totalorder %s5981_s20, 0 }
 0x834   : > { %p6001_p7 = scmp.ge.s32.totalorder %s4965_s14, 2  ;;  %s3992_s18 = scalar_lea.sflag [#allocation6], %s3991_s16 }
 0x836   : > { %p4563_p5 = pnand %p6001_p7, %p6000_p0 }
 0x838   : > { %4940 = dma.done.wait (!%p4563_p5), %s3992_s18, 128  }
 0x839   : > { %4942 = vsyncadd (!%p4563_p5), %s3992_s18, 4294967168  ;;  %s30_s14 = sadd.s32 1, %s4965_s14   ;;  %s6002_s30 = smov %s4949_s10 }
 0x83a   : > { %p27_p1 = scmp.ge.s32.totalorder %s30_s14, 4   ;;  %s6003_s10 = smov %s4953_s11 }
 0x83b   : > { %s6004_s11 = smov %s5237_s17  ;;  %s6005_s12 = smov %s4961_s13 }
 0x83c   : > { %s6006_s13 = smov %s6008_s29  ;;  %29 = sbr.rel (!%p27_p1) target bundleno = 17 (0x11), region = 135 }
 0x843   :  { %3997 = vsyncpa [#allocation5], 1 }
 0x844   :  { %3999 = vsyncpa [#allocation5 + $0x1], 1 }
 0x845   :  { %4000 = vsyncpa [#allocation8], 1 }
 0x846   :  { %4002 = vsyncpa [#allocation8 + $0x1], 1 }
 0x847   :  { %4003 = vsyncpa [#allocation11], 1 }
 0x848   :  { %4004 = vsyncpa [#allocation14], 1 }
 0x849   :  { %4005 = vsyncpa [#allocation6], 1 }
 0x84a   :  { %4007 = vsyncpa [#allocation6 + $0x1], 1 }

</bundles_post_ra>
